<compile_context>
chip_gen: v6e
topology: v6e:2x2x1
jax: 0.10.0
libtpu: 0.0.40
codegen_flags: <defaults>
</compile_context>

<pallas_src>
import functools
import math

import jax
import jax.numpy as jnp
from jax import lax
from jax.experimental import pallas as pl
from jax.experimental.pallas import tpu as pltpu

_SUBLANE = 8


def _vmem_limit_bytes():
    # Scale the scoped-VMEM budget with the actual part (v5e/v6e: 128 MiB, v7x: 64 MiB).
    try:
        info = pltpu.get_tpu_info()
        cap = (getattr(info, "vmem_capacity_bytes", None)
               or getattr(info, "vmem_size_bytes", None))
        if cap:
            return max(32 * 1024 * 1024, min(int(cap * 0.70), 100 * 1024 * 1024))
    except Exception:
        pass
    return 48 * 1024 * 1024          # safe default: fits v7x's 64 MiB physical VMEM


_VMEM_LIMIT = _vmem_limit_bytes()
_ROW_BUDGET_FLOATS = max(256 * 1024, (_VMEM_LIMIT // 4) // 3)


def _cp(sem):
    return pltpu.CompilerParams(dimension_semantics=sem,
                                vmem_limit_bytes=_VMEM_LIMIT)


def _cdiv(a, b):
    return -(-a // b)


def _round_up(a, b):
    return _cdiv(a, b) * b


def _pick_tm(M, row_floats, min_steps=2):
    """Row-tile size: as large as the VMEM budget allows, multiple of 8 (256 when big),
    prefers an exact divisor of M (no pad copy), and keeps >=2 grid steps for v7x's 2 TCs."""
    target = max(_SUBLANE, min(4096, _ROW_BUDGET_FLOATS // max(int(row_floats), 1)))
    if target >= 512:
        target = (target // 256) * 256        # MXU-friendly row counts on v6e/v7x
    else:
        target = (target // _SUBLANE) * _SUBLANE
    target = max(_SUBLANE, target)
    cap = _round_up(M, _SUBLANE)
    if M >= 4 * _SUBLANE * min_steps:         # enough work -> keep both TensorCores busy
        cap = min(cap, _round_up(_cdiv(M, min_steps), _SUBLANE))
    target = min(target, cap)
    t = (target // _SUBLANE) * _SUBLANE
    while t >= _SUBLANE:                       # exact divisor avoids a padding copy
        if M % t == 0:
            return t
        t -= _SUBLANE
    # TODO(synk): no multiple-of-8 divisor -> the wrapper pads M up to a multiple of target.
    return target


def _pick_tq(bs, n, dx, de, dffe, dy):
    """Query-tile for the fused edge/attention kernel; budgets the live intermediates
    (ep, Y, logits, softmax, FFN hidden) as well as the double-buffered E blocks."""
    budget = (_VMEM_LIMIT // 4) // 2
    const = 2 * (de * 2 * dx + dx * de + dx * dx + 2 * de * dffe + dy * 4 * dx
                 + n * 3 * dx + 2 * n)
    avail = max(budget - const, 64 * 1024)
    per_q = n * (10 * de + 8 * dx + dffe) + 8 * dx
    limit = max(1, avail // max(per_q, 1))
    divs = [d for d in range(1, n + 1)
            if n % d == 0 and (d % _SUBLANE == 0 or d == n)]
    fit = [d for d in divs if d <= limit]
    # TODO(synk): if even the smallest legal tile exceeds the budget we still take it.
    tq = max(fit) if fit else min(divs)
    if bs * (n // tq) < 2:                     # give v7x's second TensorCore some work
        smaller = [d for d in divs if d < tq]
        if smaller:
            tq = max(smaller)
    return tq


def _flatten_rows(x):
    lead = x.shape[:-1]
    M = 1
    for d in lead:
        M *= d
    return x.reshape(M, x.shape[-1]), lead, M


def _pad_rows(x2, M, TM):
    Mp = _cdiv(M, TM) * TM
    if Mp != M:
        x2 = jnp.pad(x2, ((0, Mp - M), (0, 0)))
    return x2, Mp


def _ln(x, g, b, eps):
    mu = jnp.mean(x, axis=-1, keepdims=True)
    xc = x - mu
    var = jnp.mean(xc * xc, axis=-1, keepdims=True)
    return xc * lax.rsqrt(var + eps) * g + b


# ---------------------------------------------------------------------------
# Row-tiled matmul kernels
# ---------------------------------------------------------------------------

def _linear_kernel(x_ref, w_ref, b_ref, o_ref, *, relu):
    acc = jnp.dot(x_ref[...], w_ref[...], preferred_element_type=jnp.float32)
    acc = acc + b_ref[...]
    if relu:
        acc = jnp.maximum(acc, 0.0)
    o_ref[...] = acc.astype(o_ref.dtype)


def linear(p, x, relu=False):
    """y = x @ W + b (optional fused ReLU), row-tiled over the flattened leading dims."""
    x2, lead, M = _flatten_rows(x)
    K = x2.shape[1]
    N = p["w"].shape[1]
    TM = _pick_tm(M, K + N)
    x2, Mp = _pad_rows(x2, M, TM)
    out = pl.pallas_call(
        functools.partial(_linear_kernel, relu=relu),
        grid=(Mp // TM,),
        in_specs=[
            pl.BlockSpec((TM, K), lambda i: (i, 0)),
            pl.BlockSpec((K, N), lambda i: (0, 0)),
            pl.BlockSpec((1, N), lambda i: (0, 0)),
        ],
        out_specs=pl.BlockSpec((TM, N), lambda i: (i, 0)),
        out_shape=jax.ShapeDtypeStruct((Mp, N), jnp.float32),
        compiler_params=_cp(("parallel",)),
    )(x2, p["w"], p["b"].reshape(1, N))
    return out[:M].reshape(lead + (N,))


def _mlp2_kernel(x_ref, w1_ref, b1_ref, w2_ref, b2_ref, o_ref, *, relu1, relu2):
    h = jnp.dot(x_ref[...], w1_ref[...], preferred_element_type=jnp.float32) + b1_ref[...]
    if relu1:
        h = jnp.maximum(h, 0.0)
    o = jnp.dot(h, w2_ref[...], preferred_element_type=jnp.float32) + b2_ref[...]
    if relu2:
        o = jnp.maximum(o, 0.0)
    o_ref[...] = o.astype(o_ref.dtype)


def mlp2(p1, p2, x, relu1=True, relu2=False):
    """Fused Linear(+ReLU) -> Linear(+ReLU): one HBM round trip instead of two."""
    x2, lead, M = _flatten_rows(x)
    K = x2.shape[1]
    H = p1["w"].shape[1]
    N = p2["w"].shape[1]
    TM = _pick_tm(M, K + H + N)
    x2, Mp = _pad_rows(x2, M, TM)
    out = pl.pallas_call(
        functools.partial(_mlp2_kernel, relu1=relu1, relu2=relu2),
        grid=(Mp // TM,),
        in_specs=[
            pl.BlockSpec((TM, K), lambda i: (i, 0)),
            pl.BlockSpec((K, H), lambda i: (0, 0)),
            pl.BlockSpec((1, H), lambda i: (0, 0)),
            pl.BlockSpec((H, N), lambda i: (0, 0)),
            pl.BlockSpec((1, N), lambda i: (0, 0)),
        ],
        out_specs=pl.BlockSpec((TM, N), lambda i: (i, 0)),
        out_shape=jax.ShapeDtypeStruct((Mp, N), jnp.float32),
        compiler_params=_cp(("parallel",)),
    )(x2, p1["w"], p1["b"].reshape(1, H), p2["w"], p2["b"].reshape(1, N))
    return out[:M].reshape(lead + (N,))


def _res_ffn_ln_kernel(a_ref, b_ref, g1_ref, be1_ref, w1_ref, b1_ref,
                       w2_ref, b2_ref, g2_ref, be2_ref, o_ref, *, eps):
    h = _ln(a_ref[...] + b_ref[...], g1_ref[...], be1_ref[...], eps)
    f = jnp.maximum(jnp.dot(h, w1_ref[...], preferred_element_type=jnp.float32)
                    + b1_ref[...], 0.0)
    ff = jnp.dot(f, w2_ref[...], preferred_element_type=jnp.float32) + b2_ref[...]
    o_ref[...] = _ln(h + ff, g2_ref[...], be2_ref[...], eps).astype(o_ref.dtype)


def residual_ffn_ln(pn1, p1, p2, pn2, a, b, eps=1e-5):
    """LN2(h + Linear2(ReLU(Linear1(h)))), h = LN1(a + b): the whole post-attention
    residual/FFN block in one HBM pass (used for the X path)."""
    a2, lead, M = _flatten_rows(a)
    D = a2.shape[1]
    H = p1["w"].shape[1]
    b2 = b.reshape(M, D)
    TM = _pick_tm(M, 3 * D + H)
    a2, Mp = _pad_rows(a2, M, TM)
    b2, _ = _pad_rows(b2, M, TM)
    out = pl.pallas_call(
        functools.partial(_res_ffn_ln_kernel, eps=eps),
        grid=(Mp // TM,),
        in_specs=[
            pl.BlockSpec((TM, D), lambda i: (i, 0)),
            pl.BlockSpec((TM, D), lambda i: (i, 0)),
            pl.BlockSpec((1, D), lambda i: (0, 0)),
            pl.BlockSpec((1, D), lambda i: (0, 0)),
            pl.BlockSpec((D, H), lambda i: (0, 0)),
            pl.BlockSpec((1, H), lambda i: (0, 0)),
            pl.BlockSpec((H, D), lambda i: (0, 0)),
            pl.BlockSpec((1, D), lambda i: (0, 0)),
            pl.BlockSpec((1, D), lambda i: (0, 0)),
            pl.BlockSpec((1, D), lambda i: (0, 0)),
        ],
        out_specs=pl.BlockSpec((TM, D), lambda i: (i, 0)),
        out_shape=jax.ShapeDtypeStruct((Mp, D), jnp.float32),
        compiler_params=_cp(("parallel",)),
    )(a2, b2, pn1["g"].reshape(1, D), pn1["b"].reshape(1, D),
      p1["w"], p1["b"].reshape(1, H), p2["w"], p2["b"].reshape(1, D),
      pn2["g"].reshape(1, D), pn2["b"].reshape(1, D))
    return out[:M].reshape(lead + (D,))


# ---------------------------------------------------------------------------
# Fused NodeEdgeBlock + E-path kernel
#   one read + one write of the bs*n*n*de tensor per layer:
#   e_mul|e_add, FiLM by y, e_out, edge mask, normE1(E+newE), E-FFN, normE2,
#   masked softmax + x_out for the node update, and the Etoy statistics.
# ---------------------------------------------------------------------------

def _edge_attn_kernel(qkv_ref, e_ref, y_ref, mrow_ref, mkey_ref,
                      wye_ref, bye_ref, we_ref, be_ref, weo_ref, beo_ref,
                      wxo_ref, bxo_ref, g1_ref, be1_ref,
                      wf1_ref, bf1_ref, wf2_ref, bf2_ref, g2_ref, be2_ref,
                      eout_ref, xout_ref, estats_ref,
                      s_sum, s_sq, s_min, s_max,
                      *, dx, de, n, tq, eps):
    i = pl.program_id(1)
    nt = pl.num_programs(1)

    e2d = e_ref[0]                                   # (tq*n, de) layer-input E tile

    # ---- fused Etoy statistics (mean/min/max/std over all n*n edges) ----
    tsum = jnp.sum(e2d, axis=0, keepdims=True)
    tsq = jnp.sum(e2d * e2d, axis=0, keepdims=True)
    tmin = jnp.min(e2d, axis=0, keepdims=True)
    tmax = jnp.max(e2d, axis=0, keepdims=True)

    @pl.when(i == 0)
    def _():
        s_sum[...] = tsum
        s_sq[...] = tsq
        s_min[...] = tmin
        s_max[...] = tmax

    @pl.when(i > 0)
    def _():
        s_sum[...] += tsum
        s_sq[...] += tsq
        s_min[...] = jnp.minimum(s_min[...], tmin)
        s_max[...] = jnp.maximum(s_max[...], tmax)

    # ---- q/k/v (q sliced from the resident per-batch qkv block; no extra stream) ----
    row0 = pl.multiple_of(i * tq, tq)
    q = qkv_ref[0, pl.ds(row0, tq), :][:, 0:dx]      # (tq, dx); 1/sqrt(df) folded into q W
    kv = qkv_ref[0]                                  # (n, 3*dx)
    k = kv[:, dx:2 * dx]
    v = kv[:, 2 * dx:3 * dx]

    # fused y FiLM projection (y_e_add | y_e_mul | y_x_add | y_x_mul)
    yp = jnp.dot(y_ref[0], wye_ref[...], preferred_element_type=jnp.float32) + bye_ref[...]
    ye_add = yp[:, 0:dx]
    ye_mul = yp[:, dx:2 * dx]
    yx_add = yp[:, 2 * dx:3 * dx]
    yx_mul = yp[:, 3 * dx:4 * dx]

    mrow = mrow_ref[0]                               # (tq, 1) query-row mask
    mkey = mkey_ref[0]                               # (n, 1)  key mask

    # fused e_mul | e_add projection on the flat (tq*n, de) slab
    ep = jnp.dot(e2d, we_ref[...], preferred_element_type=jnp.float32) + be_ref[...]
    ep = ep.reshape(tq, n, 2 * dx)
    e1 = ep[:, :, 0:dx]
    e2 = ep[:, :, dx:2 * dx]

    # Y[i, j, c] = (Q[i, c]/sqrt(df)) * K[j, c], modulated by the edge features
    Y = q[:, None, :] * k[None, :, :]
    Y = Y * (e1 + 1.0) + e2                          # (tq, n, dx)

    # ---- edge update: FiLM by y, e_out, mask, then normE1 + E-FFN + normE2 ----
    newe = ye_add[None] + (ye_mul[None] + 1.0) * Y
    newe = jnp.dot(newe.reshape(tq * n, dx), weo_ref[...],
                   preferred_element_type=jnp.float32) + beo_ref[...]
    emask = mrow[:, None, :] * mkey[None, :, :]      # e_mask1 * e_mask2 computed in-kernel
    newe = (newe.reshape(tq, n, de) * emask).reshape(tq * n, de)

    h = _ln(e2d + newe, g1_ref[...], be1_ref[...], eps)            # normE1(E + newE)
    ff = jnp.maximum(jnp.dot(h, wf1_ref[...], preferred_element_type=jnp.float32)
                     + bf1_ref[...], 0.0)
    ff = jnp.dot(ff, wf2_ref[...], preferred_element_type=jnp.float32) + bf2_ref[...]
    eout_ref[0] = _ln(h + ff, g2_ref[...], be2_ref[...], eps).astype(eout_ref.dtype)

    # ---- masked softmax over keys + node update ----
    # TODO(synk): masked_softmax's all-nodes-masked fallback (mask.sum()==0) is not implemented.
    bias = (mkey[None, :, :] - 1.0) * 1e9            # 0 at valid keys, -1e9 at masked keys
    logits = Y + bias
    m = jnp.max(logits, axis=1, keepdims=True)
    pexp = jnp.exp(logits - m)
    s = jnp.sum(pexp, axis=1, keepdims=True)
    attn = pexp / s                                  # exact divide (matches reference)

    wV = jnp.sum(attn * v[None, :, :], axis=1)       # (tq, dx)
    newx = yx_add + (yx_mul + 1.0) * wV
    newx = jnp.dot(newx, wxo_ref[...], preferred_element_type=jnp.float32) + bxo_ref[...]
    xout_ref[0] = (newx * mrow).astype(xout_ref.dtype)

    # ---- finalize E statistics on the last query tile ----
    @pl.when(i == nt - 1)
    def _():
        n2 = float(n * n)
        mean = s_sum[...] * (1.0 / n2)
        var = (s_sq[...] - n2 * mean * mean) / max(n2 - 1.0, 1.0)
        std = jnp.sqrt(jnp.maximum(var, 0.0))
        estats_ref[0] = jnp.concatenate([mean, s_min[...], s_max[...], std],
                                        axis=-1).astype(estats_ref.dtype)


def edge_attention_block(qkv, E, y, node_mask, sa, lp, eps=1e-5):
    bs, n, dx3 = qkv.shape
    dx = dx3 // 3
    de = E.shape[-1]
    dffe = lp["linE1"]["w"].shape[1]
    dy = y.shape[-1]
    tq = _pick_tq(bs, n, dx, de, dffe, dy)

    e_flat = E.reshape(bs, n * n, de)                # free (row-major) reshape
    maskc = node_mask.astype(jnp.float32).reshape(bs, n, 1)
    y3 = y.reshape(bs, 1, dy)

    kernel = functools.partial(_edge_attn_kernel, dx=dx, de=de, n=n, tq=tq, eps=eps)

    def w2(shape):
        return pl.BlockSpec(shape, lambda *_: (0, 0))

    eout, xout, estats = pl.pallas_call(
        kernel,
        grid=(bs, n // tq),
        in_specs=[
            pl.BlockSpec((1, n, 3 * dx), lambda b, i: (b, 0, 0)),      # full q|k|v per batch
            pl.BlockSpec((1, tq * n, de), lambda b, i: (b, i, 0)),     # E tile (flat)
            pl.BlockSpec((1, 1, dy), lambda b, i: (b, 0, 0)),          # y (FiLM projected in-kernel)
            pl.BlockSpec((1, tq, 1), lambda b, i: (b, i, 0)),          # query-row mask
            pl.BlockSpec((1, n, 1), lambda b, i: (b, 0, 0)),           # key mask
            w2((dy, 4 * dx)), w2((1, 4 * dx)),                         # fused y FiLM W/b
            w2((de, 2 * dx)), w2((1, 2 * dx)),                         # fused e_mul|e_add W/b
            w2((dx, de)), w2((1, de)),                                 # e_out
            w2((dx, dx)), w2((1, dx)),                                 # x_out
            w2((1, de)), w2((1, de)),                                  # normE1
            w2((de, dffe)), w2((1, dffe)),                             # linE1
            w2((dffe, de)), w2((1, de)),                               # linE2
            w2((1, de)), w2((1, de)),                                  # normE2
        ],
        out_specs=[
            pl.BlockSpec((1, tq * n, de), lambda b, i: (b, i, 0)),
            pl.BlockSpec((1, tq, dx), lambda b, i: (b, i, 0)),
            pl.BlockSpec((1, 1, 4 * de), lambda b, i: (b, 0, 0)),
        ],
        out_shape=[
            jax.ShapeDtypeStruct((bs, n * n, de), jnp.float32),
            jax.ShapeDtypeStruct((bs, n, dx), jnp.float32),
            jax.ShapeDtypeStruct((bs, 1, 4 * de), jnp.float32),
        ],
        scratch_shapes=[pltpu.VMEM((1, de), jnp.float32) for _ in range(4)],
        compiler_params=_cp(("parallel", "arbitrary")),
    )(qkv, e_flat, y3, maskc, maskc,
      sa["y_ex"]["w"], sa["y_ex"]["b"].reshape(1, 4 * dx),
      sa["e_proj"]["w"], sa["e_proj"]["b"].reshape(1, 2 * dx),
      sa["e_out"]["w"], sa["e_out"]["b"].reshape(1, de),
      sa["x_out"]["w"], sa["x_out"]["b"].reshape(1, dx),
      lp["normE1"]["g"].reshape(1, de), lp["normE1"]["b"].reshape(1, de),
      lp["linE1"]["w"], lp["linE1"]["b"].reshape(1, dffe),
      lp["linE2"]["w"], lp["linE2"]["b"].reshape(1, de),
      lp["normE2"]["g"].reshape(1, de), lp["normE2"]["b"].reshape(1, de))
    return eout.reshape(bs, n, n, de), xout, estats.reshape(bs, 4 * de)


# ---------------------------------------------------------------------------
# Consolidated per-layer y path: (y_y + x_y + e_y) -> y_out MLP -> norm_y1 ->
# y FFN -> norm_y2, all in one kernel over (bs, dy) rows.
# ---------------------------------------------------------------------------

def _ypath_kernel(y_ref, z_ref, win_ref, bin_ref, wo1_ref, bo1_ref, wo2_ref, bo2_ref,
                  g1_ref, be1_ref, wf1_ref, bf1_ref, wf2_ref, bf2_ref,
                  g2_ref, be2_ref, o_ref, *, eps):
    t = jnp.dot(z_ref[...], win_ref[...], preferred_element_type=jnp.float32) + bin_ref[...]
    h = jnp.maximum(jnp.dot(t, wo1_ref[...], preferred_element_type=jnp.float32)
                    + bo1_ref[...], 0.0)
    new_y = jnp.dot(h, wo2_ref[...], preferred_element_type=jnp.float32) + bo2_ref[...]
    h1 = _ln(y_ref[...] + new_y, g1_ref[...], be1_ref[...], eps)
    f = jnp.maximum(jnp.dot(h1, wf1_ref[...], preferred_element_type=jnp.float32)
                    + bf1_ref[...], 0.0)
    ff = jnp.dot(f, wf2_ref[...], preferred_element_type=jnp.float32) + bf2_ref[...]
    o_ref[...] = _ln(h1 + ff, g2_ref[...], be2_ref[...], eps).astype(o_ref.dtype)


def y_path_block(sa, lp, y, xstats, estats, eps=1e-5):
    bs, dy = y.shape
    dffy = lp["lin_y1"]["w"].shape[1]
    z = jnp.concatenate([y, xstats, estats], axis=-1)
    K = z.shape[-1]
    # fuse the three input linears (y_y | x_y | e_y) into one wide matmul
    w_in = jnp.concatenate([sa["y_y"]["w"], sa["x_y"]["w"], sa["e_y"]["w"]], axis=0)
    b_in = (sa["y_y"]["b"] + sa["x_y"]["b"] + sa["e_y"]["b"]).reshape(1, dy)
    TM = _pick_tm(bs, K + 4 * dy + dffy)
    y2, Mp = _pad_rows(y, bs, TM)
    z2, _ = _pad_rows(z, bs, TM)
    out = pl.pallas_call(
        functools.partial(_ypath_kernel, eps=eps),
        grid=(Mp // TM,),
        in_specs=[
            pl.BlockSpec((TM, dy), lambda i: (i, 0)),
            pl.BlockSpec((TM, K), lambda i: (i, 0)),
            pl.BlockSpec((K, dy), lambda i: (0, 0)),
            pl.BlockSpec((1, dy), lambda i: (0, 0)),
            pl.BlockSpec((dy, dy), lambda i: (0, 0)),
            pl.BlockSpec((1, dy), lambda i: (0, 0)),
            pl.BlockSpec((dy, dy), lambda i: (0, 0)),
            pl.BlockSpec((1, dy), lambda i: (0, 0)),
            pl.BlockSpec((1, dy), lambda i: (0, 0)),
            pl.BlockSpec((1, dy), lambda i: (0, 0)),
            pl.BlockSpec((dy, dffy), lambda i: (0, 0)),
            pl.BlockSpec((1, dffy), lambda i: (0, 0)),
            pl.BlockSpec((dffy, dy), lambda i: (0, 0)),
            pl.BlockSpec((1, dy), lambda i: (0, 0)),
            pl.BlockSpec((1, dy), lambda i: (0, 0)),
            pl.BlockSpec((1, dy), lambda i: (0, 0)),
        ],
        out_specs=pl.BlockSpec((TM, dy), lambda i: (i, 0)),
        out_shape=jax.ShapeDtypeStruct((Mp, dy), jnp.float32),
        compiler_params=_cp(("parallel",)),
    )(y2, z2, w_in, b_in,
      sa["y_out1"]["w"], sa["y_out1"]["b"].reshape(1, dy),
      sa["y_out2"]["w"], sa["y_out2"]["b"].reshape(1, dy),
      lp["norm_y1"]["g"].reshape(1, dy), lp["norm_y1"]["b"].reshape(1, dy),
      lp["lin_y1"]["w"], lp["lin_y1"]["b"].reshape(1, dffy),
      lp["lin_y2"]["w"], lp["lin_y2"]["b"].reshape(1, dy),
      lp["norm_y2"]["g"].reshape(1, dy), lp["norm_y2"]["b"].reshape(1, dy))
    return out[:bs]


# ---------------------------------------------------------------------------
# Model (glue in plain JAX, compute in the Pallas kernels above)
# ---------------------------------------------------------------------------
# TODO(synk): all Dropout layers are treated as identity (inference mode).
# TODO(synk): AugmentedGraphFeatureEncoder (augmented_graphfeature=True) is not
#             implemented; the default MLP y-encoder path is used.
# TODO(synk): inter-layer activations are kept in f32 (bf16 HBM residency would
#             halve E-path bandwidth on v6e/v7x but changes numerics vs reference).

def xey_layer(lp, X, E, y, node_mask):
    sa = lp["self_attn"]
    qkv = linear(sa["qkv"], X)      # fused q|k|v projection (1/sqrt(df) folded into q part)
    # One pass over the n^2 edge tensor: attention + normE1 + E-FFN + normE2 + Etoy stats.
    E_new, newX, estats = edge_attention_block(qkv, E, y, node_mask, sa, lp)
    # X path: normX1(X + newX) -> FFN -> normX2, fused in one kernel.
    X_new = residual_ffn_ln(lp["normX1"], lp["linX1"], lp["linX2"], lp["normX2"], X, newX)
    # Xtoy statistics over the (small) node tensor in plain JAX (matches torch.std ddof=1).
    xstats = jnp.concatenate([jnp.mean(X, axis=1), jnp.min(X, axis=1),
                              jnp.max(X, axis=1), jnp.std(X, axis=1, ddof=1)], axis=-1)
    # Consolidated y path (y_y + x_y + e_y, y_out MLP, norm_y1, y FFN, norm_y2).
    y_new = y_path_block(sa, lp, y, xstats, estats)
    return X_new, E_new, y_new


def graph_transformer(params, cfg, X, E, y, node_mask):
    bs, n = X.shape[0], X.shape[1]
    diag_mask = (1.0 - jnp.eye(n, dtype=X.dtype))[None, :, :, None]

    X_to_out = X[..., :cfg["out_X"]]
    E_to_out = E[..., :cfg["out_E"]]
    y_to_out = y[..., :cfg["out_y"]]

    new_E = mlp2(params["mlp_in_E1"], params["mlp_in_E2"], E, relu1=True, relu2=True)
    new_E = 0.5 * (new_E + jnp.swapaxes(new_E, 1, 2))
    new_X = mlp2(params["mlp_in_X1"], params["mlp_in_X2"], X, relu1=True, relu2=True)
    new_y = mlp2(params["mlp_in_y1"], params["mlp_in_y2"], y, relu1=True, relu2=True)

    x_mask = node_mask[..., None]
    e_mask1 = x_mask[:, :, None, :]
    e_mask2 = x_mask[:, None, :, :]

    Xh = new_X * x_mask
    Eh = new_E * e_mask1 * e_mask2
    yh = new_y

    for lp in params["layers"]:
        Xh, Eh, yh = xey_layer(lp, Xh, Eh, yh, node_mask)

    Xo = mlp2(params["mlp_out_X1"], params["mlp_out_X2"], Xh, relu1=True, relu2=False)
    Eo = mlp2(params["mlp_out_E1"], params["mlp_out_E2"], Eh, relu1=True, relu2=False)
    yo = mlp2(params["mlp_out_y1"], params["mlp_out_y2"], yh, relu1=True, relu2=False)

    Xo = Xo + X_to_out
    Eo = Eo + E_to_out
    yo = yo + y_to_out

    Eo = Eo * diag_mask
    Eo = 0.5 * (Eo + jnp.swapaxes(Eo, 1, 2))

    # PlaceHolder.mask
    Xo = Xo * x_mask
    Eo = Eo * e_mask1 * e_mask2
    return Xo, Eo, yo


# ---------------------------------------------------------------------------
# Deterministic parameter init (PyTorch nn.Linear-style uniform), with the
# q|k|v, e_mul|e_add and y-FiLM projections fused into wide weights.
# ---------------------------------------------------------------------------

def make_linear(key, d_in, d_out):
    kw, kb = jax.random.split(key)
    bound = 1.0 / math.sqrt(d_in)
    return {
        "w": jax.random.uniform(kw, (d_in, d_out), jnp.float32, -bound, bound),
        "b": jax.random.uniform(kb, (d_out,), jnp.float32, -bound, bound),
    }


def make_ln(d):
    return {"g": jnp.ones((d,), jnp.float32), "b": jnp.zeros((d,), jnp.float32)}


def init_params(key, n_layers, input_dims, hidden_mlp_dims, hidden_dims,
                output_dims, dim_ffy=2048):
    dx, de, dy = hidden_dims["dx"], hidden_dims["de"], hidden_dims["dy"]
    n_head = hidden_dims["n_head"]
    inv_sqrt_df = 1.0 / math.sqrt(dx // n_head)
    it = iter(jax.random.split(key, 256))
    nk = lambda: next(it)
    P = {
        "mlp_in_X1": make_linear(nk(), input_dims["X"], hidden_mlp_dims["X"]),
        "mlp_in_X2": make_linear(nk(), hidden_mlp_dims["X"], dx),
        "mlp_in_E1": make_linear(nk(), input_dims["E"], hidden_mlp_dims["E"]),
        "mlp_in_E2": make_linear(nk(), hidden_mlp_dims["E"], de),
        "mlp_in_y1": make_linear(nk(), input_dims["y"], hidden_mlp_dims["y"]),
        "mlp_in_y2": make_linear(nk(), hidden_mlp_dims["y"], dy),
        "mlp_out_X1": make_linear(nk(), dx, hidden_mlp_dims["X"]),
        "mlp_out_X2": make_linear(nk(), hidden_mlp_dims["X"], output_dims["X"]),
        "mlp_out_E1": make_linear(nk(), de, hidden_mlp_dims["E"]),
        "mlp_out_E2": make_linear(nk(), hidden_mlp_dims["E"], output_dims["E"]),
        "mlp_out_y1": make_linear(nk(), dy, hidden_mlp_dims["y"]),
        "mlp_out_y2": make_linear(nk(), hidden_mlp_dims["y"], output_dims["y"]),
        "layers": [],
    }
    for _ in range(n_layers):
        qkv = make_linear(nk(), dx, 3 * dx)
        qscale = jnp.concatenate([jnp.full((dx,), inv_sqrt_df, jnp.float32),
                                  jnp.ones((2 * dx,), jnp.float32)])
        qkv = {"w": qkv["w"] * qscale[None, :], "b": qkv["b"] * qscale}
        sa = {
            "qkv": qkv,                                   # q | k | v  (dx -> 3dx)
            "e_proj": make_linear(nk(), de, 2 * dx),      # e_mul | e_add  (de -> 2dx)
            "y_ex": make_linear(nk(), dy, 4 * dx),        # y_e_add|y_e_mul|y_x_add|y_x_mul
            "y_y": make_linear(nk(), dy, dy),
            "x_y": make_linear(nk(), 4 * dx, dy),
            "e_y": make_linear(nk(), 4 * de, dy),
            "x_out": make_linear(nk(), dx, dx),
            "e_out": make_linear(nk(), dx, de),
            "y_out1": make_linear(nk(), dy, dy),
            "y_out2": make_linear(nk(), dy, dy),
        }
        layer = {
            "self_attn": sa,
            "linX1": make_linear(nk(), dx, hidden_dims["dim_ffX"]),
            "linX2": make_linear(nk(), hidden_dims["dim_ffX"], dx),
            "normX1": make_ln(dx), "normX2": make_ln(dx),
            "linE1": make_linear(nk(), de, hidden_dims["dim_ffE"]),
            "linE2": make_linear(nk(), hidden_dims["dim_ffE"], de),
            "normE1": make_ln(de), "normE2": make_ln(de),
            # GraphTransformer does not pass dim_ffy -> XEyTransformerLayer default 2048
            "lin_y1": make_linear(nk(), dy, dim_ffy),
            "lin_y2": make_linear(nk(), dim_ffy, dy),
            "norm_y1": make_ln(dy), "norm_y2": make_ln(dy),
        }
        P["layers"].append(layer)
    return P


# ---------------------------------------------------------------------------
# main
# ---------------------------------------------------------------------------

if __name__ == "__main__":
    input_dims = {"X": 4, "E": 2, "y": 3}
    hidden_mlp_dims = {"X": 32, "E": 16, "y": 16}
    hidden_dims = {"dx": 32, "de": 16, "dy": 16, "n_head": 4,
                   "dim_ffX": 64, "dim_ffE": 32}
    output_dims = {"X": 4, "E": 2, "y": 3}
    n_layers = 2
    bs, n = 2, 8

    key = jax.random.PRNGKey(0)
    kp, kx, ke, ky = jax.random.split(key, 4)
    params = init_params(kp, n_layers, input_dims, hidden_mlp_dims,
                         hidden_dims, output_dims)

    X = jax.random.normal(kx, (bs, n, input_dims["X"]), jnp.float32)
    E0 = jax.random.normal(ke, (bs, n, n, input_dims["E"]), jnp.float32)
    E = 0.5 * (E0 + jnp.swapaxes(E0, 1, 2))           # symmetric edge features
    y = jax.random.normal(ky, (bs, input_dims["y"]), jnp.float32)
    node_mask = jnp.array([[1, 1, 1, 1, 1, 1, 1, 1],
                           [1, 1, 1, 1, 1, 0, 0, 0]], dtype=jnp.float32)

    cfg = {"out_X": output_dims["X"], "out_E": output_dims["E"], "out_y": output_dims["y"]}

    fwd = jax.jit(lambda prm, X_, E_, y_, m_: graph_transformer(prm, cfg, X_, E_, y_, m_))
    Xo, Eo, yo = fwd(params, X, E, y, node_mask)
    jax.block_until_ready((Xo, Eo, yo))

    assert Xo.shape == (bs, n, output_dims["X"])
    assert Eo.shape == (bs, n, n, output_dims["E"])
    assert yo.shape == (bs, output_dims["y"])
    assert bool(jnp.all(jnp.isfinite(Xo))) and bool(jnp.all(jnp.isfinite(Eo))) \
        and bool(jnp.all(jnp.isfinite(yo)))
    # structural invariants of the reference forward pass
    assert float(jnp.max(jnp.abs(Eo - jnp.swapaxes(Eo, 1, 2)))) < 1e-5          # symmetric E
    assert float(jnp.max(jnp.abs(Eo[:, jnp.arange(n), jnp.arange(n), :]))) < 1e-6  # zero diagonal
    assert float(jnp.max(jnp.abs(Xo[1, 5:, :]))) < 1e-6                          # masked nodes zeroed
    assert float(jnp.max(jnp.abs(Eo[1, 5:, :, :]))) < 1e-6
    assert float(jnp.max(jnp.abs(Eo[1, :, 5:, :]))) < 1e-6
    print("KERNEL_OK")
</pallas_src>

<mosaic_0001>
module attributes {stable_mosaic.version = 11 : i64} {
  func.func @_mlp2_kernel(%arg0: i32, %arg1: memref<16x4xf32, #tpu.memory_space<vmem>>, %arg2: memref<4x32xf32, #tpu.memory_space<vmem>>, %arg3: memref<1x32xf32, #tpu.memory_space<vmem>>, %arg4: memref<32x32xf32, #tpu.memory_space<vmem>>, %arg5: memref<1x32xf32, #tpu.memory_space<vmem>>, %arg6: memref<16x32xf32, #tpu.memory_space<vmem>>) attributes {dimension_semantics = [#tpu.dimension_semantics<parallel>], iteration_bounds = array<i64: 1>, scalar_prefetch = 0 : i64, scratch_operands = 0 : i64, tpu.core_type = #tpu.core_type<tc>, window_params = [{transform_indices = @transform_0, window_bounds = array<i64: 16, 4>}, {pipeline_mode = #tpu.pipeline_mode<synchronous>, transform_indices = @transform_1, window_bounds = array<i64: 4, 32>}, {pipeline_mode = #tpu.pipeline_mode<synchronous>, transform_indices = @transform_2, window_bounds = array<i64: 1, 32>}, {pipeline_mode = #tpu.pipeline_mode<synchronous>, transform_indices = @transform_3, window_bounds = array<i64: 32, 32>}, {pipeline_mode = #tpu.pipeline_mode<synchronous>, transform_indices = @transform_4, window_bounds = array<i64: 1, 32>}, {transform_indices = @transform_5, window_bounds = array<i64: 16, 32>}]} {
    %c0 = arith.constant 0 : index
    %c0_0 = arith.constant 0 : index
    %0 = vector.load %arg1[%c0, %c0_0] : memref<16x4xf32, #tpu.memory_space<vmem>>, vector<16x4xf32>
    %c0_1 = arith.constant 0 : index
    %c0_2 = arith.constant 0 : index
    %1 = vector.load %arg2[%c0_1, %c0_2] : memref<4x32xf32, #tpu.memory_space<vmem>>, vector<4x32xf32>
    %cst = arith.constant dense<0.000000e+00> : vector<16x32xf32>
    %2 = tpu.matmul %0, %1, %cst {dimension_numbers = #tpu.dot_dimension_numbers<[1], [0], [0], [1], [0, 0, 1, 1], [], []>} : vector<16x4xf32>, vector<4x32xf32>, vector<16x32xf32> -> vector<16x32xf32>
    %c0_3 = arith.constant 0 : index
    %c0_4 = arith.constant 0 : index
    %3 = vector.load %arg3[%c0_3, %c0_4] : memref<1x32xf32, #tpu.memory_space<vmem>>, vector<1x32xf32>
    %4 = vector.broadcast %3 : vector<1x32xf32> to vector<16x32xf32>
    %5 = arith.addf %2, %4 : vector<16x32xf32>
    %cst_5 = arith.constant 0.000000e+00 : f32
    %6 = vector.broadcast %cst_5 : f32 to vector<16x32xf32>
    %7 = arith.maximumf %5, %6 : vector<16x32xf32>
    %c0_6 = arith.constant 0 : index
    %c0_7 = arith.constant 0 : index
    %8 = vector.load %arg4[%c0_6, %c0_7] : memref<32x32xf32, #tpu.memory_space<vmem>>, vector<32x32xf32>
    %cst_8 = arith.constant dense<0.000000e+00> : vector<16x32xf32>
    %9 = tpu.matmul %7, %8, %cst_8 {dimension_numbers = #tpu.dot_dimension_numbers<[1], [0], [0], [1], [0, 0, 1, 1], [], []>} : vector<16x32xf32>, vector<32x32xf32>, vector<16x32xf32> -> vector<16x32xf32>
    %c0_9 = arith.constant 0 : index
    %c0_10 = arith.constant 0 : index
    %10 = vector.load %arg5[%c0_9, %c0_10] : memref<1x32xf32, #tpu.memory_space<vmem>>, vector<1x32xf32>
    %11 = vector.broadcast %10 : vector<1x32xf32> to vector<16x32xf32>
    %12 = arith.addf %9, %11 : vector<16x32xf32>
    %cst_11 = arith.constant 0.000000e+00 : f32
    %13 = vector.broadcast %cst_11 : f32 to vector<16x32xf32>
    %14 = arith.maximumf %12, %13 : vector<16x32xf32>
    %c0_12 = arith.constant 0 : index
    %c0_13 = arith.constant 0 : index
    %15 = vector.load %arg6[%c0_12, %c0_13] : memref<16x32xf32, #tpu.memory_space<vmem>>, vector<16x32xf32>
    tpu.vector_store %arg6[%c0_12, %c0_13], %14 {strides = array<i32>} : memref<16x32xf32, #tpu.memory_space<vmem>>, vector<16x32xf32>,
    return
  }
  func.func @transform_0(%arg0: i32) -> (i32, i32) {
    %c0_i32 = arith.constant 0 : i32
    %c0_i32_0 = arith.constant 0 : i32
    return %arg0, %c0_i32 : i32, i32
  }
  func.func @transform_1(%arg0: i32) -> (i32, i32) {
    %c0_i32 = arith.constant 0 : i32
    %c0_i32_0 = arith.constant 0 : i32
    %c0_i32_1 = arith.constant 0 : i32
    return %c0_i32, %c0_i32_0 : i32, i32
  }
  func.func @transform_2(%arg0: i32) -> (i32, i32) {
    %c0_i32 = arith.constant 0 : i32
    %c0_i32_0 = arith.constant 0 : i32
    %c0_i32_1 = arith.constant 0 : i32
    return %c0_i32, %c0_i32_0 : i32, i32
  }
  func.func @transform_3(%arg0: i32) -> (i32, i32) {
    %c0_i32 = arith.constant 0 : i32
    %c0_i32_0 = arith.constant 0 : i32
    %c0_i32_1 = arith.constant 0 : i32
    return %c0_i32, %c0_i32_0 : i32, i32
  }
  func.func @transform_4(%arg0: i32) -> (i32, i32) {
    %c0_i32 = arith.constant 0 : i32
    %c0_i32_0 = arith.constant 0 : i32
    %c0_i32_1 = arith.constant 0 : i32
    return %c0_i32, %c0_i32_0 : i32, i32
  }
  func.func @transform_5(%arg0: i32) -> (i32, i32) {
    %c0_i32 = arith.constant 0 : i32
    %c0_i32_0 = arith.constant 0 : i32
    return %arg0, %c0_i32 : i32, i32
  }
}

module attributes {stable_mosaic.version = 11 : i64} {
  func.func @_linear_kernel(%arg0: i32, %arg1: memref<16x32xf32, #tpu.memory_space<vmem>>, %arg2: memref<32x96xf32, #tpu.memory_space<vmem>>, %arg3: memref<1x96xf32, #tpu.memory_space<vmem>>, %arg4: memref<16x96xf32, #tpu.memory_space<vmem>>) attributes {dimension_semantics = [#tpu.dimension_semantics<parallel>], iteration_bounds = array<i64: 1>, scalar_prefetch = 0 : i64, scratch_operands = 0 : i64, tpu.core_type = #tpu.core_type<tc>, window_params = [{transform_indices = @transform_0, window_bounds = array<i64: 16, 32>}, {pipeline_mode = #tpu.pipeline_mode<synchronous>, transform_indices = @transform_1, window_bounds = array<i64: 32, 96>}, {pipeline_mode = #tpu.pipeline_mode<synchronous>, transform_indices = @transform_2, window_bounds = array<i64: 1, 96>}, {transform_indices = @transform_3, window_bounds = array<i64: 16, 96>}]} {
    %c0 = arith.constant 0 : index
    %c0_0 = arith.constant 0 : index
    %0 = vector.load %arg1[%c0, %c0_0] : memref<16x32xf32, #tpu.memory_space<vmem>>, vector<16x32xf32>
    %c0_1 = arith.constant 0 : index
    %c0_2 = arith.constant 0 : index
    %1 = vector.load %arg2[%c0_1, %c0_2] : memref<32x96xf32, #tpu.memory_space<vmem>>, vector<32x96xf32>
    %cst = arith.constant dense<0.000000e+00> : vector<16x96xf32>
    %2 = tpu.matmul %0, %1, %cst {dimension_numbers = #tpu.dot_dimension_numbers<[1], [0], [0], [1], [0, 0, 1, 1], [], []>} : vector<16x32xf32>, vector<32x96xf32>, vector<16x96xf32> -> vector<16x96xf32>
    %c0_3 = arith.constant 0 : index
    %c0_4 = arith.constant 0 : index
    %3 = vector.load %arg3[%c0_3, %c0_4] : memref<1x96xf32, #tpu.memory_space<vmem>>, vector<1x96xf32>
    %4 = vector.broadcast %3 : vector<1x96xf32> to vector<16x96xf32>
    %5 = arith.addf %2, %4 : vector<16x96xf32>
    %c0_5 = arith.constant 0 : index
    %c0_6 = arith.constant 0 : index
    %6 = vector.load %arg4[%c0_5, %c0_6] : memref<16x96xf32, #tpu.memory_space<vmem>>, vector<16x96xf32>
    tpu.vector_store %arg4[%c0_5, %c0_6], %5 {strides = array<i32>} : memref<16x96xf32, #tpu.memory_space<vmem>>, vector<16x96xf32>,
    return
  }
  func.func @transform_0(%arg0: i32) -> (i32, i32) {
    %c0_i32 = arith.constant 0 : i32
    %c0_i32_0 = arith.constant 0 : i32
    return %arg0, %c0_i32 : i32, i32
  }
  func.func @transform_1(%arg0: i32) -> (i32, i32) {
    %c0_i32 = arith.constant 0 : i32
    %c0_i32_0 = arith.constant 0 : i32
    %c0_i32_1 = arith.constant 0 : i32
    return %c0_i32, %c0_i32_0 : i32, i32
  }
  func.func @transform_2(%arg0: i32) -> (i32, i32) {
    %c0_i32 = arith.constant 0 : i32
    %c0_i32_0 = arith.constant 0 : i32
    %c0_i32_1 = arith.constant 0 : i32
    return %c0_i32, %c0_i32_0 : i32, i32
  }
  func.func @transform_3(%arg0: i32) -> (i32, i32) {
    %c0_i32 = arith.constant 0 : i32
    %c0_i32_0 = arith.constant 0 : i32
    return %arg0, %c0_i32 : i32, i32
  }
}

module attributes {stable_mosaic.version = 11 : i64} {
  func.func @_mlp2_kernel(%arg0: i32, %arg1: memref<64x2xf32, #tpu.memory_space<vmem>>, %arg2: memref<2x16xf32, #tpu.memory_space<vmem>>, %arg3: memref<1x16xf32, #tpu.memory_space<vmem>>, %arg4: memref<16x16xf32, #tpu.memory_space<vmem>>, %arg5: memref<1x16xf32, #tpu.memory_space<vmem>>, %arg6: memref<64x16xf32, #tpu.memory_space<vmem>>) attributes {dimension_semantics = [#tpu.dimension_semantics<parallel>], iteration_bounds = array<i64: 2>, scalar_prefetch = 0 : i64, scratch_operands = 0 : i64, tpu.core_type = #tpu.core_type<tc>, window_params = [{transform_indices = @transform_0, window_bounds = array<i64: 64, 2>}, {pipeline_mode = #tpu.pipeline_mode<synchronous>, transform_indices = @transform_1, window_bounds = array<i64: 2, 16>}, {pipeline_mode = #tpu.pipeline_mode<synchronous>, transform_indices = @transform_2, window_bounds = array<i64: 1, 16>}, {pipeline_mode = #tpu.pipeline_mode<synchronous>, transform_indices = @transform_3, window_bounds = array<i64: 16, 16>}, {pipeline_mode = #tpu.pipeline_mode<synchronous>, transform_indices = @transform_4, window_bounds = array<i64: 1, 16>}, {transform_indices = @transform_5, window_bounds = array<i64: 64, 16>}]} {
    %c0 = arith.constant 0 : index
    %c0_0 = arith.constant 0 : index
    %0 = vector.load %arg1[%c0, %c0_0] : memref<64x2xf32, #tpu.memory_space<vmem>>, vector<64x2xf32>
    %c0_1 = arith.constant 0 : index
    %c0_2 = arith.constant 0 : index
    %1 = vector.load %arg2[%c0_1, %c0_2] : memref<2x16xf32, #tpu.memory_space<vmem>>, vector<2x16xf32>
    %cst = arith.constant dense<0.000000e+00> : vector<64x16xf32>
    %2 = tpu.matmul %0, %1, %cst {dimension_numbers = #tpu.dot_dimension_numbers<[1], [0], [0], [1], [0, 0, 1, 1], [], []>} : vector<64x2xf32>, vector<2x16xf32>, vector<64x16xf32> -> vector<64x16xf32>
    %c0_3 = arith.constant 0 : index
    %c0_4 = arith.constant 0 : index
    %3 = vector.load %arg3[%c0_3, %c0_4] : memref<1x16xf32, #tpu.memory_space<vmem>>, vector<1x16xf32>
    %4 = vector.broadcast %3 : vector<1x16xf32> to vector<64x16xf32>
    %5 = arith.addf %2, %4 : vector<64x16xf32>
    %cst_5 = arith.constant 0.000000e+00 : f32
    %6 = vector.broadcast %cst_5 : f32 to vector<64x16xf32>
    %7 = arith.maximumf %5, %6 : vector<64x16xf32>
    %c0_6 = arith.constant 0 : index
    %c0_7 = arith.constant 0 : index
    %8 = vector.load %arg4[%c0_6, %c0_7] : memref<16x16xf32, #tpu.memory_space<vmem>>, vector<16x16xf32>
    %cst_8 = arith.constant dense<0.000000e+00> : vector<64x16xf32>
    %9 = tpu.matmul %7, %8, %cst_8 {dimension_numbers = #tpu.dot_dimension_numbers<[1], [0], [0], [1], [0, 0, 1, 1], [], []>} : vector<64x16xf32>, vector<16x16xf32>, vector<64x16xf32> -> vector<64x16xf32>
    %c0_9 = arith.constant 0 : index
    %c0_10 = arith.constant 0 : index
    %10 = vector.load %arg5[%c0_9, %c0_10] : memref<1x16xf32, #tpu.memory_space<vmem>>, vector<1x16xf32>
    %11 = vector.broadcast %10 : vector<1x16xf32> to vector<64x16xf32>
    %12 = arith.addf %9, %11 : vector<64x16xf32>
    %cst_11 = arith.constant 0.000000e+00 : f32
    %13 = vector.broadcast %cst_11 : f32 to vector<64x16xf32>
    %14 = arith.maximumf %12, %13 : vector<64x16xf32>
    %c0_12 = arith.constant 0 : index
    %c0_13 = arith.constant 0 : index
    %15 = vector.load %arg6[%c0_12, %c0_13] : memref<64x16xf32, #tpu.memory_space<vmem>>, vector<64x16xf32>
    tpu.vector_store %arg6[%c0_12, %c0_13], %14 {strides = array<i32>} : memref<64x16xf32, #tpu.memory_space<vmem>>, vector<64x16xf32>,
    return
  }
  func.func @transform_0(%arg0: i32) -> (i32, i32) {
    %c0_i32 = arith.constant 0 : i32
    %c0_i32_0 = arith.constant 0 : i32
    return %arg0, %c0_i32 : i32, i32
  }
  func.func @transform_1(%arg0: i32) -> (i32, i32) {
    %c0_i32 = arith.constant 0 : i32
    %c0_i32_0 = arith.constant 0 : i32
    %c0_i32_1 = arith.constant 0 : i32
    return %c0_i32, %c0_i32_0 : i32, i32
  }
  func.func @transform_2(%arg0: i32) -> (i32, i32) {
    %c0_i32 = arith.constant 0 : i32
    %c0_i32_0 = arith.constant 0 : i32
    %c0_i32_1 = arith.constant 0 : i32
    return %c0_i32, %c0_i32_0 : i32, i32
  }
  func.func @transform_3(%arg0: i32) -> (i32, i32) {
    %c0_i32 = arith.constant 0 : i32
    %c0_i32_0 = arith.constant 0 : i32
    %c0_i32_1 = arith.constant 0 : i32
    return %c0_i32, %c0_i32_0 : i32, i32
  }
  func.func @transform_4(%arg0: i32) -> (i32, i32) {
    %c0_i32 = arith.constant 0 : i32
    %c0_i32_0 = arith.constant 0 : i32
    %c0_i32_1 = arith.constant 0 : i32
    return %c0_i32, %c0_i32_0 : i32, i32
  }
  func.func @transform_5(%arg0: i32) -> (i32, i32) {
    %c0_i32 = arith.constant 0 : i32
    %c0_i32_0 = arith.constant 0 : i32
    return %arg0, %c0_i32 : i32, i32
  }
}

module attributes {stable_mosaic.version = 11 : i64} {
  func.func @_mlp2_kernel(%arg0: i32, %arg1: memref<8x3xf32, #tpu.memory_space<vmem>>, %arg2: memref<3x16xf32, #tpu.memory_space<vmem>>, %arg3: memref<1x16xf32, #tpu.memory_space<vmem>>, %arg4: memref<16x16xf32, #tpu.memory_space<vmem>>, %arg5: memref<1x16xf32, #tpu.memory_space<vmem>>, %arg6: memref<8x16xf32, #tpu.memory_space<vmem>>) attributes {dimension_semantics = [#tpu.dimension_semantics<parallel>], iteration_bounds = array<i64: 1>, scalar_prefetch = 0 : i64, scratch_operands = 0 : i64, tpu.core_type = #tpu.core_type<tc>, window_params = [{transform_indices = @transform_0, window_bounds = array<i64: 8, 3>}, {pipeline_mode = #tpu.pipeline_mode<synchronous>, transform_indices = @transform_1, window_bounds = array<i64: 3, 16>}, {pipeline_mode = #tpu.pipeline_mode<synchronous>, transform_indices = @transform_2, window_bounds = array<i64: 1, 16>}, {pipeline_mode = #tpu.pipeline_mode<synchronous>, transform_indices = @transform_3, window_bounds = array<i64: 16, 16>}, {pipeline_mode = #tpu.pipeline_mode<synchronous>, transform_indices = @transform_4, window_bounds = array<i64: 1, 16>}, {transform_indices = @transform_5, window_bounds = array<i64: 8, 16>}]} {
    %c0 = arith.constant 0 : index
    %c0_0 = arith.constant 0 : index
    %0 = vector.load %arg1[%c0, %c0_0] : memref<8x3xf32, #tpu.memory_space<vmem>>, vector<8x3xf32>
    %c0_1 = arith.constant 0 : index
    %c0_2 = arith.constant 0 : index
    %1 = vector.load %arg2[%c0_1, %c0_2] : memref<3x16xf32, #tpu.memory_space<vmem>>, vector<3x16xf32>
    %cst = arith.constant dense<0.000000e+00> : vector<8x16xf32>
    %2 = tpu.matmul %0, %1, %cst {dimension_numbers = #tpu.dot_dimension_numbers<[1], [0], [0], [1], [0, 0, 1, 1], [], []>} : vector<8x3xf32>, vector<3x16xf32>, vector<8x16xf32> -> vector<8x16xf32>
    %c0_3 = arith.constant 0 : index
    %c0_4 = arith.constant 0 : index
    %3 = vector.load %arg3[%c0_3, %c0_4] : memref<1x16xf32, #tpu.memory_space<vmem>>, vector<1x16xf32>
    %4 = vector.broadcast %3 : vector<1x16xf32> to vector<8x16xf32>
    %5 = arith.addf %2, %4 : vector<8x16xf32>
    %cst_5 = arith.constant 0.000000e+00 : f32
    %6 = vector.broadcast %cst_5 : f32 to vector<8x16xf32>
    %7 = arith.maximumf %5, %6 : vector<8x16xf32>
    %c0_6 = arith.constant 0 : index
    %c0_7 = arith.constant 0 : index
    %8 = vector.load %arg4[%c0_6, %c0_7] : memref<16x16xf32, #tpu.memory_space<vmem>>, vector<16x16xf32>
    %cst_8 = arith.constant dense<0.000000e+00> : vector<8x16xf32>
    %9 = tpu.matmul %7, %8, %cst_8 {dimension_numbers = #tpu.dot_dimension_numbers<[1], [0], [0], [1], [0, 0, 1, 1], [], []>} : vector<8x16xf32>, vector<16x16xf32>, vector<8x16xf32> -> vector<8x16xf32>
    %c0_9 = arith.constant 0 : index
    %c0_10 = arith.constant 0 : index
    %10 = vector.load %arg5[%c0_9, %c0_10] : memref<1x16xf32, #tpu.memory_space<vmem>>, vector<1x16xf32>
    %11 = vector.broadcast %10 : vector<1x16xf32> to vector<8x16xf32>
    %12 = arith.addf %9, %11 : vector<8x16xf32>
    %cst_11 = arith.constant 0.000000e+00 : f32
    %13 = vector.broadcast %cst_11 : f32 to vector<8x16xf32>
    %14 = arith.maximumf %12, %13 : vector<8x16xf32>
    %c0_12 = arith.constant 0 : index
    %c0_13 = arith.constant 0 : index
    %15 = vector.load %arg6[%c0_12, %c0_13] : memref<8x16xf32, #tpu.memory_space<vmem>>, vector<8x16xf32>
    tpu.vector_store %arg6[%c0_12, %c0_13], %14 {strides = array<i32>} : memref<8x16xf32, #tpu.memory_space<vmem>>, vector<8x16xf32>,
    return
  }
  func.func @transform_0(%arg0: i32) -> (i32, i32) {
    %c0_i32 = arith.constant 0 : i32
    %c0_i32_0 = arith.constant 0 : i32
    return %arg0, %c0_i32 : i32, i32
  }
  func.func @transform_1(%arg0: i32) -> (i32, i32) {
    %c0_i32 = arith.constant 0 : i32
    %c0_i32_0 = arith.constant 0 : i32
    %c0_i32_1 = arith.constant 0 : i32
    return %c0_i32, %c0_i32_0 : i32, i32
  }
  func.func @transform_2(%arg0: i32) -> (i32, i32) {
    %c0_i32 = arith.constant 0 : i32
    %c0_i32_0 = arith.constant 0 : i32
    %c0_i32_1 = arith.constant 0 : i32
    return %c0_i32, %c0_i32_0 : i32, i32
  }
  func.func @transform_3(%arg0: i32) -> (i32, i32) {
    %c0_i32 = arith.constant 0 : i32
    %c0_i32_0 = arith.constant 0 : i32
    %c0_i32_1 = arith.constant 0 : i32
    return %c0_i32, %c0_i32_0 : i32, i32
  }
  func.func @transform_4(%arg0: i32) -> (i32, i32) {
    %c0_i32 = arith.constant 0 : i32
    %c0_i32_0 = arith.constant 0 : i32
    %c0_i32_1 = arith.constant 0 : i32
    return %c0_i32, %c0_i32_0 : i32, i32
  }
  func.func @transform_5(%arg0: i32) -> (i32, i32) {
    %c0_i32 = arith.constant 0 : i32
    %c0_i32_0 = arith.constant 0 : i32
    return %arg0, %c0_i32 : i32, i32
  }
}

module attributes {stable_mosaic.version = 11 : i64} {
  func.func @_res_ffn_ln_kernel(%arg0: i32, %arg1: memref<16x32xf32, #tpu.memory_space<vmem>>, %arg2: memref<16x32xf32, #tpu.memory_space<vmem>>, %arg3: memref<1x32xf32, #tpu.memory_space<vmem>>, %arg4: memref<1x32xf32, #tpu.memory_space<vmem>>, %arg5: memref<32x64xf32, #tpu.memory_space<vmem>>, %arg6: memref<1x64xf32, #tpu.memory_space<vmem>>, %arg7: memref<64x32xf32, #tpu.memory_space<vmem>>, %arg8: memref<1x32xf32, #tpu.memory_space<vmem>>, %arg9: memref<1x32xf32, #tpu.memory_space<vmem>>, %arg10: memref<1x32xf32, #tpu.memory_space<vmem>>, %arg11: memref<16x32xf32, #tpu.memory_space<vmem>>) attributes {dimension_semantics = [#tpu.dimension_semantics<parallel>], iteration_bounds = array<i64: 1>, scalar_prefetch = 0 : i64, scratch_operands = 0 : i64, tpu.core_type = #tpu.core_type<tc>, window_params = [{transform_indices = @transform_0, window_bounds = array<i64: 16, 32>}, {transform_indices = @transform_1, window_bounds = array<i64: 16, 32>}, {pipeline_mode = #tpu.pipeline_mode<synchronous>, transform_indices = @transform_2, window_bounds = array<i64: 1, 32>}, {pipeline_mode = #tpu.pipeline_mode<synchronous>, transform_indices = @transform_3, window_bounds = array<i64: 1, 32>}, {pipeline_mode = #tpu.pipeline_mode<synchronous>, transform_indices = @transform_4, window_bounds = array<i64: 32, 64>}, {pipeline_mode = #tpu.pipeline_mode<synchronous>, transform_indices = @transform_5, window_bounds = array<i64: 1, 64>}, {pipeline_mode = #tpu.pipeline_mode<synchronous>, transform_indices = @transform_6, window_bounds = array<i64: 64, 32>}, {pipeline_mode = #tpu.pipeline_mode<synchronous>, transform_indices = @transform_7, window_bounds = array<i64: 1, 32>}, {pipeline_mode = #tpu.pipeline_mode<synchronous>, transform_indices = @transform_8, window_bounds = array<i64: 1, 32>}, {pipeline_mode = #tpu.pipeline_mode<synchronous>, transform_indices = @transform_9, window_bounds = array<i64: 1, 32>}, {transform_indices = @transform_10, window_bounds = array<i64: 16, 32>}]} {
    %c0 = arith.constant 0 : index
    %c0_0 = arith.constant 0 : index
    %0 = vector.load %arg1[%c0, %c0_0] : memref<16x32xf32, #tpu.memory_space<vmem>>, vector<16x32xf32>
    %c0_1 = arith.constant 0 : index
    %c0_2 = arith.constant 0 : index
    %1 = vector.load %arg2[%c0_1, %c0_2] : memref<16x32xf32, #tpu.memory_space<vmem>>, vector<16x32xf32>
    %2 = arith.addf %0, %1 : vector<16x32xf32>
    %c0_3 = arith.constant 0 : index
    %c0_4 = arith.constant 0 : index
    %3 = vector.load %arg3[%c0_3, %c0_4] : memref<1x32xf32, #tpu.memory_space<vmem>>, vector<1x32xf32>
    %c0_5 = arith.constant 0 : index
    %c0_6 = arith.constant 0 : index
    %4 = vector.load %arg4[%c0_5, %c0_6] : memref<1x32xf32, #tpu.memory_space<vmem>>, vector<1x32xf32>
    %cst = arith.constant dense<0.000000e+00> : vector<16xf32>
    %5 = vector.multi_reduction <add>, %2, %cst [1] : vector<16x32xf32> to vector<16xf32>
    %6 = vector.shape_cast %5 : vector<16xf32> to vector<16x1xf32>
    %cst_7 = arith.constant 3.200000e+01 : f32
    %7 = vector.broadcast %cst_7 : f32 to vector<16x1xf32>
    %8 = arith.divf %6, %7 : vector<16x1xf32>
    %9 = vector.broadcast %8 : vector<16x1xf32> to vector<16x32xf32>
    %10 = arith.subf %2, %9 : vector<16x32xf32>
    %11 = arith.mulf %10, %10 : vector<16x32xf32>
    %cst_8 = arith.constant dense<0.000000e+00> : vector<16xf32>
    %12 = vector.multi_reduction <add>, %11, %cst_8 [1] : vector<16x32xf32> to vector<16xf32>
    %13 = vector.shape_cast %12 : vector<16xf32> to vector<16x1xf32>
    %cst_9 = arith.constant 3.200000e+01 : f32
    %14 = vector.broadcast %cst_9 : f32 to vector<16x1xf32>
    %15 = arith.divf %13, %14 : vector<16x1xf32>
    %cst_10 = arith.constant 9.99999974E-6 : f32
    %16 = vector.broadcast %cst_10 : f32 to vector<16x1xf32>
    %17 = arith.addf %15, %16 : vector<16x1xf32>
    %18 = math.rsqrt %17 : vector<16x1xf32>
    %19 = vector.broadcast %18 : vector<16x1xf32> to vector<16x32xf32>
    %20 = arith.mulf %10, %19 : vector<16x32xf32>
    %21 = vector.broadcast %3 : vector<1x32xf32> to vector<16x32xf32>
    %22 = arith.mulf %20, %21 : vector<16x32xf32>
    %23 = vector.broadcast %4 : vector<1x32xf32> to vector<16x32xf32>
    %24 = arith.addf %22, %23 : vector<16x32xf32>
    %c0_11 = arith.constant 0 : index
    %c0_12 = arith.constant 0 : index
    %25 = vector.load %arg5[%c0_11, %c0_12] : memref<32x64xf32, #tpu.memory_space<vmem>>, vector<32x64xf32>
    %cst_13 = arith.constant dense<0.000000e+00> : vector<16x64xf32>
    %26 = tpu.matmul %24, %25, %cst_13 {dimension_numbers = #tpu.dot_dimension_numbers<[1], [0], [0], [1], [0, 0, 1, 1], [], []>} : vector<16x32xf32>, vector<32x64xf32>, vector<16x64xf32> -> vector<16x64xf32>
    %c0_14 = arith.constant 0 : index
    %c0_15 = arith.constant 0 : index
    %27 = vector.load %arg6[%c0_14, %c0_15] : memref<1x64xf32, #tpu.memory_space<vmem>>, vector<1x64xf32>
    %28 = vector.broadcast %27 : vector<1x64xf32> to vector<16x64xf32>
    %29 = arith.addf %26, %28 : vector<16x64xf32>
    %cst_16 = arith.constant 0.000000e+00 : f32
    %30 = vector.broadcast %cst_16 : f32 to vector<16x64xf32>
    %31 = arith.maximumf %29, %30 : vector<16x64xf32>
    %c0_17 = arith.constant 0 : index
    %c0_18 = arith.constant 0 : index
    %32 = vector.load %arg7[%c0_17, %c0_18] : memref<64x32xf32, #tpu.memory_space<vmem>>, vector<64x32xf32>
    %cst_19 = arith.constant dense<0.000000e+00> : vector<16x32xf32>
    %33 = tpu.matmul %31, %32, %cst_19 {dimension_numbers = #tpu.dot_dimension_numbers<[1], [0], [0], [1], [0, 0, 1, 1], [], []>} : vector<16x64xf32>, vector<64x32xf32>, vector<16x32xf32> -> vector<16x32xf32>
    %c0_20 = arith.constant 0 : index
    %c0_21 = arith.constant 0 : index
    %34 = vector.load %arg8[%c0_20, %c0_21] : memref<1x32xf32, #tpu.memory_space<vmem>>, vector<1x32xf32>
    %35 = vector.broadcast %34 : vector<1x32xf32> to vector<16x32xf32>
    %36 = arith.addf %33, %35 : vector<16x32xf32>
    %37 = arith.addf %24, %36 : vector<16x32xf32>
    %c0_22 = arith.constant 0 : index
    %c0_23 = arith.constant 0 : index
    %38 = vector.load %arg9[%c0_22, %c0_23] : memref<1x32xf32, #tpu.memory_space<vmem>>, vector<1x32xf32>
    %c0_24 = arith.constant 0 : index
    %c0_25 = arith.constant 0 : index
    %39 = vector.load %arg10[%c0_24, %c0_25] : memref<1x32xf32, #tpu.memory_space<vmem>>, vector<1x32xf32>
    %cst_26 = arith.constant dense<0.000000e+00> : vector<16xf32>
    %40 = vector.multi_reduction <add>, %37, %cst_26 [1] : vector<16x32xf32> to vector<16xf32>
    %41 = vector.shape_cast %40 : vector<16xf32> to vector<16x1xf32>
    %cst_27 = arith.constant 3.200000e+01 : f32
    %42 = vector.broadcast %cst_27 : f32 to vector<16x1xf32>
    %43 = arith.divf %41, %42 : vector<16x1xf32>
    %44 = vector.broadcast %43 : vector<16x1xf32> to vector<16x32xf32>
    %45 = arith.subf %37, %44 : vector<16x32xf32>
    %46 = arith.mulf %45, %45 : vector<16x32xf32>
    %cst_28 = arith.constant dense<0.000000e+00> : vector<16xf32>
    %47 = vector.multi_reduction <add>, %46, %cst_28 [1] : vector<16x32xf32> to vector<16xf32>
    %48 = vector.shape_cast %47 : vector<16xf32> to vector<16x1xf32>
    %cst_29 = arith.constant 3.200000e+01 : f32
    %49 = vector.broadcast %cst_29 : f32 to vector<16x1xf32>
    %50 = arith.divf %48, %49 : vector<16x1xf32>
    %cst_30 = arith.constant 9.99999974E-6 : f32
    %51 = vector.broadcast %cst_30 : f32 to vector<16x1xf32>
    %52 = arith.addf %50, %51 : vector<16x1xf32>
    %53 = math.rsqrt %52 : vector<16x1xf32>
    %54 = vector.broadcast %53 : vector<16x1xf32> to vector<16x32xf32>
    %55 = arith.mulf %45, %54 : vector<16x32xf32>
    %56 = vector.broadcast %38 : vector<1x32xf32> to vector<16x32xf32>
    %57 = arith.mulf %55, %56 : vector<16x32xf32>
    %58 = vector.broadcast %39 : vector<1x32xf32> to vector<16x32xf32>
    %59 = arith.addf %57, %58 : vector<16x32xf32>
    %c0_31 = arith.constant 0 : index
    %c0_32 = arith.constant 0 : index
    %60 = vector.load %arg11[%c0_31, %c0_32] : memref<16x32xf32, #tpu.memory_space<vmem>>, vector<16x32xf32>
    tpu.vector_store %arg11[%c0_31, %c0_32], %59 {strides = array<i32>} : memref<16x32xf32, #tpu.memory_space<vmem>>, vector<16x32xf32>,
    return
  }
  func.func @transform_0(%arg0: i32) -> (i32, i32) {
    %c0_i32 = arith.constant 0 : i32
    %c0_i32_0 = arith.constant 0 : i32
    return %arg0, %c0_i32 : i32, i32
  }
  func.func @transform_1(%arg0: i32) -> (i32, i32) {
    %c0_i32 = arith.constant 0 : i32
    %c0_i32_0 = arith.constant 0 : i32
    return %arg0, %c0_i32 : i32, i32
  }
  func.func @transform_2(%arg0: i32) -> (i32, i32) {
    %c0_i32 = arith.constant 0 : i32
    %c0_i32_0 = arith.constant 0 : i32
    %c0_i32_1 = arith.constant 0 : i32
    return %c0_i32, %c0_i32_0 : i32, i32
  }
  func.func @transform_3(%arg0: i32) -> (i32, i32) {
    %c0_i32 = arith.constant 0 : i32
    %c0_i32_0 = arith.constant 0 : i32
    %c0_i32_1 = arith.constant 0 : i32
    return %c0_i32, %c0_i32_0 : i32, i32
  }
  func.func @transform_4(%arg0: i32) -> (i32, i32) {
    %c0_i32 = arith.constant 0 : i32
    %c0_i32_0 = arith.constant 0 : i32
    %c0_i32_1 = arith.constant 0 : i32
    return %c0_i32, %c0_i32_0 : i32, i32
  }
  func.func @transform_5(%arg0: i32) -> (i32, i32) {
    %c0_i32 = arith.constant 0 : i32
    %c0_i32_0 = arith.constant 0 : i32
    %c0_i32_1 = arith.constant 0 : i32
    return %c0_i32, %c0_i32_0 : i32, i32
  }
  func.func @transform_6(%arg0: i32) -> (i32, i32) {
    %c0_i32 = arith.constant 0 : i32
    %c0_i32_0 = arith.constant 0 : i32
    %c0_i32_1 = arith.constant 0 : i32
    return %c0_i32, %c0_i32_0 : i32, i32
  }
  func.func @transform_7(%arg0: i32) -> (i32, i32) {
    %c0_i32 = arith.constant 0 : i32
    %c0_i32_0 = arith.constant 0 : i32
    %c0_i32_1 = arith.constant 0 : i32
    return %c0_i32, %c0_i32_0 : i32, i32
  }
  func.func @transform_8(%arg0: i32) -> (i32, i32) {
    %c0_i32 = arith.constant 0 : i32
    %c0_i32_0 = arith.constant 0 : i32
    %c0_i32_1 = arith.constant 0 : i32
    return %c0_i32, %c0_i32_0 : i32, i32
  }
  func.func @transform_9(%arg0: i32) -> (i32, i32) {
    %c0_i32 = arith.constant 0 : i32
    %c0_i32_0 = arith.constant 0 : i32
    %c0_i32_1 = arith.constant 0 : i32
    return %c0_i32, %c0_i32_0 : i32, i32
  }
  func.func @transform_10(%arg0: i32) -> (i32, i32) {
    %c0_i32 = arith.constant 0 : i32
    %c0_i32_0 = arith.constant 0 : i32
    return %arg0, %c0_i32 : i32, i32
  }
}

module attributes {stable_mosaic.version = 11 : i64} {
  func.func @_edge_attn_kernel(%arg0: i32, %arg1: i32, %arg2: memref<1x8x96xf32, #tpu.memory_space<vmem>>, %arg3: memref<1x64x16xf32, #tpu.memory_space<vmem>>, %arg4: memref<1x1x16xf32, #tpu.memory_space<vmem>>, %arg5: memref<1x8x1xf32, #tpu.memory_space<vmem>>, %arg6: memref<1x8x1xf32, #tpu.memory_space<vmem>>, %arg7: memref<16x128xf32, #tpu.memory_space<vmem>>, %arg8: memref<1x128xf32, #tpu.memory_space<vmem>>, %arg9: memref<16x64xf32, #tpu.memory_space<vmem>>, %arg10: memref<1x64xf32, #tpu.memory_space<vmem>>, %arg11: memref<32x16xf32, #tpu.memory_space<vmem>>, %arg12: memref<1x16xf32, #tpu.memory_space<vmem>>, %arg13: memref<32x32xf32, #tpu.memory_space<vmem>>, %arg14: memref<1x32xf32, #tpu.memory_space<vmem>>, %arg15: memref<1x16xf32, #tpu.memory_space<vmem>>, %arg16: memref<1x16xf32, #tpu.memory_space<vmem>>, %arg17: memref<16x32xf32, #tpu.memory_space<vmem>>, %arg18: memref<1x32xf32, #tpu.memory_space<vmem>>, %arg19: memref<32x16xf32, #tpu.memory_space<vmem>>, %arg20: memref<1x16xf32, #tpu.memory_space<vmem>>, %arg21: memref<1x16xf32, #tpu.memory_space<vmem>>, %arg22: memref<1x16xf32, #tpu.memory_space<vmem>>, %arg23: memref<1x64x16xf32, #tpu.memory_space<vmem>>, %arg24: memref<1x8x32xf32, #tpu.memory_space<vmem>>, %arg25: memref<1x1x64xf32, #tpu.memory_space<vmem>>, %arg26: memref<1x16xf32, #tpu.memory_space<vmem>>, %arg27: memref<1x16xf32, #tpu.memory_space<vmem>>, %arg28: memref<1x16xf32, #tpu.memory_space<vmem>>, %arg29: memref<1x16xf32, #tpu.memory_space<vmem>>) attributes {dimension_semantics = [#tpu.dimension_semantics<parallel>, #tpu.dimension_semantics<arbitrary>], iteration_bounds = array<i64: 2, 1>, scalar_prefetch = 0 : i64, scratch_operands = 4 : i64, tpu.core_type = #tpu.core_type<tc>, window_params = [{transform_indices = @transform_0, window_bounds = array<i64: 1, 8, 96>}, {transform_indices = @transform_1, window_bounds = array<i64: 1, 64, 16>}, {transform_indices = @transform_2, window_bounds = array<i64: 1, 1, 16>}, {transform_indices = @transform_3, window_bounds = array<i64: 1, 8, 1>}, {transform_indices = @transform_4, window_bounds = array<i64: 1, 8, 1>}, {pipeline_mode = #tpu.pipeline_mode<synchronous>, transform_indices = @transform_5, window_bounds = array<i64: 16, 128>}, {pipeline_mode = #tpu.pipeline_mode<synchronous>, transform_indices = @transform_6, window_bounds = array<i64: 1, 128>}, {pipeline_mode = #tpu.pipeline_mode<synchronous>, transform_indices = @transform_7, window_bounds = array<i64: 16, 64>}, {pipeline_mode = #tpu.pipeline_mode<synchronous>, transform_indices = @transform_8, window_bounds = array<i64: 1, 64>}, {pipeline_mode = #tpu.pipeline_mode<synchronous>, transform_indices = @transform_9, window_bounds = array<i64: 32, 16>}, {pipeline_mode = #tpu.pipeline_mode<synchronous>, transform_indices = @transform_10, window_bounds = array<i64: 1, 16>}, {pipeline_mode = #tpu.pipeline_mode<synchronous>, transform_indices = @transform_11, window_bounds = array<i64: 32, 32>}, {pipeline_mode = #tpu.pipeline_mode<synchronous>, transform_indices = @transform_12, window_bounds = array<i64: 1, 32>}, {pipeline_mode = #tpu.pipeline_mode<synchronous>, transform_indices = @transform_13, window_bounds = array<i64: 1, 16>}, {pipeline_mode = #tpu.pipeline_mode<synchronous>, transform_indices = @transform_14, window_bounds = array<i64: 1, 16>}, {pipeline_mode = #tpu.pipeline_mode<synchronous>, transform_indices = @transform_15, window_bounds = array<i64: 16, 32>}, {pipeline_mode = #tpu.pipeline_mode<synchronous>, transform_indices = @transform_16, window_bounds = array<i64: 1, 32>}, {pipeline_mode = #tpu.pipeline_mode<synchronous>, transform_indices = @transform_17, window_bounds = array<i64: 32, 16>}, {pipeline_mode = #tpu.pipeline_mode<synchronous>, transform_indices = @transform_18, window_bounds = array<i64: 1, 16>}, {pipeline_mode = #tpu.pipeline_mode<synchronous>, transform_indices = @transform_19, window_bounds = array<i64: 1, 16>}, {pipeline_mode = #tpu.pipeline_mode<synchronous>, transform_indices = @transform_20, window_bounds = array<i64: 1, 16>}, {transform_indices = @transform_21, window_bounds = array<i64: 1, 64, 16>}, {transform_indices = @transform_22, window_bounds = array<i64: 1, 8, 32>}, {transform_indices = @transform_23, window_bounds = array<i64: 1, 1, 64>}]} {
    %c0 = arith.constant 0 : index
    %c0_0 = arith.constant 0 : index
    %c0_1 = arith.constant 0 : index
    %0 = vector.load %arg3[%c0, %c0_0, %c0_1] : memref<1x64x16xf32, #tpu.memory_space<vmem>>, vector<1x64x16xf32>
    %1 = vector.shape_cast %0 : vector<1x64x16xf32> to vector<64x16xf32>
    %cst = arith.constant dense<0.000000e+00> : vector<16xf32>
    %2 = vector.multi_reduction <add>, %1, %cst [0] : vector<64x16xf32> to vector<16xf32>
    %3 = vector.shape_cast %2 : vector<16xf32> to vector<1x16xf32>
    %4 = arith.mulf %1, %1 : vector<64x16xf32>
    %cst_2 = arith.constant dense<0.000000e+00> : vector<16xf32>
    %5 = vector.multi_reduction <add>, %4, %cst_2 [0] : vector<64x16xf32> to vector<16xf32>
    %6 = vector.shape_cast %5 : vector<16xf32> to vector<1x16xf32>
    %cst_3 = arith.constant dense<0x7F800000> : vector<16xf32>
    %7 = vector.multi_reduction <minimumf>, %1, %cst_3 [0] : vector<64x16xf32> to vector<16xf32>
    %8 = vector.shape_cast %7 : vector<16xf32> to vector<1x16xf32>
    %cst_4 = arith.constant dense<0xFF800000> : vector<16xf32>
    %9 = vector.multi_reduction <maximumf>, %1, %cst_4 [0] : vector<64x16xf32> to vector<16xf32>
    %10 = vector.shape_cast %9 : vector<16xf32> to vector<1x16xf32>
    %c0_i32 = arith.constant 0 : i32
    %11 = arith.cmpi eq, %arg1, %c0_i32 : i32
    %12 = arith.extui %11 : i1 to i32
    %c0_i32_5 = arith.constant 0 : i32
    %13 = arith.cmpi ne, %12, %c0_i32_5 : i32
    scf.if %13 {
      %c0_87 = arith.constant 0 : index
      %c0_88 = arith.constant 0 : index
      %181 = vector.load %arg26[%c0_87, %c0_88] : memref<1x16xf32, #tpu.memory_space<vmem>>, vector<1x16xf32>
      tpu.vector_store %arg26[%c0_87, %c0_88], %3 {strides = array<i32>} : memref<1x16xf32, #tpu.memory_space<vmem>>, vector<1x16xf32>,
      %c0_89 = arith.constant 0 : index
      %c0_90 = arith.constant 0 : index
      %182 = vector.load %arg27[%c0_89, %c0_90] : memref<1x16xf32, #tpu.memory_space<vmem>>, vector<1x16xf32>
      tpu.vector_store %arg27[%c0_89, %c0_90], %6 {strides = array<i32>} : memref<1x16xf32, #tpu.memory_space<vmem>>, vector<1x16xf32>,
      %c0_91 = arith.constant 0 : index
      %c0_92 = arith.constant 0 : index
      %183 = vector.load %arg28[%c0_91, %c0_92] : memref<1x16xf32, #tpu.memory_space<vmem>>, vector<1x16xf32>
      tpu.vector_store %arg28[%c0_91, %c0_92], %8 {strides = array<i32>} : memref<1x16xf32, #tpu.memory_space<vmem>>, vector<1x16xf32>,
      %c0_93 = arith.constant 0 : index
      %c0_94 = arith.constant 0 : index
      %184 = vector.load %arg29[%c0_93, %c0_94] : memref<1x16xf32, #tpu.memory_space<vmem>>, vector<1x16xf32>
      tpu.vector_store %arg29[%c0_93, %c0_94], %10 {strides = array<i32>} : memref<1x16xf32, #tpu.memory_space<vmem>>, vector<1x16xf32>,
    } else {
    }
    %c0_i32_6 = arith.constant 0 : i32
    %14 = arith.cmpi sgt, %arg1, %c0_i32_6 : i32
    %15 = arith.extui %14 : i1 to i32
    %c0_i32_7 = arith.constant 0 : i32
    %16 = arith.cmpi ne, %15, %c0_i32_7 : i32
    scf.if %16 {
      %c0_87 = arith.constant 0 : index
      %c0_88 = arith.constant 0 : index
      %181 = vector.load %arg26[%c0_87, %c0_88] : memref<1x16xf32, #tpu.memory_space<vmem>>, vector<1x16xf32>
      %182 = arith.addf %181, %3 : vector<1x16xf32>
      %c0_89 = arith.constant 0 : index
      %c0_90 = arith.constant 0 : index
      %183 = vector.load %arg26[%c0_89, %c0_90] : memref<1x16xf32, #tpu.memory_space<vmem>>, vector<1x16xf32>
      tpu.vector_store %arg26[%c0_89, %c0_90], %182 {strides = array<i32>} : memref<1x16xf32, #tpu.memory_space<vmem>>, vector<1x16xf32>,
      %c0_91 = arith.constant 0 : index
      %c0_92 = arith.constant 0 : index
      %184 = vector.load %arg27[%c0_91, %c0_92] : memref<1x16xf32, #tpu.memory_space<vmem>>, vector<1x16xf32>
      %185 = arith.addf %184, %6 : vector<1x16xf32>
      %c0_93 = arith.constant 0 : index
      %c0_94 = arith.constant 0 : index
      %186 = vector.load %arg27[%c0_93, %c0_94] : memref<1x16xf32, #tpu.memory_space<vmem>>, vector<1x16xf32>
      tpu.vector_store %arg27[%c0_93, %c0_94], %185 {strides = array<i32>} : memref<1x16xf32, #tpu.memory_space<vmem>>, vector<1x16xf32>,
      %c0_95 = arith.constant 0 : index
      %c0_96 = arith.constant 0 : index
      %187 = vector.load %arg28[%c0_95, %c0_96] : memref<1x16xf32, #tpu.memory_space<vmem>>, vector<1x16xf32>
      %188 = arith.minimumf %187, %8 : vector<1x16xf32>
      %c0_97 = arith.constant 0 : index
      %c0_98 = arith.constant 0 : index
      %189 = vector.load %arg28[%c0_97, %c0_98] : memref<1x16xf32, #tpu.memory_space<vmem>>, vector<1x16xf32>
      tpu.vector_store %arg28[%c0_97, %c0_98], %188 {strides = array<i32>} : memref<1x16xf32, #tpu.memory_space<vmem>>, vector<1x16xf32>,
      %c0_99 = arith.constant 0 : index
      %c0_100 = arith.constant 0 : index
      %190 = vector.load %arg29[%c0_99, %c0_100] : memref<1x16xf32, #tpu.memory_space<vmem>>, vector<1x16xf32>
      %191 = arith.maximumf %190, %10 : vector<1x16xf32>
      %c0_101 = arith.constant 0 : index
      %c0_102 = arith.constant 0 : index
      %192 = vector.load %arg29[%c0_101, %c0_102] : memref<1x16xf32, #tpu.memory_space<vmem>>, vector<1x16xf32>
      tpu.vector_store %arg29[%c0_101, %c0_102], %191 {strides = array<i32>} : memref<1x16xf32, #tpu.memory_space<vmem>>, vector<1x16xf32>,
    } else {
    }
    %c8_i32 = arith.constant 8 : i32
    %17 = arith.muli %arg1, %c8_i32 : i32
    %18 = tpu.assume_multiple %17, 8 : i32
    %c0_8 = arith.constant 0 : index
    %19 = arith.index_cast %18 : i32 to index
    %c0_9 = arith.constant 0 : index
    %20 = vector.load %arg2[%c0_8, %19, %c0_9] : memref<1x8x96xf32, #tpu.memory_space<vmem>>, vector<1x8x96xf32>
    %21 = vector.shape_cast %20 : vector<1x8x96xf32> to vector<8x96xf32>
    %22 = vector.extract_strided_slice %21 {offsets = [0, 0], sizes = [8, 32], strides = [1, 1]} : vector<8x96xf32> to vector<8x32xf32>
    %c0_10 = arith.constant 0 : index
    %c0_11 = arith.constant 0 : index
    %c0_12 = arith.constant 0 : index
    %23 = vector.load %arg2[%c0_10, %c0_11, %c0_12] : memref<1x8x96xf32, #tpu.memory_space<vmem>>, vector<1x8x96xf32>
    %24 = vector.shape_cast %23 : vector<1x8x96xf32> to vector<8x96xf32>
    %25 = vector.extract_strided_slice %24 {offsets = [0, 32], sizes = [8, 32], strides = [1, 1]} : vector<8x96xf32> to vector<8x32xf32>
    %26 = vector.extract_strided_slice %24 {offsets = [0, 64], sizes = [8, 32], strides = [1, 1]} : vector<8x96xf32> to vector<8x32xf32>
    %c0_13 = arith.constant 0 : index
    %c0_14 = arith.constant 0 : index
    %c0_15 = arith.constant 0 : index
    %27 = vector.load %arg4[%c0_13, %c0_14, %c0_15] : memref<1x1x16xf32, #tpu.memory_space<vmem>>, vector<1x1x16xf32>
    %28 = vector.shape_cast %27 : vector<1x1x16xf32> to vector<1x16xf32>
    %c0_16 = arith.constant 0 : index
    %c0_17 = arith.constant 0 : index
    %29 = vector.load %arg7[%c0_16, %c0_17] : memref<16x128xf32, #tpu.memory_space<vmem>>, vector<16x128xf32>
    %cst_18 = arith.constant dense<0.000000e+00> : vector<1x128xf32>
    %30 = tpu.matmul %28, %29, %cst_18 {dimension_numbers = #tpu.dot_dimension_numbers<[1], [0], [0], [1], [0, 0, 1, 1], [], []>} : vector<1x16xf32>, vector<16x128xf32>, vector<1x128xf32> -> vector<1x128xf32>
    %c0_19 = arith.constant 0 : index
    %c0_20 = arith.constant 0 : index
    %31 = vector.load %arg8[%c0_19, %c0_20] : memref<1x128xf32, #tpu.memory_space<vmem>>, vector<1x128xf32>
    %32 = arith.addf %30, %31 : vector<1x128xf32>
    %33 = vector.extract_strided_slice %32 {offsets = [0, 0], sizes = [1, 32], strides = [1, 1]} : vector<1x128xf32> to vector<1x32xf32>
    %34 = vector.extract_strided_slice %32 {offsets = [0, 32], sizes = [1, 32], strides = [1, 1]} : vector<1x128xf32> to vector<1x32xf32>
    %35 = vector.extract_strided_slice %32 {offsets = [0, 64], sizes = [1, 32], strides = [1, 1]} : vector<1x128xf32> to vector<1x32xf32>
    %36 = vector.extract_strided_slice %32 {offsets = [0, 96], sizes = [1, 32], strides = [1, 1]} : vector<1x128xf32> to vector<1x32xf32>
    %c0_21 = arith.constant 0 : index
    %c0_22 = arith.constant 0 : index
    %c0_23 = arith.constant 0 : index
    %37 = vector.load %arg5[%c0_21, %c0_22, %c0_23] : memref<1x8x1xf32, #tpu.memory_space<vmem>>, vector<1x8x1xf32>
    %38 = vector.shape_cast %37 : vector<1x8x1xf32> to vector<8x1xf32>
    %c0_24 = arith.constant 0 : index
    %c0_25 = arith.constant 0 : index
    %c0_26 = arith.constant 0 : index
    %39 = vector.load %arg6[%c0_24, %c0_25, %c0_26] : memref<1x8x1xf32, #tpu.memory_space<vmem>>, vector<1x8x1xf32>
    %40 = vector.shape_cast %39 : vector<1x8x1xf32> to vector<8x1xf32>
    %c0_27 = arith.constant 0 : index
    %c0_28 = arith.constant 0 : index
    %41 = vector.load %arg9[%c0_27, %c0_28] : memref<16x64xf32, #tpu.memory_space<vmem>>, vector<16x64xf32>
    %cst_29 = arith.constant dense<0.000000e+00> : vector<64x64xf32>
    %42 = tpu.matmul %1, %41, %cst_29 {dimension_numbers = #tpu.dot_dimension_numbers<[1], [0], [0], [1], [0, 0, 1, 1], [], []>} : vector<64x16xf32>, vector<16x64xf32>, vector<64x64xf32> -> vector<64x64xf32>
    %c0_30 = arith.constant 0 : index
    %c0_31 = arith.constant 0 : index
    %43 = vector.load %arg10[%c0_30, %c0_31] : memref<1x64xf32, #tpu.memory_space<vmem>>, vector<1x64xf32>
    %44 = vector.broadcast %43 : vector<1x64xf32> to vector<64x64xf32>
    %45 = arith.addf %42, %44 : vector<64x64xf32>
    %46 = vector.shape_cast %45 : vector<64x64xf32> to vector<8x8x64xf32>
    %47 = vector.extract_strided_slice %46 {offsets = [0, 0, 0], sizes = [8, 8, 32], strides = [1, 1, 1]} : vector<8x8x64xf32> to vector<8x8x32xf32>
    %48 = vector.extract_strided_slice %46 {offsets = [0, 0, 32], sizes = [8, 8, 32], strides = [1, 1, 1]} : vector<8x8x64xf32> to vector<8x8x32xf32>
    %49 = vector.shape_cast %22 : vector<8x32xf32> to vector<8x1x32xf32>
    %50 = vector.shape_cast %25 : vector<8x32xf32> to vector<1x8x32xf32>
    %51 = vector.broadcast %49 : vector<8x1x32xf32> to vector<8x8x32xf32>
    %52 = vector.broadcast %50 : vector<1x8x32xf32> to vector<8x8x32xf32>
    %53 = arith.mulf %51, %52 : vector<8x8x32xf32>
    %cst_32 = arith.constant 1.000000e+00 : f32
    %54 = vector.broadcast %cst_32 : f32 to vector<8x8x32xf32>
    %55 = arith.addf %47, %54 : vector<8x8x32xf32>
    %56 = arith.mulf %53, %55 : vector<8x8x32xf32>
    %57 = arith.addf %56, %48 : vector<8x8x32xf32>
    %58 = vector.shape_cast %33 : vector<1x32xf32> to vector<1x1x32xf32>
    %59 = vector.shape_cast %34 : vector<1x32xf32> to vector<1x1x32xf32>
    %cst_33 = arith.constant 1.000000e+00 : f32
    %60 = vector.broadcast %cst_33 : f32 to vector<1x1x32xf32>
    %61 = arith.addf %59, %60 : vector<1x1x32xf32>
    %62 = vector.broadcast %61 : vector<1x1x32xf32> to vector<8x8x32xf32>
    %63 = arith.mulf %62, %57 : vector<8x8x32xf32>
    %64 = vector.broadcast %58 : vector<1x1x32xf32> to vector<8x8x32xf32>
    %65 = arith.addf %64, %63 : vector<8x8x32xf32>
    %66 = vector.shape_cast %65 : vector<8x8x32xf32> to vector<64x32xf32>
    %c0_34 = arith.constant 0 : index
    %c0_35 = arith.constant 0 : index
    %67 = vector.load %arg11[%c0_34, %c0_35] : memref<32x16xf32, #tpu.memory_space<vmem>>, vector<32x16xf32>
    %cst_36 = arith.constant dense<0.000000e+00> : vector<64x16xf32>
    %68 = tpu.matmul %66, %67, %cst_36 {dimension_numbers = #tpu.dot_dimension_numbers<[1], [0], [0], [1], [0, 0, 1, 1], [], []>} : vector<64x32xf32>, vector<32x16xf32>, vector<64x16xf32> -> vector<64x16xf32>
    %c0_37 = arith.constant 0 : index
    %c0_38 = arith.constant 0 : index
    %69 = vector.load %arg12[%c0_37, %c0_38] : memref<1x16xf32, #tpu.memory_space<vmem>>, vector<1x16xf32>
    %70 = vector.broadcast %69 : vector<1x16xf32> to vector<64x16xf32>
    %71 = arith.addf %68, %70 : vector<64x16xf32>
    %72 = vector.shape_cast %38 : vector<8x1xf32> to vector<8x1x1xf32>
    %73 = vector.shape_cast %40 : vector<8x1xf32> to vector<1x8x1xf32>
    %74 = vector.broadcast %72 : vector<8x1x1xf32> to vector<8x8x1xf32>
    %75 = vector.broadcast %73 : vector<1x8x1xf32> to vector<8x8x1xf32>
    %76 = arith.mulf %74, %75 : vector<8x8x1xf32>
    %77 = vector.shape_cast %71 : vector<64x16xf32> to vector<8x8x16xf32>
    %78 = vector.broadcast %76 : vector<8x8x1xf32> to vector<8x8x16xf32>
    %79 = arith.mulf %77, %78 : vector<8x8x16xf32>
    %80 = vector.shape_cast %79 : vector<8x8x16xf32> to vector<64x16xf32>
    %81 = arith.addf %1, %80 : vector<64x16xf32>
    %c0_39 = arith.constant 0 : index
    %c0_40 = arith.constant 0 : index
    %82 = vector.load %arg15[%c0_39, %c0_40] : memref<1x16xf32, #tpu.memory_space<vmem>>, vector<1x16xf32>
    %c0_41 = arith.constant 0 : index
    %c0_42 = arith.constant 0 : index
    %83 = vector.load %arg16[%c0_41, %c0_42] : memref<1x16xf32, #tpu.memory_space<vmem>>, vector<1x16xf32>
    %cst_43 = arith.constant dense<0.000000e+00> : vector<64xf32>
    %84 = vector.multi_reduction <add>, %81, %cst_43 [1] : vector<64x16xf32> to vector<64xf32>
    %85 = vector.shape_cast %84 : vector<64xf32> to vector<64x1xf32>
    %cst_44 = arith.constant 1.600000e+01 : f32
    %86 = vector.broadcast %cst_44 : f32 to vector<64x1xf32>
    %87 = arith.divf %85, %86 : vector<64x1xf32>
    %88 = vector.broadcast %87 : vector<64x1xf32> to vector<64x16xf32>
    %89 = arith.subf %81, %88 : vector<64x16xf32>
    %90 = arith.mulf %89, %89 : vector<64x16xf32>
    %cst_45 = arith.constant dense<0.000000e+00> : vector<64xf32>
    %91 = vector.multi_reduction <add>, %90, %cst_45 [1] : vector<64x16xf32> to vector<64xf32>
    %92 = vector.shape_cast %91 : vector<64xf32> to vector<64x1xf32>
    %cst_46 = arith.constant 1.600000e+01 : f32
    %93 = vector.broadcast %cst_46 : f32 to vector<64x1xf32>
    %94 = arith.divf %92, %93 : vector<64x1xf32>
    %cst_47 = arith.constant 9.99999974E-6 : f32
    %95 = vector.broadcast %cst_47 : f32 to vector<64x1xf32>
    %96 = arith.addf %94, %95 : vector<64x1xf32>
    %97 = math.rsqrt %96 : vector<64x1xf32>
    %98 = vector.broadcast %97 : vector<64x1xf32> to vector<64x16xf32>
    %99 = arith.mulf %89, %98 : vector<64x16xf32>
    %100 = vector.broadcast %82 : vector<1x16xf32> to vector<64x16xf32>
    %101 = arith.mulf %99, %100 : vector<64x16xf32>
    %102 = vector.broadcast %83 : vector<1x16xf32> to vector<64x16xf32>
    %103 = arith.addf %101, %102 : vector<64x16xf32>
    %c0_48 = arith.constant 0 : index
    %c0_49 = arith.constant 0 : index
    %104 = vector.load %arg17[%c0_48, %c0_49] : memref<16x32xf32, #tpu.memory_space<vmem>>, vector<16x32xf32>
    %cst_50 = arith.constant dense<0.000000e+00> : vector<64x32xf32>
    %105 = tpu.matmul %103, %104, %cst_50 {dimension_numbers = #tpu.dot_dimension_numbers<[1], [0], [0], [1], [0, 0, 1, 1], [], []>} : vector<64x16xf32>, vector<16x32xf32>, vector<64x32xf32> -> vector<64x32xf32>
    %c0_51 = arith.constant 0 : index
    %c0_52 = arith.constant 0 : index
    %106 = vector.load %arg18[%c0_51, %c0_52] : memref<1x32xf32, #tpu.memory_space<vmem>>, vector<1x32xf32>
    %107 = vector.broadcast %106 : vector<1x32xf32> to vector<64x32xf32>
    %108 = arith.addf %105, %107 : vector<64x32xf32>
    %cst_53 = arith.constant 0.000000e+00 : f32
    %109 = vector.broadcast %cst_53 : f32 to vector<64x32xf32>
    %110 = arith.maximumf %108, %109 : vector<64x32xf32>
    %c0_54 = arith.constant 0 : index
    %c0_55 = arith.constant 0 : index
    %111 = vector.load %arg19[%c0_54, %c0_55] : memref<32x16xf32, #tpu.memory_space<vmem>>, vector<32x16xf32>
    %cst_56 = arith.constant dense<0.000000e+00> : vector<64x16xf32>
    %112 = tpu.matmul %110, %111, %cst_56 {dimension_numbers = #tpu.dot_dimension_numbers<[1], [0], [0], [1], [0, 0, 1, 1], [], []>} : vector<64x32xf32>, vector<32x16xf32>, vector<64x16xf32> -> vector<64x16xf32>
    %c0_57 = arith.constant 0 : index
    %c0_58 = arith.constant 0 : index
    %113 = vector.load %arg20[%c0_57, %c0_58] : memref<1x16xf32, #tpu.memory_space<vmem>>, vector<1x16xf32>
    %114 = vector.broadcast %113 : vector<1x16xf32> to vector<64x16xf32>
    %115 = arith.addf %112, %114 : vector<64x16xf32>
    %116 = arith.addf %103, %115 : vector<64x16xf32>
    %c0_59 = arith.constant 0 : index
    %c0_60 = arith.constant 0 : index
    %117 = vector.load %arg21[%c0_59, %c0_60] : memref<1x16xf32, #tpu.memory_space<vmem>>, vector<1x16xf32>
    %c0_61 = arith.constant 0 : index
    %c0_62 = arith.constant 0 : index
    %118 = vector.load %arg22[%c0_61, %c0_62] : memref<1x16xf32, #tpu.memory_space<vmem>>, vector<1x16xf32>
    %cst_63 = arith.constant dense<0.000000e+00> : vector<64xf32>
    %119 = vector.multi_reduction <add>, %116, %cst_63 [1] : vector<64x16xf32> to vector<64xf32>
    %120 = vector.shape_cast %119 : vector<64xf32> to vector<64x1xf32>
    %cst_64 = arith.constant 1.600000e+01 : f32
    %121 = vector.broadcast %cst_64 : f32 to vector<64x1xf32>
    %122 = arith.divf %120, %121 : vector<64x1xf32>
    %123 = vector.broadcast %122 : vector<64x1xf32> to vector<64x16xf32>
    %124 = arith.subf %116, %123 : vector<64x16xf32>
    %125 = arith.mulf %124, %124 : vector<64x16xf32>
    %cst_65 = arith.constant dense<0.000000e+00> : vector<64xf32>
    %126 = vector.multi_reduction <add>, %125, %cst_65 [1] : vector<64x16xf32> to vector<64xf32>
    %127 = vector.shape_cast %126 : vector<64xf32> to vector<64x1xf32>
    %cst_66 = arith.constant 1.600000e+01 : f32
    %128 = vector.broadcast %cst_66 : f32 to vector<64x1xf32>
    %129 = arith.divf %127, %128 : vector<64x1xf32>
    %cst_67 = arith.constant 9.99999974E-6 : f32
    %130 = vector.broadcast %cst_67 : f32 to vector<64x1xf32>
    %131 = arith.addf %129, %130 : vector<64x1xf32>
    %132 = math.rsqrt %131 : vector<64x1xf32>
    %133 = vector.broadcast %132 : vector<64x1xf32> to vector<64x16xf32>
    %134 = arith.mulf %124, %133 : vector<64x16xf32>
    %135 = vector.broadcast %117 : vector<1x16xf32> to vector<64x16xf32>
    %136 = arith.mulf %134, %135 : vector<64x16xf32>
    %137 = vector.broadcast %118 : vector<1x16xf32> to vector<64x16xf32>
    %138 = arith.addf %136, %137 : vector<64x16xf32>
    %c0_68 = arith.constant 0 : index
    %c0_69 = arith.constant 0 : index
    %c0_70 = arith.constant 0 : index
    %139 = vector.load %arg23[%c0_68, %c0_69, %c0_70] : memref<1x64x16xf32, #tpu.memory_space<vmem>>, vector<1x64x16xf32>
    %140 = vector.shape_cast %139 : vector<1x64x16xf32> to vector<64x16xf32>
    %141 = vector.shape_cast %138 : vector<64x16xf32> to vector<1x64x16xf32>
    tpu.vector_store %arg23[%c0_68, %c0_69, %c0_70], %141 {strides = array<i32>} : memref<1x64x16xf32, #tpu.memory_space<vmem>>, vector<1x64x16xf32>,
    %142 = vector.shape_cast %40 : vector<8x1xf32> to vector<1x8x1xf32>
    %cst_71 = arith.constant 1.000000e+00 : f32
    %143 = vector.broadcast %cst_71 : f32 to vector<1x8x1xf32>
    %144 = arith.subf %142, %143 : vector<1x8x1xf32>
    %cst_72 = arith.constant 1.000000e+09 : f32
    %145 = vector.broadcast %cst_72 : f32 to vector<1x8x1xf32>
    %146 = arith.mulf %144, %145 : vector<1x8x1xf32>
    %147 = vector.broadcast %146 : vector<1x8x1xf32> to vector<8x8x32xf32>
    %148 = arith.addf %57, %147 : vector<8x8x32xf32>
    %cst_73 = arith.constant dense<0xFF800000> : vector<8x32xf32>
    %149 = vector.multi_reduction <maximumf>, %148, %cst_73 [1] : vector<8x8x32xf32> to vector<8x32xf32>
    %150 = vector.shape_cast %149 : vector<8x32xf32> to vector<8x1x32xf32>
    %151 = vector.broadcast %150 : vector<8x1x32xf32> to vector<8x8x32xf32>
    %152 = arith.subf %148, %151 : vector<8x8x32xf32>
    %153 = math.exp %152 : vector<8x8x32xf32>
    %cst_74 = arith.constant dense<0.000000e+00> : vector<8x32xf32>
    %154 = vector.multi_reduction <add>, %153, %cst_74 [1] : vector<8x8x32xf32> to vector<8x32xf32>
    %155 = vector.shape_cast %154 : vector<8x32xf32> to vector<8x1x32xf32>
    %156 = vector.broadcast %155 : vector<8x1x32xf32> to vector<8x8x32xf32>
    %157 = arith.divf %153, %156 : vector<8x8x32xf32>
    %158 = vector.shape_cast %26 : vector<8x32xf32> to vector<1x8x32xf32>
    %159 = vector.broadcast %158 : vector<1x8x32xf32> to vector<8x8x32xf32>
    %160 = arith.mulf %157, %159 : vector<8x8x32xf32>
    %cst_75 = arith.constant dense<0.000000e+00> : vector<8x32xf32>
    %161 = vector.multi_reduction <add>, %160, %cst_75 [1] : vector<8x8x32xf32> to vector<8x32xf32>
    %cst_76 = arith.constant 1.000000e+00 : f32
    %162 = vector.broadcast %cst_76 : f32 to vector<1x32xf32>
    %163 = arith.addf %36, %162 : vector<1x32xf32>
    %164 = vector.broadcast %163 : vector<1x32xf32> to vector<8x32xf32>
    %165 = arith.mulf %164, %161 : vector<8x32xf32>
    %166 = vector.broadcast %35 : vector<1x32xf32> to vector<8x32xf32>
    %167 = arith.addf %166, %165 : vector<8x32xf32>
    %c0_77 = arith.constant 0 : index
    %c0_78 = arith.constant 0 : index
    %168 = vector.load %arg13[%c0_77, %c0_78] : memref<32x32xf32, #tpu.memory_space<vmem>>, vector<32x32xf32>
    %cst_79 = arith.constant dense<0.000000e+00> : vector<8x32xf32>
    %169 = tpu.matmul %167, %168, %cst_79 {dimension_numbers = #tpu.dot_dimension_numbers<[1], [0], [0], [1], [0, 0, 1, 1], [], []>} : vector<8x32xf32>, vector<32x32xf32>, vector<8x32xf32> -> vector<8x32xf32>
    %c0_80 = arith.constant 0 : index
    %c0_81 = arith.constant 0 : index
    %170 = vector.load %arg14[%c0_80, %c0_81] : memref<1x32xf32, #tpu.memory_space<vmem>>, vector<1x32xf32>
    %171 = vector.broadcast %170 : vector<1x32xf32> to vector<8x32xf32>
    %172 = arith.addf %169, %171 : vector<8x32xf32>
    %173 = vector.broadcast %38 : vector<8x1xf32> to vector<8x32xf32>
    %174 = arith.mulf %172, %173 : vector<8x32xf32>
    %c0_82 = arith.constant 0 : index
    %c0_83 = arith.constant 0 : index
    %c0_84 = arith.constant 0 : index
    %175 = vector.load %arg24[%c0_82, %c0_83, %c0_84] : memref<1x8x32xf32, #tpu.memory_space<vmem>>, vector<1x8x32xf32>
    %176 = vector.shape_cast %175 : vector<1x8x32xf32> to vector<8x32xf32>
    %177 = vector.shape_cast %174 : vector<8x32xf32> to vector<1x8x32xf32>
    tpu.vector_store %arg24[%c0_82, %c0_83, %c0_84], %177 {strides = array<i32>} : memref<1x8x32xf32, #tpu.memory_space<vmem>>, vector<1x8x32xf32>,
    %c0_i32_85 = arith.constant 0 : i32
    %178 = arith.cmpi eq, %arg1, %c0_i32_85 : i32
    %179 = arith.extui %178 : i1 to i32
    %c0_i32_86 = arith.constant 0 : i32
    %180 = arith.cmpi ne, %179, %c0_i32_86 : i32
    scf.if %180 {
      %c0_87 = arith.constant 0 : index
      %c0_88 = arith.constant 0 : index
      %181 = vector.load %arg26[%c0_87, %c0_88] : memref<1x16xf32, #tpu.memory_space<vmem>>, vector<1x16xf32>
      %cst_89 = arith.constant 1.562500e-02 : f32
      %182 = vector.broadcast %cst_89 : f32 to vector<1x16xf32>
      %183 = arith.mulf %181, %182 : vector<1x16xf32>
      %c0_90 = arith.constant 0 : index
      %c0_91 = arith.constant 0 : index
      %184 = vector.load %arg27[%c0_90, %c0_91] : memref<1x16xf32, #tpu.memory_space<vmem>>, vector<1x16xf32>
      %cst_92 = arith.constant 6.400000e+01 : f32
      %185 = vector.broadcast %cst_92 : f32 to vector<1x16xf32>
      %186 = arith.mulf %185, %183 : vector<1x16xf32>
      %187 = arith.mulf %186, %183 : vector<1x16xf32>
      %188 = arith.subf %184, %187 : vector<1x16xf32>
      %cst_93 = arith.constant 6.300000e+01 : f32
      %189 = vector.broadcast %cst_93 : f32 to vector<1x16xf32>
      %190 = arith.divf %188, %189 : vector<1x16xf32>
      %cst_94 = arith.constant 0.000000e+00 : f32
      %191 = vector.broadcast %cst_94 : f32 to vector<1x16xf32>
      %192 = arith.maximumf %190, %191 : vector<1x16xf32>
      %193 = math.sqrt %192 : vector<1x16xf32>
      %c0_95 = arith.constant 0 : index
      %c0_96 = arith.constant 0 : index
      %194 = vector.load %arg28[%c0_95, %c0_96] : memref<1x16xf32, #tpu.memory_space<vmem>>, vector<1x16xf32>
      %c0_97 = arith.constant 0 : index
      %c0_98 = arith.constant 0 : index
      %195 = vector.load %arg29[%c0_97, %c0_98] : memref<1x16xf32, #tpu.memory_space<vmem>>, vector<1x16xf32>
      %196 = tpu.concatenate %183, %194, %195, %193 in 1 : vector<1x16xf32>, vector<1x16xf32>, vector<1x16xf32>, vector<1x16xf32> -> vector<1x64xf32>
      %c0_99 = arith.constant 0 : index
      %c0_100 = arith.constant 0 : index
      %c0_101 = arith.constant 0 : index
      %197 = vector.load %arg25[%c0_99, %c0_100, %c0_101] : memref<1x1x64xf32, #tpu.memory_space<vmem>>, vector<1x1x64xf32>
      %198 = vector.shape_cast %197 : vector<1x1x64xf32> to vector<1x64xf32>
      %199 = vector.shape_cast %196 : vector<1x64xf32> to vector<1x1x64xf32>
      tpu.vector_store %arg25[%c0_99, %c0_100, %c0_101], %199 {strides = array<i32>} : memref<1x1x64xf32, #tpu.memory_space<vmem>>, vector<1x1x64xf32>,
    } else {
    }
    return
  }
  func.func @transform_0(%arg0: i32, %arg1: i32) -> (i32, i32, i32) {
    %c0_i32 = arith.constant 0 : i32
    %c0_i32_0 = arith.constant 0 : i32
    %c0_i32_1 = arith.constant 0 : i32
    return %arg0, %c0_i32, %c0_i32_0 : i32, i32, i32
  }
  func.func @transform_1(%arg0: i32, %arg1: i32) -> (i32, i32, i32) {
    %c0_i32 = arith.constant 0 : i32
    %c0_i32_0 = arith.constant 0 : i32
    return %arg0, %arg1, %c0_i32 : i32, i32, i32
  }
  func.func @transform_2(%arg0: i32, %arg1: i32) -> (i32, i32, i32) {
    %c0_i32 = arith.constant 0 : i32
    %c0_i32_0 = arith.constant 0 : i32
    %c0_i32_1 = arith.constant 0 : i32
    return %arg0, %c0_i32, %c0_i32_0 : i32, i32, i32
  }
  func.func @transform_3(%arg0: i32, %arg1: i32) -> (i32, i32, i32) {
    %c0_i32 = arith.constant 0 : i32
    %c0_i32_0 = arith.constant 0 : i32
    return %arg0, %arg1, %c0_i32 : i32, i32, i32
  }
  func.func @transform_4(%arg0: i32, %arg1: i32) -> (i32, i32, i32) {
    %c0_i32 = arith.constant 0 : i32
    %c0_i32_0 = arith.constant 0 : i32
    %c0_i32_1 = arith.constant 0 : i32
    return %arg0, %c0_i32, %c0_i32_0 : i32, i32, i32
  }
  func.func @transform_5(%arg0: i32, %arg1: i32) -> (i32, i32) {
    %c0_i32 = arith.constant 0 : i32
    %c0_i32_0 = arith.constant 0 : i32
    %c0_i32_1 = arith.constant 0 : i32
    return %c0_i32, %c0_i32_0 : i32, i32
  }
  func.func @transform_6(%arg0: i32, %arg1: i32) -> (i32, i32) {
    %c0_i32 = arith.constant 0 : i32
    %c0_i32_0 = arith.constant 0 : i32
    %c0_i32_1 = arith.constant 0 : i32
    return %c0_i32, %c0_i32_0 : i32, i32
  }
  func.func @transform_7(%arg0: i32, %arg1: i32) -> (i32, i32) {
    %c0_i32 = arith.constant 0 : i32
    %c0_i32_0 = arith.constant 0 : i32
    %c0_i32_1 = arith.constant 0 : i32
    return %c0_i32, %c0_i32_0 : i32, i32
  }
  func.func @transform_8(%arg0: i32, %arg1: i32) -> (i32, i32) {
    %c0_i32 = arith.constant 0 : i32
    %c0_i32_0 = arith.constant 0 : i32
    %c0_i32_1 = arith.constant 0 : i32
    return %c0_i32, %c0_i32_0 : i32, i32
  }
  func.func @transform_9(%arg0: i32, %arg1: i32) -> (i32, i32) {
    %c0_i32 = arith.constant 0 : i32
    %c0_i32_0 = arith.constant 0 : i32
    %c0_i32_1 = arith.constant 0 : i32
    return %c0_i32, %c0_i32_0 : i32, i32
  }
  func.func @transform_10(%arg0: i32, %arg1: i32) -> (i32, i32) {
    %c0_i32 = arith.constant 0 : i32
    %c0_i32_0 = arith.constant 0 : i32
    %c0_i32_1 = arith.constant 0 : i32
    return %c0_i32, %c0_i32_0 : i32, i32
  }
  func.func @transform_11(%arg0: i32, %arg1: i32) -> (i32, i32) {
    %c0_i32 = arith.constant 0 : i32
    %c0_i32_0 = arith.constant 0 : i32
    %c0_i32_1 = arith.constant 0 : i32
    return %c0_i32, %c0_i32_0 : i32, i32
  }
  func.func @transform_12(%arg0: i32, %arg1: i32) -> (i32, i32) {
    %c0_i32 = arith.constant 0 : i32
    %c0_i32_0 = arith.constant 0 : i32
    %c0_i32_1 = arith.constant 0 : i32
    return %c0_i32, %c0_i32_0 : i32, i32
  }
  func.func @transform_13(%arg0: i32, %arg1: i32) -> (i32, i32) {
    %c0_i32 = arith.constant 0 : i32
    %c0_i32_0 = arith.constant 0 : i32
    %c0_i32_1 = arith.constant 0 : i32
    return %c0_i32, %c0_i32_0 : i32, i32
  }
  func.func @transform_14(%arg0: i32, %arg1: i32) -> (i32, i32) {
    %c0_i32 = arith.constant 0 : i32
    %c0_i32_0 = arith.constant 0 : i32
    %c0_i32_1 = arith.constant 0 : i32
    return %c0_i32, %c0_i32_0 : i32, i32
  }
  func.func @transform_15(%arg0: i32, %arg1: i32) -> (i32, i32) {
    %c0_i32 = arith.constant 0 : i32
    %c0_i32_0 = arith.constant 0 : i32
    %c0_i32_1 = arith.constant 0 : i32
    return %c0_i32, %c0_i32_0 : i32, i32
  }
  func.func @transform_16(%arg0: i32, %arg1: i32) -> (i32, i32) {
    %c0_i32 = arith.constant 0 : i32
    %c0_i32_0 = arith.constant 0 : i32
    %c0_i32_1 = arith.constant 0 : i32
    return %c0_i32, %c0_i32_0 : i32, i32
  }
  func.func @transform_17(%arg0: i32, %arg1: i32) -> (i32, i32) {
    %c0_i32 = arith.constant 0 : i32
    %c0_i32_0 = arith.constant 0 : i32
    %c0_i32_1 = arith.constant 0 : i32
    return %c0_i32, %c0_i32_0 : i32, i32
  }
  func.func @transform_18(%arg0: i32, %arg1: i32) -> (i32, i32) {
    %c0_i32 = arith.constant 0 : i32
    %c0_i32_0 = arith.constant 0 : i32
    %c0_i32_1 = arith.constant 0 : i32
    return %c0_i32, %c0_i32_0 : i32, i32
  }
  func.func @transform_19(%arg0: i32, %arg1: i32) -> (i32, i32) {
    %c0_i32 = arith.constant 0 : i32
    %c0_i32_0 = arith.constant 0 : i32
    %c0_i32_1 = arith.constant 0 : i32
    return %c0_i32, %c0_i32_0 : i32, i32
  }
  func.func @transform_20(%arg0: i32, %arg1: i32) -> (i32, i32) {
    %c0_i32 = arith.constant 0 : i32
    %c0_i32_0 = arith.constant 0 : i32
    %c0_i32_1 = arith.constant 0 : i32
    return %c0_i32, %c0_i32_0 : i32, i32
  }
  func.func @transform_21(%arg0: i32, %arg1: i32) -> (i32, i32, i32) {
    %c0_i32 = arith.constant 0 : i32
    %c0_i32_0 = arith.constant 0 : i32
    return %arg0, %arg1, %c0_i32 : i32, i32, i32
  }
  func.func @transform_22(%arg0: i32, %arg1: i32) -> (i32, i32, i32) {
    %c0_i32 = arith.constant 0 : i32
    %c0_i32_0 = arith.constant 0 : i32
    return %arg0, %arg1, %c0_i32 : i32, i32, i32
  }
  func.func @transform_23(%arg0: i32, %arg1: i32) -> (i32, i32, i32) {
    %c0_i32 = arith.constant 0 : i32
    %c0_i32_0 = arith.constant 0 : i32
    %c0_i32_1 = arith.constant 0 : i32
    return %arg0, %c0_i32, %c0_i32_0 : i32, i32, i32
  }
}

module attributes {stable_mosaic.version = 11 : i64} {
  func.func @_mlp2_kernel(%arg0: i32, %arg1: memref<16x32xf32, #tpu.memory_space<vmem>>, %arg2: memref<32x32xf32, #tpu.memory_space<vmem>>, %arg3: memref<1x32xf32, #tpu.memory_space<vmem>>, %arg4: memref<32x4xf32, #tpu.memory_space<vmem>>, %arg5: memref<1x4xf32, #tpu.memory_space<vmem>>, %arg6: memref<16x4xf32, #tpu.memory_space<vmem>>) attributes {dimension_semantics = [#tpu.dimension_semantics<parallel>], iteration_bounds = array<i64: 1>, scalar_prefetch = 0 : i64, scratch_operands = 0 : i64, tpu.core_type = #tpu.core_type<tc>, window_params = [{transform_indices = @transform_0, window_bounds = array<i64: 16, 32>}, {pipeline_mode = #tpu.pipeline_mode<synchronous>, transform_indices = @transform_1, window_bounds = array<i64: 32, 32>}, {pipeline_mode = #tpu.pipeline_mode<synchronous>, transform_indices = @transform_2, window_bounds = array<i64: 1, 32>}, {pipeline_mode = #tpu.pipeline_mode<synchronous>, transform_indices = @transform_3, window_bounds = array<i64: 32, 4>}, {pipeline_mode = #tpu.pipeline_mode<synchronous>, transform_indices = @transform_4, window_bounds = array<i64: 1, 4>}, {transform_indices = @transform_5, window_bounds = array<i64: 16, 4>}]} {
    %c0 = arith.constant 0 : index
    %c0_0 = arith.constant 0 : index
    %0 = vector.load %arg1[%c0, %c0_0] : memref<16x32xf32, #tpu.memory_space<vmem>>, vector<16x32xf32>
    %c0_1 = arith.constant 0 : index
    %c0_2 = arith.constant 0 : index
    %1 = vector.load %arg2[%c0_1, %c0_2] : memref<32x32xf32, #tpu.memory_space<vmem>>, vector<32x32xf32>
    %cst = arith.constant dense<0.000000e+00> : vector<16x32xf32>
    %2 = tpu.matmul %0, %1, %cst {dimension_numbers = #tpu.dot_dimension_numbers<[1], [0], [0], [1], [0, 0, 1, 1], [], []>} : vector<16x32xf32>, vector<32x32xf32>, vector<16x32xf32> -> vector<16x32xf32>
    %c0_3 = arith.constant 0 : index
    %c0_4 = arith.constant 0 : index
    %3 = vector.load %arg3[%c0_3, %c0_4] : memref<1x32xf32, #tpu.memory_space<vmem>>, vector<1x32xf32>
    %4 = vector.broadcast %3 : vector<1x32xf32> to vector<16x32xf32>
    %5 = arith.addf %2, %4 : vector<16x32xf32>
    %cst_5 = arith.constant 0.000000e+00 : f32
    %6 = vector.broadcast %cst_5 : f32 to vector<16x32xf32>
    %7 = arith.maximumf %5, %6 : vector<16x32xf32>
    %c0_6 = arith.constant 0 : index
    %c0_7 = arith.constant 0 : index
    %8 = vector.load %arg4[%c0_6, %c0_7] : memref<32x4xf32, #tpu.memory_space<vmem>>, vector<32x4xf32>
    %cst_8 = arith.constant dense<0.000000e+00> : vector<16x4xf32>
    %9 = tpu.matmul %7, %8, %cst_8 {dimension_numbers = #tpu.dot_dimension_numbers<[1], [0], [0], [1], [0, 0, 1, 1], [], []>} : vector<16x32xf32>, vector<32x4xf32>, vector<16x4xf32> -> vector<16x4xf32>
    %c0_9 = arith.constant 0 : index
    %c0_10 = arith.constant 0 : index
    %10 = vector.load %arg5[%c0_9, %c0_10] : memref<1x4xf32, #tpu.memory_space<vmem>>, vector<1x4xf32>
    %11 = vector.broadcast %10 : vector<1x4xf32> to vector<16x4xf32>
    %12 = arith.addf %9, %11 : vector<16x4xf32>
    %c0_11 = arith.constant 0 : index
    %c0_12 = arith.constant 0 : index
    %13 = vector.load %arg6[%c0_11, %c0_12] : memref<16x4xf32, #tpu.memory_space<vmem>>, vector<16x4xf32>
    tpu.vector_store %arg6[%c0_11, %c0_12], %12 {strides = array<i32>} : memref<16x4xf32, #tpu.memory_space<vmem>>, vector<16x4xf32>,
    return
  }
  func.func @transform_0(%arg0: i32) -> (i32, i32) {
    %c0_i32 = arith.constant 0 : i32
    %c0_i32_0 = arith.constant 0 : i32
    return %arg0, %c0_i32 : i32, i32
  }
  func.func @transform_1(%arg0: i32) -> (i32, i32) {
    %c0_i32 = arith.constant 0 : i32
    %c0_i32_0 = arith.constant 0 : i32
    %c0_i32_1 = arith.constant 0 : i32
    return %c0_i32, %c0_i32_0 : i32, i32
  }
  func.func @transform_2(%arg0: i32) -> (i32, i32) {
    %c0_i32 = arith.constant 0 : i32
    %c0_i32_0 = arith.constant 0 : i32
    %c0_i32_1 = arith.constant 0 : i32
    return %c0_i32, %c0_i32_0 : i32, i32
  }
  func.func @transform_3(%arg0: i32) -> (i32, i32) {
    %c0_i32 = arith.constant 0 : i32
    %c0_i32_0 = arith.constant 0 : i32
    %c0_i32_1 = arith.constant 0 : i32
    return %c0_i32, %c0_i32_0 : i32, i32
  }
  func.func @transform_4(%arg0: i32) -> (i32, i32) {
    %c0_i32 = arith.constant 0 : i32
    %c0_i32_0 = arith.constant 0 : i32
    %c0_i32_1 = arith.constant 0 : i32
    return %c0_i32, %c0_i32_0 : i32, i32
  }
  func.func @transform_5(%arg0: i32) -> (i32, i32) {
    %c0_i32 = arith.constant 0 : i32
    %c0_i32_0 = arith.constant 0 : i32
    return %arg0, %c0_i32 : i32, i32
  }
}

module attributes {stable_mosaic.version = 11 : i64} {
  func.func @_ypath_kernel(%arg0: i32, %arg1: memref<8x16xf32, #tpu.memory_space<vmem>>, %arg2: memref<8x208xf32, #tpu.memory_space<vmem>>, %arg3: memref<208x16xf32, #tpu.memory_space<vmem>>, %arg4: memref<1x16xf32, #tpu.memory_space<vmem>>, %arg5: memref<16x16xf32, #tpu.memory_space<vmem>>, %arg6: memref<1x16xf32, #tpu.memory_space<vmem>>, %arg7: memref<16x16xf32, #tpu.memory_space<vmem>>, %arg8: memref<1x16xf32, #tpu.memory_space<vmem>>, %arg9: memref<1x16xf32, #tpu.memory_space<vmem>>, %arg10: memref<1x16xf32, #tpu.memory_space<vmem>>, %arg11: memref<16x2048xf32, #tpu.memory_space<vmem>>, %arg12: memref<1x2048xf32, #tpu.memory_space<vmem>>, %arg13: memref<2048x16xf32, #tpu.memory_space<vmem>>, %arg14: memref<1x16xf32, #tpu.memory_space<vmem>>, %arg15: memref<1x16xf32, #tpu.memory_space<vmem>>, %arg16: memref<1x16xf32, #tpu.memory_space<vmem>>, %arg17: memref<8x16xf32, #tpu.memory_space<vmem>>) attributes {dimension_semantics = [#tpu.dimension_semantics<parallel>], iteration_bounds = array<i64: 1>, scalar_prefetch = 0 : i64, scratch_operands = 0 : i64, tpu.core_type = #tpu.core_type<tc>, window_params = [{transform_indices = @transform_0, window_bounds = array<i64: 8, 16>}, {transform_indices = @transform_1, window_bounds = array<i64: 8, 208>}, {pipeline_mode = #tpu.pipeline_mode<synchronous>, transform_indices = @transform_2, window_bounds = array<i64: 208, 16>}, {pipeline_mode = #tpu.pipeline_mode<synchronous>, transform_indices = @transform_3, window_bounds = array<i64: 1, 16>}, {pipeline_mode = #tpu.pipeline_mode<synchronous>, transform_indices = @transform_4, window_bounds = array<i64: 16, 16>}, {pipeline_mode = #tpu.pipeline_mode<synchronous>, transform_indices = @transform_5, window_bounds = array<i64: 1, 16>}, {pipeline_mode = #tpu.pipeline_mode<synchronous>, transform_indices = @transform_6, window_bounds = array<i64: 16, 16>}, {pipeline_mode = #tpu.pipeline_mode<synchronous>, transform_indices = @transform_7, window_bounds = array<i64: 1, 16>}, {pipeline_mode = #tpu.pipeline_mode<synchronous>, transform_indices = @transform_8, window_bounds = array<i64: 1, 16>}, {pipeline_mode = #tpu.pipeline_mode<synchronous>, transform_indices = @transform_9, window_bounds = array<i64: 1, 16>}, {pipeline_mode = #tpu.pipeline_mode<synchronous>, transform_indices = @transform_10, window_bounds = array<i64: 16, 2048>}, {pipeline_mode = #tpu.pipeline_mode<synchronous>, transform_indices = @transform_11, window_bounds = array<i64: 1, 2048>}, {pipeline_mode = #tpu.pipeline_mode<synchronous>, transform_indices = @transform_12, window_bounds = array<i64: 2048, 16>}, {pipeline_mode = #tpu.pipeline_mode<synchronous>, transform_indices = @transform_13, window_bounds = array<i64: 1, 16>}, {pipeline_mode = #tpu.pipeline_mode<synchronous>, transform_indices = @transform_14, window_bounds = array<i64: 1, 16>}, {pipeline_mode = #tpu.pipeline_mode<synchronous>, transform_indices = @transform_15, window_bounds = array<i64: 1, 16>}, {transform_indices = @transform_16, window_bounds = array<i64: 8, 16>}]} {
    %c0 = arith.constant 0 : index
    %c0_0 = arith.constant 0 : index
    %0 = vector.load %arg2[%c0, %c0_0] : memref<8x208xf32, #tpu.memory_space<vmem>>, vector<8x208xf32>
    %c0_1 = arith.constant 0 : index
    %c0_2 = arith.constant 0 : index
    %1 = vector.load %arg3[%c0_1, %c0_2] : memref<208x16xf32, #tpu.memory_space<vmem>>, vector<208x16xf32>
    %cst = arith.constant dense<0.000000e+00> : vector<8x16xf32>
    %2 = tpu.matmul %0, %1, %cst {dimension_numbers = #tpu.dot_dimension_numbers<[1], [0], [0], [1], [0, 0, 1, 1], [], []>} : vector<8x208xf32>, vector<208x16xf32>, vector<8x16xf32> -> vector<8x16xf32>
    %c0_3 = arith.constant 0 : index
    %c0_4 = arith.constant 0 : index
    %3 = vector.load %arg4[%c0_3, %c0_4] : memref<1x16xf32, #tpu.memory_space<vmem>>, vector<1x16xf32>
    %4 = vector.broadcast %3 : vector<1x16xf32> to vector<8x16xf32>
    %5 = arith.addf %2, %4 : vector<8x16xf32>
    %c0_5 = arith.constant 0 : index
    %c0_6 = arith.constant 0 : index
    %6 = vector.load %arg5[%c0_5, %c0_6] : memref<16x16xf32, #tpu.memory_space<vmem>>, vector<16x16xf32>
    %cst_7 = arith.constant dense<0.000000e+00> : vector<8x16xf32>
    %7 = tpu.matmul %5, %6, %cst_7 {dimension_numbers = #tpu.dot_dimension_numbers<[1], [0], [0], [1], [0, 0, 1, 1], [], []>} : vector<8x16xf32>, vector<16x16xf32>, vector<8x16xf32> -> vector<8x16xf32>
    %c0_8 = arith.constant 0 : index
    %c0_9 = arith.constant 0 : index
    %8 = vector.load %arg6[%c0_8, %c0_9] : memref<1x16xf32, #tpu.memory_space<vmem>>, vector<1x16xf32>
    %9 = vector.broadcast %8 : vector<1x16xf32> to vector<8x16xf32>
    %10 = arith.addf %7, %9 : vector<8x16xf32>
    %cst_10 = arith.constant 0.000000e+00 : f32
    %11 = vector.broadcast %cst_10 : f32 to vector<8x16xf32>
    %12 = arith.maximumf %10, %11 : vector<8x16xf32>
    %c0_11 = arith.constant 0 : index
    %c0_12 = arith.constant 0 : index
    %13 = vector.load %arg7[%c0_11, %c0_12] : memref<16x16xf32, #tpu.memory_space<vmem>>, vector<16x16xf32>
    %cst_13 = arith.constant dense<0.000000e+00> : vector<8x16xf32>
    %14 = tpu.matmul %12, %13, %cst_13 {dimension_numbers = #tpu.dot_dimension_numbers<[1], [0], [0], [1], [0, 0, 1, 1], [], []>} : vector<8x16xf32>, vector<16x16xf32>, vector<8x16xf32> -> vector<8x16xf32>
    %c0_14 = arith.constant 0 : index
    %c0_15 = arith.constant 0 : index
    %15 = vector.load %arg8[%c0_14, %c0_15] : memref<1x16xf32, #tpu.memory_space<vmem>>, vector<1x16xf32>
    %16 = vector.broadcast %15 : vector<1x16xf32> to vector<8x16xf32>
    %17 = arith.addf %14, %16 : vector<8x16xf32>
    %c0_16 = arith.constant 0 : index
    %c0_17 = arith.constant 0 : index
    %18 = vector.load %arg1[%c0_16, %c0_17] : memref<8x16xf32, #tpu.memory_space<vmem>>, vector<8x16xf32>
    %19 = arith.addf %18, %17 : vector<8x16xf32>
    %c0_18 = arith.constant 0 : index
    %c0_19 = arith.constant 0 : index
    %20 = vector.load %arg9[%c0_18, %c0_19] : memref<1x16xf32, #tpu.memory_space<vmem>>, vector<1x16xf32>
    %c0_20 = arith.constant 0 : index
    %c0_21 = arith.constant 0 : index
    %21 = vector.load %arg10[%c0_20, %c0_21] : memref<1x16xf32, #tpu.memory_space<vmem>>, vector<1x16xf32>
    %cst_22 = arith.constant dense<0.000000e+00> : vector<8xf32>
    %22 = vector.multi_reduction <add>, %19, %cst_22 [1] : vector<8x16xf32> to vector<8xf32>
    %23 = vector.shape_cast %22 : vector<8xf32> to vector<8x1xf32>
    %cst_23 = arith.constant 1.600000e+01 : f32
    %24 = vector.broadcast %cst_23 : f32 to vector<8x1xf32>
    %25 = arith.divf %23, %24 : vector<8x1xf32>
    %26 = vector.broadcast %25 : vector<8x1xf32> to vector<8x16xf32>
    %27 = arith.subf %19, %26 : vector<8x16xf32>
    %28 = arith.mulf %27, %27 : vector<8x16xf32>
    %cst_24 = arith.constant dense<0.000000e+00> : vector<8xf32>
    %29 = vector.multi_reduction <add>, %28, %cst_24 [1] : vector<8x16xf32> to vector<8xf32>
    %30 = vector.shape_cast %29 : vector<8xf32> to vector<8x1xf32>
    %cst_25 = arith.constant 1.600000e+01 : f32
    %31 = vector.broadcast %cst_25 : f32 to vector<8x1xf32>
    %32 = arith.divf %30, %31 : vector<8x1xf32>
    %cst_26 = arith.constant 9.99999974E-6 : f32
    %33 = vector.broadcast %cst_26 : f32 to vector<8x1xf32>
    %34 = arith.addf %32, %33 : vector<8x1xf32>
    %35 = math.rsqrt %34 : vector<8x1xf32>
    %36 = vector.broadcast %35 : vector<8x1xf32> to vector<8x16xf32>
    %37 = arith.mulf %27, %36 : vector<8x16xf32>
    %38 = vector.broadcast %20 : vector<1x16xf32> to vector<8x16xf32>
    %39 = arith.mulf %37, %38 : vector<8x16xf32>
    %40 = vector.broadcast %21 : vector<1x16xf32> to vector<8x16xf32>
    %41 = arith.addf %39, %40 : vector<8x16xf32>
    %c0_27 = arith.constant 0 : index
    %c0_28 = arith.constant 0 : index
    %42 = vector.load %arg11[%c0_27, %c0_28] : memref<16x2048xf32, #tpu.memory_space<vmem>>, vector<16x2048xf32>
    %cst_29 = arith.constant dense<0.000000e+00> : vector<8x2048xf32>
    %43 = tpu.matmul %41, %42, %cst_29 {dimension_numbers = #tpu.dot_dimension_numbers<[1], [0], [0], [1], [0, 0, 1, 1], [], []>} : vector<8x16xf32>, vector<16x2048xf32>, vector<8x2048xf32> -> vector<8x2048xf32>
    %c0_30 = arith.constant 0 : index
    %c0_31 = arith.constant 0 : index
    %44 = vector.load %arg12[%c0_30, %c0_31] : memref<1x2048xf32, #tpu.memory_space<vmem>>, vector<1x2048xf32>
    %45 = vector.broadcast %44 : vector<1x2048xf32> to vector<8x2048xf32>
    %46 = arith.addf %43, %45 : vector<8x2048xf32>
    %cst_32 = arith.constant 0.000000e+00 : f32
    %47 = vector.broadcast %cst_32 : f32 to vector<8x2048xf32>
    %48 = arith.maximumf %46, %47 : vector<8x2048xf32>
    %c0_33 = arith.constant 0 : index
    %c0_34 = arith.constant 0 : index
    %49 = vector.load %arg13[%c0_33, %c0_34] : memref<2048x16xf32, #tpu.memory_space<vmem>>, vector<2048x16xf32>
    %cst_35 = arith.constant dense<0.000000e+00> : vector<8x16xf32>
    %50 = tpu.matmul %48, %49, %cst_35 {dimension_numbers = #tpu.dot_dimension_numbers<[1], [0], [0], [1], [0, 0, 1, 1], [], []>} : vector<8x2048xf32>, vector<2048x16xf32>, vector<8x16xf32> -> vector<8x16xf32>
    %c0_36 = arith.constant 0 : index
    %c0_37 = arith.constant 0 : index
    %51 = vector.load %arg14[%c0_36, %c0_37] : memref<1x16xf32, #tpu.memory_space<vmem>>, vector<1x16xf32>
    %52 = vector.broadcast %51 : vector<1x16xf32> to vector<8x16xf32>
    %53 = arith.addf %50, %52 : vector<8x16xf32>
    %54 = arith.addf %41, %53 : vector<8x16xf32>
    %c0_38 = arith.constant 0 : index
    %c0_39 = arith.constant 0 : index
    %55 = vector.load %arg15[%c0_38, %c0_39] : memref<1x16xf32, #tpu.memory_space<vmem>>, vector<1x16xf32>
    %c0_40 = arith.constant 0 : index
    %c0_41 = arith.constant 0 : index
    %56 = vector.load %arg16[%c0_40, %c0_41] : memref<1x16xf32, #tpu.memory_space<vmem>>, vector<1x16xf32>
    %cst_42 = arith.constant dense<0.000000e+00> : vector<8xf32>
    %57 = vector.multi_reduction <add>, %54, %cst_42 [1] : vector<8x16xf32> to vector<8xf32>
    %58 = vector.shape_cast %57 : vector<8xf32> to vector<8x1xf32>
    %cst_43 = arith.constant 1.600000e+01 : f32
    %59 = vector.broadcast %cst_43 : f32 to vector<8x1xf32>
    %60 = arith.divf %58, %59 : vector<8x1xf32>
    %61 = vector.broadcast %60 : vector<8x1xf32> to vector<8x16xf32>
    %62 = arith.subf %54, %61 : vector<8x16xf32>
    %63 = arith.mulf %62, %62 : vector<8x16xf32>
    %cst_44 = arith.constant dense<0.000000e+00> : vector<8xf32>
    %64 = vector.multi_reduction <add>, %63, %cst_44 [1] : vector<8x16xf32> to vector<8xf32>
    %65 = vector.shape_cast %64 : vector<8xf32> to vector<8x1xf32>
    %cst_45 = arith.constant 1.600000e+01 : f32
    %66 = vector.broadcast %cst_45 : f32 to vector<8x1xf32>
    %67 = arith.divf %65, %66 : vector<8x1xf32>
    %cst_46 = arith.constant 9.99999974E-6 : f32
    %68 = vector.broadcast %cst_46 : f32 to vector<8x1xf32>
    %69 = arith.addf %67, %68 : vector<8x1xf32>
    %70 = math.rsqrt %69 : vector<8x1xf32>
    %71 = vector.broadcast %70 : vector<8x1xf32> to vector<8x16xf32>
    %72 = arith.mulf %62, %71 : vector<8x16xf32>
    %73 = vector.broadcast %55 : vector<1x16xf32> to vector<8x16xf32>
    %74 = arith.mulf %72, %73 : vector<8x16xf32>
    %75 = vector.broadcast %56 : vector<1x16xf32> to vector<8x16xf32>
    %76 = arith.addf %74, %75 : vector<8x16xf32>
    %c0_47 = arith.constant 0 : index
    %c0_48 = arith.constant 0 : index
    %77 = vector.load %arg17[%c0_47, %c0_48] : memref<8x16xf32, #tpu.memory_space<vmem>>, vector<8x16xf32>
    tpu.vector_store %arg17[%c0_47, %c0_48], %76 {strides = array<i32>} : memref<8x16xf32, #tpu.memory_space<vmem>>, vector<8x16xf32>,
    return
  }
  func.func @transform_0(%arg0: i32) -> (i32, i32) {
    %c0_i32 = arith.constant 0 : i32
    %c0_i32_0 = arith.constant 0 : i32
    return %arg0, %c0_i32 : i32, i32
  }
  func.func @transform_1(%arg0: i32) -> (i32, i32) {
    %c0_i32 = arith.constant 0 : i32
    %c0_i32_0 = arith.constant 0 : i32
    return %arg0, %c0_i32 : i32, i32
  }
  func.func @transform_2(%arg0: i32) -> (i32, i32) {
    %c0_i32 = arith.constant 0 : i32
    %c0_i32_0 = arith.constant 0 : i32
    %c0_i32_1 = arith.constant 0 : i32
    return %c0_i32, %c0_i32_0 : i32, i32
  }
  func.func @transform_3(%arg0: i32) -> (i32, i32) {
    %c0_i32 = arith.constant 0 : i32
    %c0_i32_0 = arith.constant 0 : i32
    %c0_i32_1 = arith.constant 0 : i32
    return %c0_i32, %c0_i32_0 : i32, i32
  }
  func.func @transform_4(%arg0: i32) -> (i32, i32) {
    %c0_i32 = arith.constant 0 : i32
    %c0_i32_0 = arith.constant 0 : i32
    %c0_i32_1 = arith.constant 0 : i32
    return %c0_i32, %c0_i32_0 : i32, i32
  }
  func.func @transform_5(%arg0: i32) -> (i32, i32) {
    %c0_i32 = arith.constant 0 : i32
    %c0_i32_0 = arith.constant 0 : i32
    %c0_i32_1 = arith.constant 0 : i32
    return %c0_i32, %c0_i32_0 : i32, i32
  }
  func.func @transform_6(%arg0: i32) -> (i32, i32) {
    %c0_i32 = arith.constant 0 : i32
    %c0_i32_0 = arith.constant 0 : i32
    %c0_i32_1 = arith.constant 0 : i32
    return %c0_i32, %c0_i32_0 : i32, i32
  }
  func.func @transform_7(%arg0: i32) -> (i32, i32) {
    %c0_i32 = arith.constant 0 : i32
    %c0_i32_0 = arith.constant 0 : i32
    %c0_i32_1 = arith.constant 0 : i32
    return %c0_i32, %c0_i32_0 : i32, i32
  }
  func.func @transform_8(%arg0: i32) -> (i32, i32) {
    %c0_i32 = arith.constant 0 : i32
    %c0_i32_0 = arith.constant 0 : i32
    %c0_i32_1 = arith.constant 0 : i32
    return %c0_i32, %c0_i32_0 : i32, i32
  }
  func.func @transform_9(%arg0: i32) -> (i32, i32) {
    %c0_i32 = arith.constant 0 : i32
    %c0_i32_0 = arith.constant 0 : i32
    %c0_i32_1 = arith.constant 0 : i32
    return %c0_i32, %c0_i32_0 : i32, i32
  }
  func.func @transform_10(%arg0: i32) -> (i32, i32) {
    %c0_i32 = arith.constant 0 : i32
    %c0_i32_0 = arith.constant 0 : i32
    %c0_i32_1 = arith.constant 0 : i32
    return %c0_i32, %c0_i32_0 : i32, i32
  }
  func.func @transform_11(%arg0: i32) -> (i32, i32) {
    %c0_i32 = arith.constant 0 : i32
    %c0_i32_0 = arith.constant 0 : i32
    %c0_i32_1 = arith.constant 0 : i32
    return %c0_i32, %c0_i32_0 : i32, i32
  }
  func.func @transform_12(%arg0: i32) -> (i32, i32) {
    %c0_i32 = arith.constant 0 : i32
    %c0_i32_0 = arith.constant 0 : i32
    %c0_i32_1 = arith.constant 0 : i32
    return %c0_i32, %c0_i32_0 : i32, i32
  }
  func.func @transform_13(%arg0: i32) -> (i32, i32) {
    %c0_i32 = arith.constant 0 : i32
    %c0_i32_0 = arith.constant 0 : i32
    %c0_i32_1 = arith.constant 0 : i32
    return %c0_i32, %c0_i32_0 : i32, i32
  }
  func.func @transform_14(%arg0: i32) -> (i32, i32) {
    %c0_i32 = arith.constant 0 : i32
    %c0_i32_0 = arith.constant 0 : i32
    %c0_i32_1 = arith.constant 0 : i32
    return %c0_i32, %c0_i32_0 : i32, i32
  }
  func.func @transform_15(%arg0: i32) -> (i32, i32) {
    %c0_i32 = arith.constant 0 : i32
    %c0_i32_0 = arith.constant 0 : i32
    %c0_i32_1 = arith.constant 0 : i32
    return %c0_i32, %c0_i32_0 : i32, i32
  }
  func.func @transform_16(%arg0: i32) -> (i32, i32) {
    %c0_i32 = arith.constant 0 : i32
    %c0_i32_0 = arith.constant 0 : i32
    return %arg0, %c0_i32 : i32, i32
  }
}

module attributes {stable_mosaic.version = 11 : i64} {
  func.func @_mlp2_kernel(%arg0: i32, %arg1: memref<64x16xf32, #tpu.memory_space<vmem>>, %arg2: memref<16x16xf32, #tpu.memory_space<vmem>>, %arg3: memref<1x16xf32, #tpu.memory_space<vmem>>, %arg4: memref<16x2xf32, #tpu.memory_space<vmem>>, %arg5: memref<1x2xf32, #tpu.memory_space<vmem>>, %arg6: memref<64x2xf32, #tpu.memory_space<vmem>>) attributes {dimension_semantics = [#tpu.dimension_semantics<parallel>], iteration_bounds = array<i64: 2>, scalar_prefetch = 0 : i64, scratch_operands = 0 : i64, tpu.core_type = #tpu.core_type<tc>, window_params = [{transform_indices = @transform_0, window_bounds = array<i64: 64, 16>}, {pipeline_mode = #tpu.pipeline_mode<synchronous>, transform_indices = @transform_1, window_bounds = array<i64: 16, 16>}, {pipeline_mode = #tpu.pipeline_mode<synchronous>, transform_indices = @transform_2, window_bounds = array<i64: 1, 16>}, {pipeline_mode = #tpu.pipeline_mode<synchronous>, transform_indices = @transform_3, window_bounds = array<i64: 16, 2>}, {pipeline_mode = #tpu.pipeline_mode<synchronous>, transform_indices = @transform_4, window_bounds = array<i64: 1, 2>}, {transform_indices = @transform_5, window_bounds = array<i64: 64, 2>}]} {
    %c0 = arith.constant 0 : index
    %c0_0 = arith.constant 0 : index
    %0 = vector.load %arg1[%c0, %c0_0] : memref<64x16xf32, #tpu.memory_space<vmem>>, vector<64x16xf32>
    %c0_1 = arith.constant 0 : index
    %c0_2 = arith.constant 0 : index
    %1 = vector.load %arg2[%c0_1, %c0_2] : memref<16x16xf32, #tpu.memory_space<vmem>>, vector<16x16xf32>
    %cst = arith.constant dense<0.000000e+00> : vector<64x16xf32>
    %2 = tpu.matmul %0, %1, %cst {dimension_numbers = #tpu.dot_dimension_numbers<[1], [0], [0], [1], [0, 0, 1, 1], [], []>} : vector<64x16xf32>, vector<16x16xf32>, vector<64x16xf32> -> vector<64x16xf32>
    %c0_3 = arith.constant 0 : index
    %c0_4 = arith.constant 0 : index
    %3 = vector.load %arg3[%c0_3, %c0_4] : memref<1x16xf32, #tpu.memory_space<vmem>>, vector<1x16xf32>
    %4 = vector.broadcast %3 : vector<1x16xf32> to vector<64x16xf32>
    %5 = arith.addf %2, %4 : vector<64x16xf32>
    %cst_5 = arith.constant 0.000000e+00 : f32
    %6 = vector.broadcast %cst_5 : f32 to vector<64x16xf32>
    %7 = arith.maximumf %5, %6 : vector<64x16xf32>
    %c0_6 = arith.constant 0 : index
    %c0_7 = arith.constant 0 : index
    %8 = vector.load %arg4[%c0_6, %c0_7] : memref<16x2xf32, #tpu.memory_space<vmem>>, vector<16x2xf32>
    %cst_8 = arith.constant dense<0.000000e+00> : vector<64x2xf32>
    %9 = tpu.matmul %7, %8, %cst_8 {dimension_numbers = #tpu.dot_dimension_numbers<[1], [0], [0], [1], [0, 0, 1, 1], [], []>} : vector<64x16xf32>, vector<16x2xf32>, vector<64x2xf32> -> vector<64x2xf32>
    %c0_9 = arith.constant 0 : index
    %c0_10 = arith.constant 0 : index
    %10 = vector.load %arg5[%c0_9, %c0_10] : memref<1x2xf32, #tpu.memory_space<vmem>>, vector<1x2xf32>
    %11 = vector.broadcast %10 : vector<1x2xf32> to vector<64x2xf32>
    %12 = arith.addf %9, %11 : vector<64x2xf32>
    %c0_11 = arith.constant 0 : index
    %c0_12 = arith.constant 0 : index
    %13 = vector.load %arg6[%c0_11, %c0_12] : memref<64x2xf32, #tpu.memory_space<vmem>>, vector<64x2xf32>
    tpu.vector_store %arg6[%c0_11, %c0_12], %12 {strides = array<i32>} : memref<64x2xf32, #tpu.memory_space<vmem>>, vector<64x2xf32>,
    return
  }
  func.func @transform_0(%arg0: i32) -> (i32, i32) {
    %c0_i32 = arith.constant 0 : i32
    %c0_i32_0 = arith.constant 0 : i32
    return %arg0, %c0_i32 : i32, i32
  }
  func.func @transform_1(%arg0: i32) -> (i32, i32) {
    %c0_i32 = arith.constant 0 : i32
    %c0_i32_0 = arith.constant 0 : i32
    %c0_i32_1 = arith.constant 0 : i32
    return %c0_i32, %c0_i32_0 : i32, i32
  }
  func.func @transform_2(%arg0: i32) -> (i32, i32) {
    %c0_i32 = arith.constant 0 : i32
    %c0_i32_0 = arith.constant 0 : i32
    %c0_i32_1 = arith.constant 0 : i32
    return %c0_i32, %c0_i32_0 : i32, i32
  }
  func.func @transform_3(%arg0: i32) -> (i32, i32) {
    %c0_i32 = arith.constant 0 : i32
    %c0_i32_0 = arith.constant 0 : i32
    %c0_i32_1 = arith.constant 0 : i32
    return %c0_i32, %c0_i32_0 : i32, i32
  }
  func.func @transform_4(%arg0: i32) -> (i32, i32) {
    %c0_i32 = arith.constant 0 : i32
    %c0_i32_0 = arith.constant 0 : i32
    %c0_i32_1 = arith.constant 0 : i32
    return %c0_i32, %c0_i32_0 : i32, i32
  }
  func.func @transform_5(%arg0: i32) -> (i32, i32) {
    %c0_i32 = arith.constant 0 : i32
    %c0_i32_0 = arith.constant 0 : i32
    return %arg0, %c0_i32 : i32, i32
  }
}

module attributes {stable_mosaic.version = 11 : i64} {
  func.func @_mlp2_kernel(%arg0: i32, %arg1: memref<8x16xf32, #tpu.memory_space<vmem>>, %arg2: memref<16x16xf32, #tpu.memory_space<vmem>>, %arg3: memref<1x16xf32, #tpu.memory_space<vmem>>, %arg4: memref<16x3xf32, #tpu.memory_space<vmem>>, %arg5: memref<1x3xf32, #tpu.memory_space<vmem>>, %arg6: memref<8x3xf32, #tpu.memory_space<vmem>>) attributes {dimension_semantics = [#tpu.dimension_semantics<parallel>], iteration_bounds = array<i64: 1>, scalar_prefetch = 0 : i64, scratch_operands = 0 : i64, tpu.core_type = #tpu.core_type<tc>, window_params = [{transform_indices = @transform_0, window_bounds = array<i64: 8, 16>}, {pipeline_mode = #tpu.pipeline_mode<synchronous>, transform_indices = @transform_1, window_bounds = array<i64: 16, 16>}, {pipeline_mode = #tpu.pipeline_mode<synchronous>, transform_indices = @transform_2, window_bounds = array<i64: 1, 16>}, {pipeline_mode = #tpu.pipeline_mode<synchronous>, transform_indices = @transform_3, window_bounds = array<i64: 16, 3>}, {pipeline_mode = #tpu.pipeline_mode<synchronous>, transform_indices = @transform_4, window_bounds = array<i64: 1, 3>}, {transform_indices = @transform_5, window_bounds = array<i64: 8, 3>}]} {
    %c0 = arith.constant 0 : index
    %c0_0 = arith.constant 0 : index
    %0 = vector.load %arg1[%c0, %c0_0] : memref<8x16xf32, #tpu.memory_space<vmem>>, vector<8x16xf32>
    %c0_1 = arith.constant 0 : index
    %c0_2 = arith.constant 0 : index
    %1 = vector.load %arg2[%c0_1, %c0_2] : memref<16x16xf32, #tpu.memory_space<vmem>>, vector<16x16xf32>
    %cst = arith.constant dense<0.000000e+00> : vector<8x16xf32>
    %2 = tpu.matmul %0, %1, %cst {dimension_numbers = #tpu.dot_dimension_numbers<[1], [0], [0], [1], [0, 0, 1, 1], [], []>} : vector<8x16xf32>, vector<16x16xf32>, vector<8x16xf32> -> vector<8x16xf32>
    %c0_3 = arith.constant 0 : index
    %c0_4 = arith.constant 0 : index
    %3 = vector.load %arg3[%c0_3, %c0_4] : memref<1x16xf32, #tpu.memory_space<vmem>>, vector<1x16xf32>
    %4 = vector.broadcast %3 : vector<1x16xf32> to vector<8x16xf32>
    %5 = arith.addf %2, %4 : vector<8x16xf32>
    %cst_5 = arith.constant 0.000000e+00 : f32
    %6 = vector.broadcast %cst_5 : f32 to vector<8x16xf32>
    %7 = arith.maximumf %5, %6 : vector<8x16xf32>
    %c0_6 = arith.constant 0 : index
    %c0_7 = arith.constant 0 : index
    %8 = vector.load %arg4[%c0_6, %c0_7] : memref<16x3xf32, #tpu.memory_space<vmem>>, vector<16x3xf32>
    %cst_8 = arith.constant dense<0.000000e+00> : vector<8x3xf32>
    %9 = tpu.matmul %7, %8, %cst_8 {dimension_numbers = #tpu.dot_dimension_numbers<[1], [0], [0], [1], [0, 0, 1, 1], [], []>} : vector<8x16xf32>, vector<16x3xf32>, vector<8x3xf32> -> vector<8x3xf32>
    %c0_9 = arith.constant 0 : index
    %c0_10 = arith.constant 0 : index
    %10 = vector.load %arg5[%c0_9, %c0_10] : memref<1x3xf32, #tpu.memory_space<vmem>>, vector<1x3xf32>
    %11 = vector.broadcast %10 : vector<1x3xf32> to vector<8x3xf32>
    %12 = arith.addf %9, %11 : vector<8x3xf32>
    %c0_11 = arith.constant 0 : index
    %c0_12 = arith.constant 0 : index
    %13 = vector.load %arg6[%c0_11, %c0_12] : memref<8x3xf32, #tpu.memory_space<vmem>>, vector<8x3xf32>
    tpu.vector_store %arg6[%c0_11, %c0_12], %12 {strides = array<i32>} : memref<8x3xf32, #tpu.memory_space<vmem>>, vector<8x3xf32>,
    return
  }
  func.func @transform_0(%arg0: i32) -> (i32, i32) {
    %c0_i32 = arith.constant 0 : i32
    %c0_i32_0 = arith.constant 0 : i32
    return %arg0, %c0_i32 : i32, i32
  }
  func.func @transform_1(%arg0: i32) -> (i32, i32) {
    %c0_i32 = arith.constant 0 : i32
    %c0_i32_0 = arith.constant 0 : i32
    %c0_i32_1 = arith.constant 0 : i32
    return %c0_i32, %c0_i32_0 : i32, i32
  }
  func.func @transform_2(%arg0: i32) -> (i32, i32) {
    %c0_i32 = arith.constant 0 : i32
    %c0_i32_0 = arith.constant 0 : i32
    %c0_i32_1 = arith.constant 0 : i32
    return %c0_i32, %c0_i32_0 : i32, i32
  }
  func.func @transform_3(%arg0: i32) -> (i32, i32) {
    %c0_i32 = arith.constant 0 : i32
    %c0_i32_0 = arith.constant 0 : i32
    %c0_i32_1 = arith.constant 0 : i32
    return %c0_i32, %c0_i32_0 : i32, i32
  }
  func.func @transform_4(%arg0: i32) -> (i32, i32) {
    %c0_i32 = arith.constant 0 : i32
    %c0_i32_0 = arith.constant 0 : i32
    %c0_i32_1 = arith.constant 0 : i32
    return %c0_i32, %c0_i32_0 : i32, i32
  }
  func.func @transform_5(%arg0: i32) -> (i32, i32) {
    %c0_i32 = arith.constant 0 : i32
    %c0_i32_0 = arith.constant 0 : i32
    return %arg0, %c0_i32 : i32, i32
  }
}

</mosaic_0001>

<bundles_post_ra>
// kernel: _lambda_.17
= control target key start
LH: loop header
LB: loop body
LE: loop exit
PB: predicated region body
PF: predicated region fallthrough
CT: control target
= control target key end

     0   :  { %vm27_vm0 = vcmask 261120   ;;  %vm109_vm1 = vcmask 785408   ;;  %s185_s1 = inlined_call_operand.vmem [shape: f32[32,96], index: 1, kind: input, shape index: {}]   ;;  %s186_s0 = inlined_call_operand.vmem [shape: f32[16,32], index: 0, kind: input, shape index: {}]   ;;  %s187_s2 = inlined_call_operand.vmem [shape: f32[1,96], index: 2, kind: input, shape index: {}]   ;;  %s188_s3 = inlined_call_operand.vmem [shape: f32[16,96], index: 3, kind: output, shape index: {}]  }
   0x1   :  { %v19_v0 = vld [vmem:[%s185_s1 + $0x18] sm:$0xff]  ;;  %v18_v1 = vld [vmem:[%s185_s1 + $0x10] sm:$0xff]  ;;  %v14_v2 = vld [vmem:[%s186_s0] sm:$0xff] }
   0x2   :  { %125 = vmatprep.subr.mxu0 %v19_v0  ;;  %v17_v3 = vld [vmem:[%s185_s1 + $0x8] sm:$0xff]  ;;  %133 = vmatprep.mubr.msk.f32.mxu0 %vm27_vm0, %v14_v2  ;;  %v16_v4 = vld [vmem:[%s185_s1] sm:$0xff] }
   0x3   :  { %126 = vmatpush3.msra.mxu0 %v19_v0  ;;  %v15_v5 = vld [vmem:[%s186_s0 + $0x8] sm:$0xff]  ;;  %v116_v6 = vld [vmem:[%s187_s2] ss:$0 sm:$0xff] }
   0x4   :  { %127 = vmatprep.subr.mxu0 %v18_v1 }
   0x5   :  { %128 = vmatpush3.msra.mxu0 %v18_v1 }
   0x6   :  { %129 = vmatprep.subr.mxu0 %v17_v3 }
   0x7   :  { %130 = vmatpush3.msra.mxu0 %v17_v3 }
   0x8   :  { %131 = vmatprep.subr.mxu0 %v16_v4 }
   0x9   :  { %132 = vmatpush3.msra.mxu0 %v16_v4 }
   0xa   :  { %134 = vmatmul.mubr.msk.f32.vlgmr.msra.gmra.mxu0 %vm27_vm0, %v15_v5 }
  0xca   :  { %v135_v7 = vpop.f32.mrf.mxu0 }
  0xcb   :  { %v106_v8 = vadd.f32 %v135_v7, %v116_v6 }
  0xcc   :  { %v100_v9 = vpop.f32.mrf.mxu0 }
  0xcd   :  { %111 = vst.msk [vmem:[%s188_s3 + $0x8] sm:$0xff] %vm109_vm1, %v106_v8  ;;  %v101_v10 = vadd.f32 %v116_v6, %v100_v9 }
  0xcf   :  { %110 = vst.msk [vmem:[%s188_s3] sm:$0xff] %vm109_vm1, %v101_v10 }

// kernel: _lambda_.15
= control target key start
LH: loop header
LB: loop body
LE: loop exit
PB: predicated region body
PF: predicated region fallthrough
CT: control target
= control target key end

     0   :  { %vm37_vm0 = vcmask 1043456   ;;  %vm30_vm1 = vcmask 31744   ;;  %vm129_vm2 = vcmask 261120   ;;  %s314_s1 = inlined_call_operand.vmem [shape: f32[4,32], index: 1, kind: input, shape index: {}]   ;;  %s315_s0 = inlined_call_operand.vmem [shape: f32[16,4], index: 0, kind: input, shape index: {}]   ;;  %s316_s3 = inlined_call_operand.vmem [shape: f32[32,32], index: 3, kind: input, shape index: {}]   ;;  %s317_s2 = inlined_call_operand.vmem [shape: f32[1,32], index: 2, kind: input, shape index: {}]   ;;  %s318_s4 = inlined_call_operand.vmem [shape: f32[1,32], index: 4, kind: input, shape index: {}]   ;;  %s319_s5 = inlined_call_operand.vmem [shape: f32[16,32], index: 5, kind: output, shape index: {}]  }
   0x1   :  { %v22_v0 = vld [vmem:[%s314_s1] sm:$0xf]  ;;  %v21_v2 = vld [vmem:[%s315_s0 + $0x8] sm:$0xff]  ;;  %v121_v3 = vld [vmem:[%s316_s3 + $0x18] sm:$0xff] }
   0x2   :  { %v20_v1 = vld [vmem:[%s315_s0] sm:$0xff]  ;;  %235 = vmatprep.subr.msk.mxu0 %vm37_vm0, %v22_v0  ;;  %240 = vmatprep.subr.mxu1 %v121_v3  ;;  %v120_v4 = vld [vmem:[%s316_s3 + $0x10] sm:$0xff]  ;;  %v119_v5 = vld [vmem:[%s316_s3 + $0x8] sm:$0xff] }
   0x3   :  { %237 = vmatprep.mubr.msk.f32.mxu0 %vm30_vm1, %v20_v1  ;;  %236 = vmatpush3.msk.msra.mxu0 %vm37_vm0, %v22_v0  ;;  %v118_v6 = vld [vmem:[%s316_s3] sm:$0xff] }
   0x4   :  { %238 = vmatmul.mubr.msk.f32.vlgmr.msra.gmra.mxu0 %vm30_vm1, %v21_v2  ;;  %241 = vmatpush3.msra.mxu1 %v121_v3  ;;  %v219_v7 = vld [vmem:[%s317_s2] ss:$0 sm:$0xff] }
   0x5   :  { %242 = vmatprep.subr.mxu1 %v120_v4  ;;  %v223_v14 = vld [vmem:[%s318_s4] ss:$0 sm:$0xff] }
   0x6   :  { %243 = vmatpush3.msra.mxu1 %v120_v4 }
   0x7   :  { %244 = vmatprep.subr.mxu1 %v119_v5 }
   0x8   :  { %245 = vmatpush3.msra.mxu1 %v119_v5 }
   0x9   :  { %246 = vmatprep.subr.mxu1 %v118_v6 }
   0xa   :  { %247 = vmatpush3.msra.mxu1 %v118_v6 }
  0xc4   :  { %v239_v8 = vpop.f32.mrf.mxu0 }
  0xc5   :  { %v113_v9 = vadd.f32 %v239_v8, %v219_v7 }
  0xc6   :  { %v107_v10 = vpop.f32.mrf.mxu0 }
  0xc7   :  { %v108_v11 = vadd.f32 %v219_v7, %v107_v10  ;;  %v117_v13 = vmax.f32 %v113_v9, 0.0 }
  0xc9   :  { %v116_v12 = vmax.f32 %v108_v11, 0.0 }
  0xcb   :  { %248 = vmatprep.mubr.msk.f32.mxu1 %vm129_vm2, %v116_v12 }
  0xcc   :  { %249 = vmatmul.mubr.msk.f32.vlgmr.msra.gmra.mxu1 %vm129_vm2, %v117_v13 }
 0x18c   :  { %v250_v15 = vpop.f32.mrf.mxu1 }
 0x18d   :  { %v208_v16 = vadd.f32 %v250_v15, %v223_v14 }
 0x18e   :  { %v202_v17 = vpop.f32.mrf.mxu1 }
 0x18f   :  { %v212_v18 = vmax.f32 %v208_v16, 0.0  ;;  %v203_v19 = vadd.f32 %v223_v14, %v202_v17 }
 0x191   :  { %214 = vst.msk [vmem:[%s319_s5 + $0x8] sm:$0xff] %vm129_vm2, %v212_v18  ;;  %v211_v20 = vmax.f32 %v203_v19, 0.0 }
 0x193   :  { %213 = vst.msk [vmem:[%s319_s5] sm:$0xff] %vm129_vm2, %v211_v20 }

// kernel: _lambda_.14
= control target key start
LH: loop header
LB: loop body
LE: loop exit
PB: predicated region body
PF: predicated region fallthrough
CT: control target
= control target key end

     0   :  { %s722_s18 = smov 0   ;;  %s785_s0 = inlined_call_operand.vmem [shape: f32[128,2], index: 0, kind: input, shape index: {}]   ;;  %s786_s1 = inlined_call_operand.vmem [shape: f32[2,16], index: 1, kind: input, shape index: {}]   ;;  %s787_s2 = inlined_call_operand.vmem [shape: f32[1,16], index: 2, kind: input, shape index: {}]   ;;  %s788_s3 = inlined_call_operand.vmem [shape: f32[16,16], index: 3, kind: input, shape index: {}]   ;;  %s789_s4 = inlined_call_operand.vmem [shape: f32[1,16], index: 4, kind: input, shape index: {}]   ;;  %s790_s5 = inlined_call_operand.vmem [shape: f32[128,16], index: 5, kind: output, shape index: {}]  }
   0x1 LB: > { %s597_s19 = sadd.s32 4294967295, %s690_s18   ;;  %p601_p0 = scmp.ge.s32.totalorder %s690_s18, 1  ;;  %s690_s18 = sphi %s722_s18, %s15_s18  }
   0x2   : > { %p188_p1 = scmp.lt.s32.totalorder %s690_s18, 3 }
   0x4   : > { %p189_p2 = pnand %p601_p0, %p188_p1 }
   0x5   : > { %s602_s22 = sshll.u32 (!%p189_p2), %s597_s19, 3 }
   0x6   : > { %192 = sbr.rel (%p189_p2) target bundleno = 428 (0x1ac), region = 40  ;;  %p217_p3 = scmp.lt.s32.totalorder (!%p189_p2), %s602_s22, 15 }
   0xb   : > { %v236_v0 = vld [vmem:[%s786_s1] sm:$0x3]  ;;  %vm269_vm0 = vcmask 1041408   ;;  %s792_s22 = smov (!%p217_p3, %s602_s22), 15  ;;  %vm244_vm1 = vcmask 15360   ;;  %v387_v9 = vld [vmem:[%s788_s3 + $0x8] sm:$0xff] }
   0xc   : > { %646 = vmatprep.subr.msk.mxu0 %vm269_vm0, %v236_v0  ;;  %s603_s23 = sshll.u32 %s792_s22, 3  ;;  %660 = vmatprep.subr.mxu1 %v387_v9  ;;  %v386_v10 = vld [vmem:[%s788_s3] sm:$0xff]  ;;  %vm395_vm2 = vcmask 130048  }
   0xd   : > { %647 = vmatpush3.msk.msra.mxu0 %vm269_vm0, %v236_v0  ;;  %s220_s26 = scalar_lea.vmem %s785_s0, %s603_s23  ;;  %661 = vmatpush3.msra.mxu1 %v387_v9  ;;  %v606_v11 = vld [vmem:[%s787_s2] ss:$0 sm:$0xff]  ;;  %s226_s12 = scalar_lea.vmem %s790_s5, %s603_s23 }
   0xe   : > { %v228_v1 = vld [vmem:[%s220_s26] sm:$0xff]  ;;  %v229_v2 = vld [vmem:[%s220_s26 + $0x8] sm:$0xff]  ;;  %v230_v3 = vld [vmem:[%s220_s26 + $0x10] sm:$0xff]  ;;  %662 = vmatprep.subr.mxu1 %v386_v10 }
   0xf   : > { %648 = vmatprep.mubr.msk.f32.mxu0 %vm244_vm1, %v228_v1  ;;  %v231_v4 = vld [vmem:[%s220_s26 + $0x18] sm:$0xff]  ;;  %v232_v5 = vld [vmem:[%s220_s26 + $0x20] sm:$0xff]  ;;  %v233_v6 = vld [vmem:[%s220_s26 + $0x28] sm:$0xff]  ;;  %663 = vmatpush3.msra.mxu1 %v386_v10 }
  0x10   : > { %649 = vmatmul.mubr.msk.f32.vlgmr.msra.gmra.mxu0 %vm244_vm1, %v229_v2  ;;  %v234_v7 = vld [vmem:[%s220_s26 + $0x30] sm:$0xff]  ;;  %v235_v8 = vld [vmem:[%s220_s26 + $0x38] sm:$0xff]  ;;  %v616_v36 = vld [vmem:[%s789_s4] ss:$0 sm:$0xff] }
  0x11   : > { %651 = vmatprep.mubr.msk.f32.mxu0 %vm244_vm1, %v230_v3 }
  0x14   : > { %652 = vmatmul.mubr.msk.f32.gmra.mxu0 %vm244_vm1, %v231_v4 }
  0x15   : > { %654 = vmatprep.mubr.msk.f32.mxu0 %vm244_vm1, %v232_v5 }
  0x18   : > { %655 = vmatmul.mubr.msk.f32.gmra.mxu0 %vm244_vm1, %v233_v6 }
  0x19   : > { %657 = vmatprep.mubr.msk.f32.mxu0 %vm244_vm1, %v234_v7 }
  0x1c   : > { %658 = vmatmul.mubr.msk.f32.gmra.mxu0 %vm244_vm1, %v235_v8 }
  0xd0   : > { %v650_v12 = vpop.f32.mrf.mxu0 }
  0xd1   : > { %v345_v13 = vadd.f32 %v650_v12, %v606_v11 }
  0xd2   : > { %v339_v14 = vpop.f32.mrf.mxu0 }
  0xd3   : > { %v340_v15 = vadd.f32 %v606_v11, %v339_v14  ;;  %v379_v18 = vmax.f32 %v345_v13, 0.0 }
  0xd4   : > { %v653_v16 = vpop.f32.mrf.mxu0 }
  0xd5   : > { %v378_v17 = vmax.f32 %v340_v15, 0.0  ;;  %v355_v19 = vadd.f32 %v653_v16, %v606_v11 }
  0xd6   : > { %v349_v20 = vpop.f32.mrf.mxu0 }
  0xd7   : > { %v350_v21 = vadd.f32 %v606_v11, %v349_v20  ;;  %664 = vmatprep.mubr.msk.f32.mxu1 %vm395_vm2, %v378_v17  ;;  %v381_v24 = vmax.f32 %v355_v19, 0.0 }
  0xd8   : > { %v656_v22 = vpop.f32.mrf.mxu0  ;;  %665 = vmatmul.mubr.msk.f32.vlgmr.msra.gmra.mxu1 %vm395_vm2, %v379_v18 }
  0xd9   : > { %v380_v23 = vmax.f32 %v350_v21, 0.0  ;;  %v365_v25 = vadd.f32 %v656_v22, %v606_v11 }
  0xda   : > { %v359_v26 = vpop.f32.mrf.mxu0 }
  0xdb   : > { %v360_v27 = vadd.f32 %v606_v11, %v359_v26  ;;  %667 = vmatprep.mubr.msk.f32.mxu1 %vm395_vm2, %v380_v23  ;;  %v383_v30 = vmax.f32 %v365_v25, 0.0 }
  0xdc   : > { %v659_v28 = vpop.f32.mrf.mxu0  ;;  %668 = vmatmul.mubr.msk.f32.gmra.mxu1 %vm395_vm2, %v381_v24 }
  0xdd   : > { %v382_v29 = vmax.f32 %v360_v27, 0.0  ;;  %v375_v31 = vadd.f32 %v659_v28, %v606_v11 }
  0xde   : > { %v369_v32 = vpop.f32.mrf.mxu0 }
  0xdf   : > { %v370_v33 = vadd.f32 %v606_v11, %v369_v32  ;;  %670 = vmatprep.mubr.msk.f32.mxu1 %vm395_vm2, %v382_v29  ;;  %v385_v35 = vmax.f32 %v375_v31, 0.0 }
  0xe0   : > { %671 = vmatmul.mubr.msk.f32.gmra.mxu1 %vm395_vm2, %v383_v30 }
  0xe1   : > { %v384_v34 = vmax.f32 %v370_v33, 0.0 }
  0xe3   : > { %673 = vmatprep.mubr.msk.f32.mxu1 %vm395_vm2, %v384_v34 }
  0xe4   : > { %674 = vmatmul.mubr.msk.f32.gmra.mxu1 %vm395_vm2, %v385_v35 }
 0x198   : > { %v666_v37 = vpop.f32.mrf.mxu1 }
 0x199   : > { %v492_v38 = vadd.f32 %v666_v37, %v616_v36 }
 0x19a   : > { %v486_v39 = vpop.f32.mrf.mxu1 }
 0x19b   : > { %v526_v40 = vmax.f32 %v492_v38, 0.0  ;;  %v487_v41 = vadd.f32 %v616_v36, %v486_v39 }
 0x19c   : > { %v669_v42 = vpop.f32.mrf.mxu1 }
 0x19d   : > { %534 = vst.msk [vmem:[%s226_s12 + $0x8] sm:$0xff] %vm395_vm2, %v526_v40  ;;  %v525_v43 = vmax.f32 %v487_v41, 0.0  ;;  %v502_v44 = vadd.f32 %v669_v42, %v616_v36 }
 0x19e   : > { %v496_v45 = vpop.f32.mrf.mxu1 }
 0x19f   : > { %533 = vst.msk [vmem:[%s226_s12] sm:$0xff] %vm395_vm2, %v525_v43  ;;  %v528_v46 = vmax.f32 %v502_v44, 0.0  ;;  %v497_v47 = vadd.f32 %v616_v36, %v496_v45 }
 0x1a0   : > { %v672_v48 = vpop.f32.mrf.mxu1 }
 0x1a1   : > { %536 = vst.msk [vmem:[%s226_s12 + $0x18] sm:$0xff] %vm395_vm2, %v528_v46  ;;  %v527_v49 = vmax.f32 %v497_v47, 0.0  ;;  %v512_v50 = vadd.f32 %v672_v48, %v616_v36 }
 0x1a2   : > { %v506_v51 = vpop.f32.mrf.mxu1 }
 0x1a3   : > { %535 = vst.msk [vmem:[%s226_s12 + $0x10] sm:$0xff] %vm395_vm2, %v527_v49  ;;  %v530_v52 = vmax.f32 %v512_v50, 0.0  ;;  %v507_v53 = vadd.f32 %v616_v36, %v506_v51 }
 0x1a4   : > { %v675_v54 = vpop.f32.mrf.mxu1 }
 0x1a5   : > { %538 = vst.msk [vmem:[%s226_s12 + $0x28] sm:$0xff] %vm395_vm2, %v530_v52  ;;  %v529_v55 = vmax.f32 %v507_v53, 0.0  ;;  %v522_v56 = vadd.f32 %v675_v54, %v616_v36 }
 0x1a6   : > { %v516_v57 = vpop.f32.mrf.mxu1 }
 0x1a7   : > { %537 = vst.msk [vmem:[%s226_s12 + $0x20] sm:$0xff] %vm395_vm2, %v529_v55  ;;  %v532_v58 = vmax.f32 %v522_v56, 0.0  ;;  %v517_v59 = vadd.f32 %v616_v36, %v516_v57 }
 0x1a9   : > { %540 = vst.msk [vmem:[%s226_s12 + $0x38] sm:$0xff] %vm395_vm2, %v532_v58  ;;  %v531_v60 = vmax.f32 %v517_v59, 0.0 }
 0x1ab   : > { %539 = vst.msk [vmem:[%s226_s12 + $0x30] sm:$0xff] %vm395_vm2, %v531_v60 }
 0x1ac PF: > { %s15_s18 = sadd.s32 1, %s690_s18  }
 0x1ad   : > { %p12_p4 = scmp.ge.s32.totalorder %s15_s18, 4  }
 0x1af   :  { %14 = sbr.rel (!%p12_p4) target bundleno = 1 (0x1), region = 70 }

// kernel: _lambda_.16
= control target key start
LH: loop header
LB: loop body
LE: loop exit
PB: predicated region body
PF: predicated region fallthrough
CT: control target
= control target key end

     0   :  { %vm33_vm0 = vcmask 1042432   ;;  %vm29_vm1 = vcmask 23552   ;;  %v221_v0 = vmov 0.0   ;;  %vm222_vm2 = vmmov 0   ;;  %s274_s1 = inlined_call_operand.vmem [shape: f32[3,16], index: 1, kind: input, shape index: {}]   ;;  %s275_s0 = inlined_call_operand.vmem [shape: f32[8,3], index: 0, kind: input, shape index: {}]   ;;  %s276_s3 = inlined_call_operand.vmem [shape: f32[16,16], index: 3, kind: input, shape index: {}]   ;;  %s277_s2 = inlined_call_operand.vmem [shape: f32[1,16], index: 2, kind: input, shape index: {}]   ;;  %s278_s4 = inlined_call_operand.vmem [shape: f32[1,16], index: 4, kind: input, shape index: {}]   ;;  %s279_s5 = inlined_call_operand.vmem [shape: f32[8,16], index: 5, kind: output, shape index: {}]  }
   0x1   :  { %207 = vmatprep.subr.mxu0 %v221_v0  ;;  %v21_v1 = vld [vmem:[%s274_s1] sm:$0x7]  ;;  %209 = vmatprep.mubr.msk.f32.mxu0 %vm222_vm2, %v221_v0  ;;  %v109_v3 = vld [vmem:[%s276_s3 + $0x8] sm:$0xff]  ;;  %vm117_vm3 = vcmask 130048  }
   0x2   :  { %v20_v2 = vld [vmem:[%s275_s0] sm:$0xff]  ;;  %208 = vmatpush3.msk.msra.mxu0 %vm33_vm0, %v21_v1  ;;  %212 = vmatprep.subr.mxu1 %v221_v0 }
   0x3   :  { %210 = vmatmul.mubr.msk.f32.vlgmr.msra.gmra.mxu0 %vm29_vm1, %v20_v2  ;;  %216 = vmatprep.mubr.msk.f32.mxu1 %vm222_vm2, %v221_v0  ;;  %v108_v4 = vld [vmem:[%s276_s3] sm:$0xff] }
   0x4   :  { %213 = vmatpush3.msra.mxu1 %v109_v3  ;;  %v197_v5 = vld [vmem:[%s277_s2] ss:$0 sm:$0xff] }
   0x5   :  { %214 = vmatprep.subr.mxu1 %v221_v0  ;;  %v200_v10 = vld [vmem:[%s278_s4] ss:$0 sm:$0xff] }
   0x6   :  { %215 = vmatpush3.msra.mxu1 %v108_v4 }
  0xc3   :  { %v103_v6 = vpop.f32.mrf.mxu0 }
  0xc4   :  { %v104_v7 = vadd.f32 %v197_v5, %v103_v6 }
  0xc5   :  { %v211_v8 = vpop.f32.mrf.mxu0 }
  0xc6   :  { %v107_v9 = vmax.f32 %v104_v7, 0.0 }
  0xc8   :  { %217 = vmatmul.mubr.msk.f32.vlgmr.msra.gmra.mxu1 %vm117_vm3, %v107_v9 }
 0x188   :  { %v187_v11 = vpop.f32.mrf.mxu1 }
 0x189   :  { %v188_v12 = vadd.f32 %v200_v10, %v187_v11 }
 0x18a   :  { %v218_v13 = vpop.f32.mrf.mxu1 }
 0x18b   :  { %v191_v14 = vmax.f32 %v188_v12, 0.0 }
 0x18d   :  { %192 = vst.msk [vmem:[%s279_s5] sm:$0xff] %vm117_vm3, %v191_v14 }

// kernel: _lambda_.19
= control target key start
LH: loop header
LB: loop body
LE: loop exit
PB: predicated region body
PF: predicated region fallthrough
CT: control target
= control target key end

     0   :  { %vm43_vm0 = vcmask 261120   ;;  %vm196_vm1 = vcmask 523264   ;;  %s533_s0 = inlined_call_operand.vmem [shape: f32[16,32], index: 0, kind: input, shape index: {}]   ;;  %s534_s1 = inlined_call_operand.vmem [shape: f32[16,32], index: 1, kind: input, shape index: {}]   ;;  %s535_s4 = inlined_call_operand.vmem [shape: f32[32,64], index: 4, kind: input, shape index: {}]   ;;  %s536_s6 = inlined_call_operand.vmem [shape: f32[64,32], index: 6, kind: input, shape index: {}]   ;;  %s537_s2 = inlined_call_operand.vmem [shape: f32[1,32], index: 2, kind: input, shape index: {}]   ;;  %s538_s3 = inlined_call_operand.vmem [shape: f32[1,32], index: 3, kind: input, shape index: {}]   ;;  %s539_s5 = inlined_call_operand.vmem [shape: f32[1,64], index: 5, kind: input, shape index: {}]   ;;  %s540_s7 = inlined_call_operand.vmem [shape: f32[1,32], index: 7, kind: input, shape index: {}]   ;;  %s541_s8 = inlined_call_operand.vmem [shape: f32[1,32], index: 8, kind: input, shape index: {}]   ;;  %s542_s9 = inlined_call_operand.vmem [shape: f32[1,32], index: 9, kind: input, shape index: {}]   ;;  %s543_s10 = inlined_call_operand.vmem [shape: f32[16,32], index: 10, kind: output, shape index: {}]  }
   0x1   :  { %v35_v0 = vld [vmem:[%s533_s0] sm:$0xff]  ;;  %v36_v2 = vld [vmem:[%s533_s0 + $0x8] sm:$0xff]  ;;  %v90_v18 = vld [vmem:[%s535_s4 + $0x18] sm:$0xff] }
   0x2   :  { %v37_v1 = vld [vmem:[%s534_s1] sm:$0xff]  ;;  %v38_v4 = vld [vmem:[%s534_s1 + $0x8] sm:$0xff]  ;;  %v89_v19 = vld [vmem:[%s535_s4 + $0x10] sm:$0xff]  ;;  %356 = vmatprep.subr.mxu0 %v90_v18 }
   0x3   :  { %v39_v3 = vadd.f32 %v37_v1, %v35_v0  ;;  %v40_v5 = vadd.f32 %v38_v4, %v36_v2  ;;  %357 = vmatpush3.msra.mxu0 %v90_v18  ;;  %v88_v20 = vld [vmem:[%s535_s4 + $0x8] sm:$0xff]  ;;  %v87_v21 = vld [vmem:[%s535_s4] sm:$0xff]  ;;  %v188_v22 = vld [vmem:[%s536_s6 + $0x38] sm:$0xff] }
   0x4   :  { %358 = vmatprep.subr.mxu0 %v89_v19  ;;  %v187_v23 = vld [vmem:[%s536_s6 + $0x30] sm:$0xff]  ;;  %367 = vmatprep.subr.mxu1 %v188_v22  ;;  %v186_v24 = vld [vmem:[%s536_s6 + $0x28] sm:$0xff]  ;;  %v185_v25 = vld [vmem:[%s536_s6 + $0x20] sm:$0xff] }
   0x5   :  { %v44_v6 = vsel %vm43_vm0, %v39_v3, 0.0  ;;  %v47_v7 = vsel %vm43_vm0, %v40_v5, 0.0  ;;  %359 = vmatpush3.msra.mxu0 %v89_v19  ;;  %368 = vmatpush3.msra.mxu1 %v188_v22  ;;  %v330_v33 = vld [vmem:[%s537_s2] ss:$0 sm:$0xff]  ;;  %v184_v42 = vld [vmem:[%s536_s6 + $0x18] sm:$0xff]  ;;  %v183_v43 = vld [vmem:[%s536_s6 + $0x10] sm:$0xff] }
   0x6   :  { %45 = vadd.xlane.f32.xlu0 %v44_v6  ;;  %360 = vmatprep.subr.mxu0 %v88_v20  ;;  %v331_v35 = vld [vmem:[%s538_s3] ss:$0 sm:$0xff]  ;;  %v182_v44 = vld [vmem:[%s536_s6 + $0x8] sm:$0xff] }
   0x7   :  { %361 = vmatpush3.msra.mxu0 %v88_v20  ;;  %369 = vmatprep.subr.mxu1 %v187_v23  ;;  %v181_v45 = vld [vmem:[%s536_s6] sm:$0xff] }
   0x8   :  { %362 = vmatprep.subr.mxu0 %v87_v21  ;;  %370 = vmatpush3.msra.mxu1 %v187_v23  ;;  %v332_v46 = vld [vmem:[%s539_s5] ss:$0 sm:$0xff] }
   0x9   :  { %363 = vmatpush3.msra.mxu0 %v87_v21  ;;  %371 = vmatprep.subr.mxu1 %v186_v24  ;;  %v335_v53 = vld [vmem:[%s540_s7] ss:$0 sm:$0xff] }
   0xa   :  { %48 = vadd.xlane.f32.xlu0 %v47_v7  ;;  %372 = vmatpush3.msra.mxu1 %v186_v24  ;;  %v339_v18 = vld [vmem:[%s542_s9] ss:$0 sm:$0xff] }
   0xb   :  { %373 = vmatprep.subr.mxu1 %v185_v25 }
   0xc   :  { %374 = vmatpush3.msra.mxu1 %v185_v25 }
   0xd   :  { %375 = vmatprep.subr.mxu1 %v184_v42 }
   0xe   :  { %376 = vmatpush3.msra.mxu1 %v184_v42 }
   0xf   :  { %377 = vmatprep.subr.mxu1 %v183_v43 }
  0x10   :  { %378 = vmatpush3.msra.mxu1 %v183_v43 }
  0x11   :  { %379 = vmatprep.subr.mxu1 %v182_v44 }
  0x12   :  { %380 = vmatpush3.msra.mxu1 %v182_v44 }
  0x13   :  { %381 = vmatprep.subr.mxu1 %v181_v45 }
  0x14   :  { %382 = vmatpush3.msra.mxu1 %v181_v45 }
  0x8f   :  { %v46_v8 = vpop.xlane.xlu0 %45 }
  0x90   :  { %v51_v9 = vmul.f32 0.03125, %v46_v8 }
  0x92   :  { %v53_v10 = vsub.f32 %v39_v3, %v51_v9 }
  0x93   :  { %v49_v11 = vpop.xlane.xlu0 %48 }
  0x94   :  { %v52_v12 = vmul.f32 0.03125, %v49_v11  ;;  %v55_v13 = vmul.f32 %v53_v10, %v53_v10 }
  0x96   :  { %v54_v14 = vsub.f32 %v40_v5, %v52_v12  ;;  %v57_v15 = vsel %vm43_vm0, %v55_v13, 0.0 }
  0x97   :  { %58 = vadd.xlane.f32.xlu1 %v57_v15  ;;  %v338_v15 = vld [vmem:[%s541_s8] ss:$0 sm:$0xff] }
  0x98   :  { %v56_v16 = vmul.f32 %v54_v14, %v54_v14 }
  0x9a   :  { %v60_v17 = vsel %vm43_vm0, %v56_v16, 0.0 }
  0x9b   :  { %61 = vadd.xlane.f32.xlu1 %v60_v17 }
 0x120   :  { %v59_v26 = vpop.xlane.xlu1 %58 }
 0x121   :  { %v63_v27 = vmul.f32 0.03125, %v59_v26 }
 0x123   :  { %v65_v28 = vadd.f32 1e-05, %v63_v27 }
 0x124   :  { %v62_v29 = vpop.xlane.xlu1 %61 }
 0x125   :  { %386 = vrsqrt.f32 %v65_v28  ;;  %v64_v30 = vmul.f32 0.03125, %v62_v29 }
 0x127   :  { %v66_v31 = vadd.f32 1e-05, %v64_v30 }
 0x129   :  { %388 = vrsqrt.f32 %v66_v31 }
 0x132   :  { %v387_v32 = vpop.eup %386 }
 0x133   :  { %v69_v34 = vmul.f32 %v387_v32, %v53_v10 }
 0x135   :  { %v77_v36 = vmul.f32 %v330_v33, %v69_v34 }
 0x136   :  { %v389_v37 = vpop.eup %388 }
 0x137   :  { %v70_v38 = vmul.f32 %v389_v37, %v54_v14  ;;  %v85_v39 = vadd.f32 %v331_v35, %v77_v36 }
 0x139   :  { %v78_v40 = vmul.f32 %v330_v33, %v70_v38  ;;  %364 = vmatprep.mubr.msk.f32.mxu0 %vm43_vm0, %v85_v39 }
 0x13b   :  { %v86_v41 = vadd.f32 %v331_v35, %v78_v40 }
 0x13d   :  { %365 = vmatmul.mubr.msk.f32.vlgmr.msra.gmra.mxu0 %vm43_vm0, %v86_v41 }
 0x1fd   :  { %v366_v47 = vpop.f32.mrf.mxu0 }
 0x1fe   :  { %v176_v48 = vadd.f32 %v366_v47, %v332_v46 }
 0x1ff   :  { %v170_v49 = vpop.f32.mrf.mxu0 }
 0x200   :  { %v171_v50 = vadd.f32 %v332_v46, %v170_v49  ;;  %v180_v52 = vmax.f32 %v176_v48, 0.0 }
 0x202   :  { %v179_v51 = vmax.f32 %v171_v50, 0.0 }
 0x204   :  { %383 = vmatprep.mubr.msk.f32.mxu1 %vm196_vm1, %v179_v51 }
 0x205   :  { %384 = vmatmul.mubr.msk.f32.vlgmr.msra.gmra.mxu1 %vm196_vm1, %v180_v52 }
 0x2c5   :  { %v385_v54 = vpop.f32.mrf.mxu1 }
 0x2c6   :  { %v275_v55 = vadd.f32 %v385_v54, %v335_v53 }
 0x2c7   :  { %v269_v56 = vpop.f32.mrf.mxu1 }
 0x2c8   :  { %v270_v57 = vadd.f32 %v335_v53, %v269_v56  ;;  %v279_v58 = vadd.f32 %v275_v55, %v86_v41 }
 0x2ca   :  { %v285_v59 = vsel %vm43_vm0, %v279_v58, 0.0  ;;  %v278_v60 = vadd.f32 %v270_v57, %v85_v39 }
 0x2cb   :  { %286 = vadd.xlane.f32.xlu1 %v285_v59 }
 0x2cc   :  { %v282_v61 = vsel %vm43_vm0, %v278_v60, 0.0 }
 0x2cd   :  { %283 = vadd.xlane.f32.xlu0 %v282_v61 }
 0x354   :  { %v287_v62 = vpop.xlane.xlu1 %286 }
 0x355   :  { %v289_v63 = vmul.f32 0.03125, %v287_v62 }
 0x356   :  { %v284_v0 = vpop.xlane.xlu0 %283 }
 0x357   :  { %v291_v1 = vsub.f32 %v279_v58, %v289_v63  ;;  %v288_v2 = vmul.f32 0.03125, %v284_v0 }
 0x359   :  { %v290_v3 = vsub.f32 %v278_v60, %v288_v2  ;;  %v293_v4 = vmul.f32 %v291_v1, %v291_v1 }
 0x35b   :  { %v297_v5 = vsel %vm43_vm0, %v293_v4, 0.0  ;;  %v292_v6 = vmul.f32 %v290_v3, %v290_v3 }
 0x35c   :  { %298 = vadd.xlane.f32.xlu1 %v297_v5 }
 0x35d   :  { %v294_v7 = vsel %vm43_vm0, %v292_v6, 0.0 }
 0x35e   :  { %295 = vadd.xlane.f32.xlu0 %v294_v7 }
 0x3e5   :  { %v299_v8 = vpop.xlane.xlu1 %298 }
 0x3e6   :  { %v301_v9 = vmul.f32 0.03125, %v299_v8 }
 0x3e7   :  { %v296_v10 = vpop.xlane.xlu0 %295 }
 0x3e8   :  { %v303_v11 = vadd.f32 1e-05, %v301_v9  ;;  %v300_v12 = vmul.f32 0.03125, %v296_v10 }
 0x3ea   :  { %390 = vrsqrt.f32 %v303_v11  ;;  %v302_v13 = vadd.f32 1e-05, %v300_v12 }
 0x3ec   :  { %392 = vrsqrt.f32 %v302_v13 }
 0x3f7   :  { %v391_v14 = vpop.eup %390 }
 0x3f8   :  { %v307_v16 = vmul.f32 %v391_v14, %v291_v1 }
 0x3f9   :  { %v393_v17 = vpop.eup %392 }
 0x3fa   :  { %v315_v19 = vmul.f32 %v338_v15, %v307_v16  ;;  %v306_v20 = vmul.f32 %v393_v17, %v290_v3 }
 0x3fc   :  { %v323_v21 = vadd.f32 %v339_v18, %v315_v19  ;;  %v314_v22 = vmul.f32 %v338_v15, %v306_v20 }
 0x3fe   :  { %325 = vst.msk [vmem:[%s543_s10 + $0x8] sm:$0xff] %vm43_vm0, %v323_v21  ;;  %v322_v23 = vadd.f32 %v339_v18, %v314_v22 }
 0x400   :  { %324 = vst.msk [vmem:[%s543_s10] sm:$0xff] %vm43_vm0, %v322_v23 }

// kernel: _lambda_.25
= control target key start
LH: loop header
LB: loop body
LE: loop exit
PB: predicated region body
PF: predicated region fallthrough
CT: control target
= control target key end

     0   :  { %vm33_vm0 = vcmask 261120   ;;  %vm209_vm1 = vcmask 31744   ;;  %s332_s1 = inlined_call_operand.vmem [shape: f32[32,32], index: 1, kind: input, shape index: {}]   ;;  %s333_s0 = inlined_call_operand.vmem [shape: f32[16,32], index: 0, kind: input, shape index: {}]   ;;  %s334_s3 = inlined_call_operand.vmem [shape: f32[32,4], index: 3, kind: input, shape index: {}]   ;;  %s335_s2 = inlined_call_operand.vmem [shape: f32[1,32], index: 2, kind: input, shape index: {}]   ;;  %s336_s4 = inlined_call_operand.vmem [shape: f32[1,4], index: 4, kind: input, shape index: {}]   ;;  %s337_s5 = inlined_call_operand.vmem [shape: f32[16,4], index: 5, kind: output, shape index: {}]  }
   0x1   :  { %v25_v0 = vld [vmem:[%s332_s1 + $0x18] sm:$0xff]  ;;  %v24_v1 = vld [vmem:[%s332_s1 + $0x10] sm:$0xff]  ;;  %v20_v2 = vld [vmem:[%s333_s0] sm:$0xff] }
   0x2   :  { %234 = vmatprep.subr.mxu0 %v25_v0  ;;  %v23_v3 = vld [vmem:[%s332_s1 + $0x8] sm:$0xff]  ;;  %242 = vmatprep.mubr.msk.f32.mxu0 %vm33_vm0, %v20_v2  ;;  %v22_v4 = vld [vmem:[%s332_s1] sm:$0xff]  ;;  %v120_v6 = vld [vmem:[%s334_s3 + $0x18] sm:$0xff] }
   0x3   :  { %235 = vmatpush3.msra.mxu0 %v25_v0  ;;  %v21_v5 = vld [vmem:[%s333_s0 + $0x8] sm:$0xff]  ;;  %245 = vmatprep.subr.mxu1 %v120_v6  ;;  %v119_v7 = vld [vmem:[%s334_s3 + $0x10] sm:$0xff]  ;;  %v117_v9 = vld [vmem:[%s334_s3] sm:$0xff] }
   0x4   :  { %236 = vmatprep.subr.mxu0 %v24_v1  ;;  %246 = vmatpush3.msra.mxu1 %v120_v6  ;;  %v118_v8 = vld [vmem:[%s334_s3 + $0x8] sm:$0xff]  ;;  %v216_v10 = vld [vmem:[%s335_s2] ss:$0 sm:$0xff] }
   0x5   :  { %237 = vmatpush3.msra.mxu0 %v24_v1  ;;  %247 = vmatprep.subr.mxu1 %v119_v7  ;;  %v219_v17 = vld [vmem:[%s336_s4] ss:$0 sm:$0xff] }
   0x6   :  { %238 = vmatprep.subr.mxu0 %v23_v3  ;;  %248 = vmatpush3.msra.mxu1 %v119_v7 }
   0x7   :  { %239 = vmatpush3.msra.mxu0 %v23_v3  ;;  %249 = vmatprep.subr.mxu1 %v118_v8 }
   0x8   :  { %240 = vmatprep.subr.mxu0 %v22_v4  ;;  %250 = vmatpush3.msra.mxu1 %v118_v8 }
   0x9   :  { %241 = vmatpush3.msra.mxu0 %v22_v4  ;;  %251 = vmatprep.subr.mxu1 %v117_v9 }
   0xa   :  { %243 = vmatmul.mubr.msk.f32.vlgmr.msra.gmra.mxu0 %vm33_vm0, %v21_v5  ;;  %252 = vmatpush3.msra.mxu1 %v117_v9 }
  0xca   :  { %v244_v11 = vpop.f32.mrf.mxu0 }
  0xcb   :  { %v112_v12 = vadd.f32 %v244_v11, %v216_v10 }
  0xcc   :  { %v106_v13 = vpop.f32.mrf.mxu0 }
  0xcd   :  { %v107_v14 = vadd.f32 %v216_v10, %v106_v13  ;;  %v116_v16 = vmax.f32 %v112_v12, 0.0 }
  0xcf   :  { %v115_v15 = vmax.f32 %v107_v14, 0.0 }
  0xd1   :  { %253 = vmatprep.mubr.msk.f32.mxu1 %vm33_vm0, %v115_v15 }
  0xd2   :  { %254 = vmatmul.mubr.msk.f32.vlgmr.msra.gmra.mxu1 %vm33_vm0, %v116_v16 }
 0x192   :  { %v255_v18 = vpop.f32.mrf.mxu1 }
 0x193   :  { %v206_v19 = vadd.f32 %v255_v18, %v219_v17 }
 0x194   :  { %v200_v20 = vpop.f32.mrf.mxu1 }
 0x195   :  { %211 = vst.msk [vmem:[%s337_s5 + $0x8] sm:$0xff] %vm209_vm1, %v206_v19  ;;  %v201_v21 = vadd.f32 %v219_v17, %v200_v20 }
 0x197   :  { %210 = vst.msk [vmem:[%s337_s5] sm:$0xff] %vm209_vm1, %v201_v21 }

// kernel: _lambda_.18
= control target key start
LH: loop header
LB: loop body
LE: loop exit
PB: predicated region body
PF: predicated region fallthrough
CT: control target
= control target key end

     0   :  { %s3389_s30 = smov 0   ;;  %s3391_s24 = smov 0   ;;  %s4154_s0 = inlined_call_operand.vmem [shape: f32[2,8,96], index: 0, kind: input, shape index: {}]   ;;  %s4155_s1 = inlined_call_operand.vmem [shape: f32[2,64,16], index: 1, kind: input, shape index: {}]   ;;  %s4156_s2 = inlined_call_operand.vmem [shape: f32[2,1,16], index: 2, kind: input, shape index: {}]   ;;  %s4157_s3 = inlined_call_operand.vmem [shape: f32[2,8,1], index: 3, kind: input, shape index: {}, may-alias: {3,4}]   ;;  %s4158_s4 = inlined_call_operand.vmem [shape: f32[2,8,1], index: 4, kind: input, shape index: {}, may-alias: {3,4}]   ;;  %s4159_s5 = inlined_call_operand.vmem [shape: f32[16,128], index: 5, kind: input, shape index: {}]   ;;  %s4160_s6 = inlined_call_operand.vmem [shape: f32[1,128], index: 6, kind: input, shape index: {}]   ;;  %s4161_s7 = inlined_call_operand.vmem [shape: f32[16,64], index: 7, kind: input, shape index: {}]   ;;  %s4162_s8 = inlined_call_operand.vmem [shape: f32[1,64], index: 8, kind: input, shape index: {}]   ;;  %s4163_s9 = inlined_call_operand.vmem [shape: f32[32,16], index: 9, kind: input, shape index: {}]   ;;  %s4164_s10 = inlined_call_operand.vmem [shape: f32[1,16], index: 10, kind: input, shape index: {}]   ;;  %s4165_s11 = inlined_call_operand.vmem [shape: f32[32,32], index: 11, kind: input, shape index: {}]   ;;  %s4166_s12 = inlined_call_operand.vmem [shape: f32[1,32], index: 12, kind: input, shape index: {}]   ;;  %s4167_s13 = inlined_call_operand.vmem [shape: f32[1,16], index: 13, kind: input, shape index: {}]   ;;  %s4168_s14 = inlined_call_operand.vmem [shape: f32[1,16], index: 14, kind: input, shape index: {}]   ;;  %s4169_s15 = inlined_call_operand.vmem [shape: f32[16,32], index: 15, kind: input, shape index: {}]   ;;  %s4170_s16 = inlined_call_operand.vmem [shape: f32[1,32], index: 16, kind: input, shape index: {}]   ;;  %s4171_s17 = inlined_call_operand.vmem [shape: f32[32,16], index: 17, kind: input, shape index: {}]   ;;  %s4172_s18 = inlined_call_operand.vmem [shape: f32[1,16], index: 18, kind: input, shape index: {}]   ;;  %s4173_s19 = inlined_call_operand.vmem [shape: f32[1,16], index: 19, kind: input, shape index: {}]   ;;  %s4174_s20 = inlined_call_operand.vmem [shape: f32[1,16], index: 20, kind: input, shape index: {}]   ;;  %s4175_s21 = inlined_call_operand.vmem [shape: f32[2,64,16], index: 21, kind: output, shape index: {0}]   ;;  %s4176_s22 = inlined_call_operand.vmem [shape: f32[2,8,32], index: 22, kind: output, shape index: {1}]   ;;  %s4177_s23 = inlined_call_operand.vmem [shape: f32[2,1,64], index: 23, kind: output, shape index: {2}]  }
   0x1   :  { %4186 = sst [smem:[#allocation6_spill]] %s4154_s0 }
   0x2   :  { %4187 = sst [smem:[#allocation7_spill]] %s4155_s1 }
   0x3   :  { %4188 = sst [smem:[#allocation8_spill]] %s4156_s2 }
   0x4   :  { %4189 = sst [smem:[#allocation9_spill]] %s4157_s3 }
   0x5   :  { %4190 = sst [smem:[#allocation10_spill]] %s4158_s4  ;;  %s3387_s4 = smov 0  }
   0x6   :  { %4191 = sst [smem:[#allocation11_spill]] %s4159_s5 }
   0x7   :  { %4192 = sst [smem:[#allocation12_spill]] %s4160_s6 }
   0x8   :  { %4193 = sst [smem:[#allocation13_spill]] %s4161_s7 }
   0x9 LB: > { %s46_s25 = sadd.s32 1, %s3252_s30  ;;  %p2929_p0 = scmp.ge.s32.totalorder %s3256_s24, 1  ;;  %s3256_s24 = sphi %s3391_s24, %s34_s24   ;;  %s3252_s30 = sphi %s3389_s30, %s4207_s30   ;;  %s3248_s4 = sphi %s3387_s4, %s4206_s4  }
   0xa   : > { %p48_p1 = scmp.ge.s32.totalorder %s46_s25, 2  ;;  %p705_p2 = scmp.lt.s32.totalorder %s3256_s24, 3 }
   0xc   : > { %s4209_s25 = smov (%p48_p1, %s46_s25), 0  ;;  %p706_p3 = pnand %p2929_p0, %p705_p2 }
   0xd   : > { %s4194_s26 = sld [smem:[#allocation13_spill]] (!%p706_p3)  ;;  %p805_p4 = scmp.lt.s32.totalorder (!%p706_p3), %s3248_s4, 1 }
   0xe   : > { %709 = sbr.rel (%p706_p3) target bundleno = 1830 (0x726), region = 104  ;;  %s4195_s3 = sld [smem:[#allocation7_spill]] (!%p706_p3) }
   0xf   : > { %s4196_s2 = sld [smem:[#allocation6_spill]] (!%p706_p3)  ;;  %s4181_s28 = smov (!%p706_p3), 96  }
  0x10   : > { %s4200_s5 = sld [smem:[#allocation12_spill]] (!%p706_p3)  ;;  %s4185_s1 = smov (!%p706_p3), 64  }
  0x13   : > { %v1064_v0 = vld [vmem:[%s4194_s26 + $0x8] sm:$0xff]  ;;  %v1063_v1 = vld [vmem:[%s4194_s26] sm:$0xff]  ;;  %s4211_s4 = smov (!%p805_p4, %s3248_s4), 1  ;;  %vm861_vm0 = vcmask 130048   ;;  %vm958_vm1 = vcmask 122880   ;;  %vm3260_vm2 = vmmov 0  }
  0x14   : > { %3047 = vmatprep.subr.mxu1 %v1064_v0  ;;  %s4180_s27 = sshll.u32 %s4211_s4, 6  ;;  %s3415_s7 = sshll.u32 %s4211_s4, 3  ;;  %vm1459_vm3 = vcmask 261120   ;;  %vm2556_vm4 = vcmask 1041409   ;;  %vm2558_vm5 = vcmask 1042434   ;;  %vm2560_vm6 = vcmask 1043459  }
  0x15   : > { %3048 = vmatpush3.msra.mxu1 %v1064_v0  ;;  %s3422_s0 = scalar_lea.vmem %s4195_s3, %s4180_s27  ;;  %s808_s6 = scalar_lea.vmem %s4196_s2, %s3415_s7  ;;  %vm2562_vm7 = vcmask 1044484   ;;  %vm2564_vm8 = vcmask 1045509   ;;  %vm2566_vm9 = vcmask 1046534   ;;  %vm2568_vm10 = vcmask 1047559  }
  0x16   : > { %3049 = vmatprep.subr.mxu1 %v1063_v1  ;;  %v3425_v2 = vld [vmem:[%s3422_s0] sm:$0xff]  ;;  %v3428_v3 = vld [vmem:[%s3422_s0 + $0x8] sm:$0xff]  ;;  %v3431_v4 = vld [vmem:[%s3422_s0 + $0x10] sm:$0xff]  ;;  %s4198_s2 = sld [smem:[#allocation8_spill]]  ;;  %s4199_s27 = smov 96   ;;  %vm2718_vm13 = vcmask 392192  }
  0x17   : > { %3050 = vmatpush3.msra.mxu1 %v1063_v1  ;;  %v862_v5 = vsel %vm861_vm0, %v3425_v2, 0.0  ;;  %v883_v6 = vmul.f32 %v3425_v2, %v3425_v2  ;;  %v3443_v7 = vsel %vm861_vm0, %v3425_v2, inf  ;;  %3051 = vmatprep.mubr.msk.f32.mxu1 %vm861_vm0, %v3425_v2  ;;  %v3449_v8 = vsel %vm861_vm0, %v3425_v2, -inf  ;;  %v3459_v12 = vld [vmem:[%s808_s6] sm:$0xff]  ;;  %v3469_v17 = vld [vmem:[%s3422_s0 + $0x18] sm:$0xff]  ;;  %v3502_v35 = vld [vmem:[%s3422_s0 + $0x28] sm:$0xff] }
  0x18   : > { %v863_v9 = vsel %vm861_vm0, %v3428_v3, 0.0  ;;  %v884_v10 = vmul.f32 %v3428_v3, %v3428_v3  ;;  %v913_v11 = vsel %vm861_vm0, %v3428_v3, inf  ;;  %3052 = vmatmul.mubr.msk.f32.vlgmr.msra.gmra.mxu1 %vm861_vm0, %v3428_v3  ;;  %v865_v15 = vsel %vm861_vm0, %v3431_v4, 0.0  ;;  %1292 = vrot.lane.b32.xlu0 %v3459_v12, %s4181_s28  ;;  %v3481_v22 = vld [vmem:[%s3422_s0 + $0x20] sm:$0xff]  ;;  %v3511_v40 = vld [vmem:[%s3422_s0 + $0x30] sm:$0xff]  ;;  %v3530_v53 = vld [vmem:[%s3422_s0 + $0x38] sm:$0xff] }
  0x19   : > { %v891_v13 = vsel %vm861_vm0, %v883_v6, 0.0  ;;  %v864_v14 = vadd.f32 %v863_v9, %v862_v5  ;;  %v885_v16 = vmul.f32 %v3431_v4, %v3431_v4  ;;  %3054 = vmatprep.mubr.msk.f32.mxu1 %vm861_vm0, %v3431_v4  ;;  %v934_v19 = vsel %vm861_vm0, %v3428_v3, -inf  ;;  %s4197_s0 = sld [smem:[#allocation11_spill]]  ;;  %s4184_s28 = smov 32  }
  0x1a   : > { %v892_v18 = vsel %vm861_vm0, %v884_v10, 0.0  ;;  %v914_v20 = vsel %vm861_vm0, %v3431_v4, inf  ;;  %v867_v21 = vsel %vm861_vm0, %v3469_v17, 0.0  ;;  %v886_v26 = vmul.f32 %v3469_v17, %v3469_v17 }
  0x1b   : > { %v893_v23 = vadd.f32 %v892_v18, %v891_v13  ;;  %v866_v24 = vadd.f32 %v865_v15, %v864_v14  ;;  %v894_v25 = vsel %vm861_vm0, %v885_v16, 0.0  ;;  %v935_v27 = vsel %vm861_vm0, %v3431_v4, -inf }
  0x1c   : > { %v915_v28 = vsel %vm861_vm0, %v3469_v17, inf  ;;  %3055 = vmatmul.mubr.msk.f32.gmra.mxu1 %vm861_vm0, %v3469_v17  ;;  %v869_v29 = vsel %vm861_vm0, %v3481_v22, 0.0  ;;  %v887_v30 = vmul.f32 %v3481_v22, %v3481_v22  ;;  %v896_v33 = vsel %vm861_vm0, %v886_v26, 0.0  ;;  %s821_s6 = scalar_lea.vmem %s4198_s2, %s4211_s4  ;;  %s4202_s2 = sld [smem:[#allocation10_spill]] }
  0x1d   : > { %v895_v31 = vadd.f32 %v894_v25, %v893_v23  ;;  %v868_v32 = vadd.f32 %v867_v21, %v866_v24  ;;  %v916_v34 = vsel %vm861_vm0, %v3481_v22, inf  ;;  %3057 = vmatprep.mubr.msk.f32.mxu1 %vm861_vm0, %v3481_v22  ;;  %v937_v38 = vsel %vm861_vm0, %v3481_v22, -inf }
  0x1e   : > { %v898_v36 = vsel %vm861_vm0, %v887_v30, 0.0  ;;  %v917_v37 = vmin.f32 %v3443_v7, %v916_v34  ;;  %v871_v39 = vsel %vm861_vm0, %v3502_v35, 0.0  ;;  %v938_v43 = vmax.f32 %v3449_v8, %v937_v38 }
  0x1f   : > { %v897_v41 = vadd.f32 %v896_v33, %v895_v31  ;;  %v870_v42 = vadd.f32 %v869_v29, %v868_v32  ;;  %v888_v44 = vmul.f32 %v3502_v35, %v3502_v35  ;;  %v918_v45 = vsel %vm861_vm0, %v3502_v35, inf }
  0x20   : > { %v939_v46 = vsel %vm861_vm0, %v3502_v35, -inf  ;;  %3058 = vmatmul.mubr.msk.f32.gmra.mxu1 %vm861_vm0, %v3502_v35  ;;  %v873_v47 = vsel %vm861_vm0, %v3511_v40, 0.0  ;;  %v889_v48 = vmul.f32 %v3511_v40, %v3511_v40  ;;  %v919_v52 = vmin.f32 %v913_v11, %v918_v45 }
  0x21   : > { %v899_v49 = vadd.f32 %v898_v36, %v897_v41  ;;  %v872_v50 = vadd.f32 %v871_v39, %v870_v42  ;;  %v900_v51 = vsel %vm861_vm0, %v888_v44, 0.0  ;;  %3060 = vmatprep.mubr.msk.f32.mxu1 %vm861_vm0, %v3511_v40  ;;  %v940_v54 = vmax.f32 %v934_v19, %v939_v46 }
  0x22   : > { %v902_v55 = vsel %vm861_vm0, %v889_v48, 0.0  ;;  %v920_v56 = vsel %vm861_vm0, %v3511_v40, inf  ;;  %v941_v57 = vsel %vm861_vm0, %v3511_v40, -inf  ;;  %v936_v58 = vsel %vm861_vm0, %v3469_v17, -inf }
  0x23   : > { %v901_v59 = vadd.f32 %v900_v51, %v899_v49  ;;  %v924_v60 = vmin.f32 %v917_v37, %v919_v52  ;;  %v874_v61 = vadd.f32 %v873_v47, %v872_v50  ;;  %v921_v62 = vmin.f32 %v914_v20, %v920_v56  ;;  %v986_v47 = vld [vmem:[%s4197_s0 + $0x8] sm:$0xff]  ;;  %v985_v49 = vld [vmem:[%s4197_s0] sm:$0xff] }
  0x24   : > { %v942_v63 = vmax.f32 %v935_v27, %v941_v57  ;;  %v875_v0 = vsel %vm861_vm0, %v3530_v53, 0.0  ;;  %v890_v1 = vmul.f32 %v3530_v53, %v3530_v53  ;;  %3061 = vmatmul.mubr.msk.f32.gmra.mxu1 %vm861_vm0, %v3530_v53  ;;  %v922_v7 = vsel %vm861_vm0, %v3530_v53, inf  ;;  %v984_v50 = vld [vmem:[%s821_s6] sm:$0x1]  ;;  %s832_s6 = scalar_lea.vmem %s4202_s2, %s3415_s7  ;;  %s4204_s2 = smov 32  }
  0x25   : > { %v903_v5 = vadd.f32 %v902_v55, %v901_v59  ;;  %v876_v6 = vadd.f32 %v875_v0, %v874_v61  ;;  %v943_v8 = vsel %vm861_vm0, %v3530_v53, -inf  ;;  %v945_v9 = vmax.f32 %v938_v43, %v940_v54  ;;  %v2939_v51 = vld [vmem:[%s4162_s8] ss:$0 sm:$0xff] }
  0x26   : > { %v904_v10 = vsel %vm861_vm0, %v890_v1, 0.0  ;;  %v923_v11 = vmin.f32 %v915_v28, %v922_v7  ;;  %v944_v13 = vmax.f32 %v936_v58, %v943_v8  ;;  %v3259_v48 = vmov 0.0  }
  0x27   : > { %v877_v14 = vrot.slane %v876_v6, 4  ;;  %v905_v15 = vadd.f32 %v904_v10, %v903_v5  ;;  %3040 = vmatprep.subr.mxu0 %v3259_v48  ;;  %3044 = vmatprep.mubr.msk.f32.mxu0 %vm3260_vm2, %v3259_v48  ;;  %v3261_v8 = vmov 1966171168   ;;  %v1206_v10 = vlaneseq }
  0x28   : > { %v925_v16 = vmin.f32 %v921_v62, %v923_v11  ;;  %v946_v18 = vmax.f32 %v942_v63, %v944_v13  ;;  %3041 = vmatpush3.msra.mxu0 %v986_v47  ;;  %vm2720_vm14 = vcmask 516096  }
  0x29   : > { %v878_v19 = vadd.f32 %v877_v14, %v876_v6  ;;  %v906_v20 = vrot.slane %v905_v15, 4  ;;  %3042 = vmatprep.subr.mxu0 %v3259_v48  ;;  %v1207_v14 = vshrl.u32 %v1206_v10, 7 }
  0x2a   : > { %v926_v21 = vmin.f32 %v924_v60, %v925_v16  ;;  %v947_v23 = vmax.f32 %v945_v9, %v946_v18  ;;  %3043 = vmatpush3.msra.mxu0 %v985_v49  ;;  %v1204_v9 = vunpack.c.l.s4 %v3261_v8 }
  0x2b   : > { %v879_v24 = vrot.slane %v878_v19, 2  ;;  %v907_v25 = vadd.f32 %v906_v20, %v905_v15  ;;  %3045 = vmatmul.mubr.msk.f32.vlgmr.msra.gmra.mxu0 %vm861_vm0, %v984_v50 }
  0x2c   : > { %v927_v26 = vrot.slane %v926_v21, 4  ;;  %v948_v27 = vrot.slane %v947_v23, 4  ;;  %v1205_v13 = vunpack.c.0.s8 %v1204_v9 }
  0x2d   : > { %v880_v29 = vadd.f32 %v879_v24, %v878_v19  ;;  %v908_v30 = vrot.slane %v907_v25, 2  ;;  %v1202_v19 = vcombine.high %v3459_v12, %v3459_v12 }
  0x2e   : > { %v928_v31 = vmin.f32 %v926_v21, %v927_v26  ;;  %v949_v32 = vmax.f32 %v947_v23, %v948_v27  ;;  %v3584_v16 = vsub.s32 %v1205_v13, %v1207_v14  ;;  %v3590_v21 = vsub.s32 0, %v1207_v14  ;;  %v1451_v13 = vld [vmem:[%s4163_s9 + $0x18] sm:$0xff] }
  0x2f   : > { %v881_v33 = vrot.slane %v880_v29, 1  ;;  %v909_v34 = vadd.f32 %v908_v30, %v907_v25  ;;  %3063 = vmatprep.subr.mxu0 %v1451_v13 }
  0x30   : > { %v929_v28 = vrot.slane %v928_v31, 2  ;;  %v950_v36 = vrot.slane %v949_v32, 2  ;;  %v1209_v18 = vrot.slane %v3459_v12, %v3584_v16  ;;  %v1216_v23 = vrot.slane %v1202_v19, %v3584_v16  ;;  %3064 = vmatpush3.msra.mxu0 %v1451_v13 }
  0x31   : > { %v882_v37 = vadd.f32 %v881_v33, %v880_v29  ;;  %v910_v38 = vrot.slane %v909_v34, 1 }
  0x32   : > { %v930_v39 = vmin.f32 %v928_v31, %v929_v28  ;;  %v951_v41 = vmax.f32 %v949_v32, %v950_v36  ;;  %v1217_v20 = vcombine.high %v1209_v18, %v1209_v18  ;;  %v1225_v25 = vrot.slane %v1209_v18, %v3584_v16 }
  0x33   : > { %v911_v42 = vadd.f32 %v910_v38, %v909_v34  ;;  %959 = vst.msk [vmem:[#allocation2] sm:$0x1] %vm958_vm1, %v882_v37  ;;  %v1218_v26 = vcombine.high %v1216_v23, %v1216_v23  ;;  %v1232_v33 = vrot.slane %v1216_v23, %v3584_v16 }
  0x34   : > { %v931_v43 = vrot.slane %v930_v39, 1  ;;  %v952_v44 = vrot.slane %v951_v41, 1  ;;  %v1239_v24 = vrot.slane %v1217_v20, %v3584_v16  ;;  %v1247_v29 = vcombine.high %v1225_v25, %v1225_v25 }
  0x35   : > { %960 = vst.msk [vmem:[#allocation3] sm:$0x1] %vm958_vm1, %v911_v42  ;;  %v1254_v32 = vrot.slane %v1225_v25, %v3590_v21  ;;  %v1246_v36 = vrot.slane %v1218_v26, %v3584_v16  ;;  %v1248_v49 = vcombine.high %v1232_v33, %v1232_v33 }
  0x36   : > { %v932_v45 = vmin.f32 %v930_v39, %v931_v43  ;;  %v953_v46 = vmax.f32 %v951_v41, %v952_v44  ;;  %v1258_v27 = vrot.slane %v1239_v24, %v3590_v21  ;;  %v1249_v31 = vcombine.high %v1239_v24, %v1239_v24 }
  0x37   : > { %v1262_v37 = vrot.slane %v1247_v29, %v3590_v21  ;;  %v1270_v43 = vrot.slane %v1232_v33, %v3590_v21  ;;  %v1274_v44 = vrot.slane %v1246_v36, %v3590_v21  ;;  %v1250_v50 = vcombine.high %v1246_v36, %v1246_v36  ;;  %v1449_v36 = vld [vmem:[%s4163_s9 + $0x8] sm:$0xff] }
  0x38   : > { %961 = vst.msk [vmem:[#allocation4] sm:$0x1] %vm958_vm1, %v932_v45  ;;  %962 = vst.msk [vmem:[#allocation5] sm:$0x1] %vm958_vm1, %v953_v46  ;;  %v1266_v38 = vrot.slane %v1249_v31, %v3590_v21 }
  0x8a   : > { %v1293_v30 = vpop.permute.xlu0 %1292 }
  0x8b   : > { %v1296_v28 = vmul.f32 %v1293_v30, %v1258_v27  ;;  %v1295_v41 = vmul.f32 %v1293_v30, %v1254_v32  ;;  %v1297_v46 = vmul.f32 %v1293_v30, %v1262_v37  ;;  %v1298_v47 = vmul.f32 %v1293_v30, %v1266_v38  ;;  %v1448_v37 = vld [vmem:[%s4163_s9] sm:$0xff] }
  0xd8   : > { %v3053_v52 = vpop.f32.mrf.mxu1 }
  0xd9   : > { %v1168_v54 = vadd.f32 %v3053_v52, %v2939_v51 }
  0xda   : > { %v1162_v55 = vpop.f32.mrf.mxu1 }
  0xdb   : > { %v1163_v56 = vadd.f32 %v2939_v51, %v1162_v55  ;;  %1329 = vrot.lane.b32.xlu1 %v1168_v54, %s4199_s27  ;;  %v1304_v34 = vadd.f32 1.0, %v1168_v54 }
  0xdc   : > { %v3056_v57 = vpop.f32.mrf.mxu1 }
  0xdd   : > { %1327 = vrot.lane.b32.xlu0 %v1163_v56, %s4199_s27  ;;  %v1178_v59 = vadd.f32 %v3056_v57, %v2939_v51  ;;  %v1303_v39 = vadd.f32 1.0, %v1163_v56  ;;  %v1312_v42 = vmul.f32 %v1304_v34, %v1296_v28  ;;  %v1299_v56 = vmul.f32 %v1293_v30, %v1270_v43  ;;  %v987_v34 = vld [vmem:[%s4200_s5] sm:$0x1]  ;;  %s4201_s5 = sld [smem:[#allocation9_spill]] }
  0xde   : > { %v1172_v58 = vpop.f32.mrf.mxu1 }
  0xdf   : > { %v1173_v60 = vadd.f32 %v2939_v51, %v1172_v58  ;;  %v1311_v55 = vmul.f32 %v1303_v39, %v1295_v41 }
  0xe0   : > { %v3059_v61 = vpop.f32.mrf.mxu1 }
  0xe1   : > { %v1188_v62 = vadd.f32 %v3059_v61, %v2939_v51  ;;  %1331 = vrot.lane.b32.xlu1 %v1173_v60, %s4199_s27  ;;  %1333 = vrot.lane.b32.xlu0 %v1178_v59, %s4199_s27  ;;  %v1305_v52 = vadd.f32 1.0, %v1173_v60  ;;  %v1300_v61 = vmul.f32 %v1293_v30, %v1274_v44 }
  0xe2   : > { %v1182_v63 = vpop.f32.mrf.mxu1 }
  0xe3   : > { %v1183_v0 = vadd.f32 %v2939_v51, %v1182_v63  ;;  %v1278_v63 = vrot.slane %v1248_v49, %v3590_v21 }
  0xe4   : > { %v3062_v1 = vpop.f32.mrf.mxu1 }
  0xe5   : > { %v3572_v5 = vadd.f32 %v3062_v1, %v2939_v51  ;;  %1335 = vrot.lane.b32.xlu1 %v1183_v0, %s4199_s27  ;;  %1337 = vrot.lane.b32.xlu0 %v1188_v62, %s4199_s27  ;;  %v1282_v1 = vrot.slane %v1250_v50, %v3590_v21  ;;  %v1307_v8 = vadd.f32 1.0, %v1183_v0  ;;  %v1301_v0 = vmul.f32 %v1293_v30, %v1278_v63 }
  0xe6   : > { %v1192_v6 = vpop.f32.mrf.mxu1 }
  0xe7   : > { %v3576_v7 = vadd.f32 %v2939_v51, %v1192_v6  ;;  %v1306_v51 = vadd.f32 1.0, %v1178_v59  ;;  %v1308_v6 = vadd.f32 1.0, %v1188_v62  ;;  %v1313_v59 = vmul.f32 %v1305_v52, %v1297_v46  ;;  %v1450_v62 = vld [vmem:[%s4163_s9 + $0x10] sm:$0xff] }
  0xe8   : > { %v1302_v18 = vmul.f32 %v1293_v30, %v1282_v1  ;;  %v1310_v19 = vadd.f32 1.0, %v3572_v5  ;;  %v1315_v23 = vmul.f32 %v1307_v8, %v1299_v56  ;;  %3065 = vmatprep.subr.mxu0 %v1450_v62  ;;  %v3263_v52 = vmov 0  }
  0xe9   : > { %1339 = vrot.lane.b32.xlu1 %v3576_v7, %s4199_s27  ;;  %1341 = vrot.lane.b32.xlu0 %v3572_v5, %s4199_s27  ;;  %v1314_v60 = vmul.f32 %v1306_v51, %v1298_v47  ;;  %v1309_v20 = vadd.f32 1.0, %v3576_v7  ;;  %v1316_v24 = vmul.f32 %v1308_v6, %v1300_v61 }
  0xea   : > { %3066 = vmatpush3.msra.mxu0 %v1450_v62  ;;  %v1318_v7 = vmul.f32 %v1310_v19, %v1302_v18  ;;  %3163 = vset.pattern.permute.xlu1 %v3263_v52 }
  0xeb   : > { %v3582_v11 = vpop.f32.mrf.mxu0  ;;  %v1317_v5 = vmul.f32 %v1309_v20, %v1301_v0  ;;  %3067 = vmatprep.subr.mxu0 %v1449_v36  ;;  %3164 = vset.pattern.permute.xlu0 %v3263_v52 }
  0xec   : > { %v3649_v28 = vadd.f32 %v3582_v11, %v987_v34  ;;  %3068 = vmatpush3.msra.mxu0 %v1449_v36 }
  0xed   : > { %v3046_v15 = vpop.f32.mrf.mxu0  ;;  %3069 = vmatprep.subr.mxu0 %v1448_v37 }
  0xee   : > { %v1359_v38 = vadd.f32 1.0, %v3649_v28  ;;  %3070 = vmatpush3.msra.mxu0 %v1448_v37 }
  0xf0   : > { %v3659_v39 = vrot.slane %v1359_v38, %v3590_v21 }
 0x14d   : > { %v1330_v45 = vpop.permute.xlu1 %1329 }
 0x14e   : > { %v3603_v54 = vadd.f32 %v1330_v45, %v1312_v42 }
 0x14f   : > { %v1328_v57 = vpop.permute.xlu0 %1327 }
 0x150   : > { %v3605_v58 = vadd.f32 %v1328_v57, %v1311_v55  ;;  %1374 = vrot.lane.b32.xlu0 %v3603_v54, %s4184_s28 }
 0x152   : > { %1372 = vrot.lane.b32.xlu1 %v3605_v58, %s4184_s28 }
 0x153   : > { %v1332_v9 = vpop.permute.xlu1 %1331  ;;  %v1334_v10 = vpop.permute.xlu0 %1333 }
 0x154   : > { %v3616_v14 = vadd.f32 %v1332_v9, %v1313_v59  ;;  %v3618_v15 = vadd.f32 %v1334_v10, %v1314_v60  ;;  %v3690_v10 = vld [vmem:[%s832_s6] sm:$0xff]  ;;  %s3266_s6 = smov 48  }
 0x156   : > { %1376 = vrot.lane.b32.xlu1 %v3616_v14, %s4184_s28  ;;  %1378 = vrot.lane.b32.xlu0 %v3618_v15, %s4184_s28 }
 0x157   : > { %v1336_v25 = vpop.permute.xlu1 %1335  ;;  %v1338_v26 = vpop.permute.xlu0 %1337 }
 0x158   : > { %v3629_v27 = vadd.f32 %v1336_v25, %v1315_v23  ;;  %v3631_v29 = vadd.f32 %v1338_v26, %v1316_v24 }
 0x15a   : > { %1380 = vrot.lane.b32.xlu1 %v3629_v27, %s4184_s28  ;;  %1382 = vrot.lane.b32.xlu0 %v3631_v29, %s4184_s28 }
 0x15b   : > { %v1340_v30 = vpop.permute.xlu1 %1339  ;;  %v1342_v31 = vpop.permute.xlu0 %1341 }
 0x15c   : > { %v3637_v32 = vadd.f32 %v1340_v30, %v1317_v5  ;;  %v3639_v33 = vadd.f32 %v1342_v31, %v1318_v7 }
 0x15e   : > { %1384 = vrot.lane.b32.xlu1 %v3637_v32, %s4184_s28  ;;  %1386 = vrot.lane.b32.xlu0 %v3639_v33, %s4184_s28  ;;  %s3665_s28 = scalar_lea.vmem %s4201_s5, %s3415_s7  ;;  %s4205_s5 = sshll.u32 %s4211_s4, 6 }
 0x15f   : > { %v1061_v44 = vld [vmem:[%s3665_s28] sm:$0xff] }
 0x160   : > { %v1590_v45 = vcombine.high %v1061_v44, %v1061_v44  ;;  %v1597_v51 = vrot.slane %v1061_v44, %v3584_v16 }
 0x162   : > { %v1613_v55 = vrot.slane %v1597_v51, %v3584_v16  ;;  %v1605_v57 = vcombine.high %v1597_v51, %v1597_v51  ;;  %v1604_v63 = vrot.slane %v1590_v45, %v3584_v16  ;;  %v3714_v45 = vrot.slane %v3649_v28, %v3590_v21 }
 0x164   : > { %v1635_v8 = vcombine.high %v1613_v55, %v1613_v55  ;;  %v1627_v59 = vrot.slane %v1605_v57, %v3584_v16  ;;  %v1620_v60 = vrot.slane %v1604_v63, %v3584_v16  ;;  %v1642_v9 = vrot.slane %v1613_v55, %v3590_v21 }
 0x165   : > { %v1606_v23 = vcombine.high %v1604_v63, %v1604_v63 }
 0x166   : > { %v1646_v0 = vrot.slane %v1627_v59, %v3590_v21  ;;  %v1650_v20 = vrot.slane %v1635_v8, %v3590_v21  ;;  %v1658_v24 = vrot.slane %v1620_v60, %v3590_v21  ;;  %v1636_v25 = vcombine.high %v1620_v60, %v1620_v60 }
 0x167   : > { %v1679_v26 = vmul.f32 %v1642_v9, %v3690_v10  ;;  %v1637_v5 = vcombine.high %v1627_v59, %v1627_v59  ;;  %v1634_v31 = vrot.slane %v1606_v23, %v3584_v16 }
 0x168   : > { %v1680_v7 = vmul.f32 %v1646_v0, %v3690_v10  ;;  %v1681_v30 = vmul.f32 %v1650_v20, %v3690_v10  ;;  %v1683_v36 = vmul.f32 %v1658_v24, %v3690_v10  ;;  %v1666_v37 = vrot.slane %v1636_v25, %v3590_v21 }
 0x169   : > { %v1654_v34 = vrot.slane %v1637_v5, %v3590_v21  ;;  %v1662_v38 = vrot.slane %v1634_v31, %v3590_v21 }
 0x16b   : > { %v1684_v16 = vmul.f32 %v1662_v38, %v3690_v10 }
 0x1c2   : > { %v1375_v41 = vpop.permute.xlu0 %1374 }
 0x1c3   : > { %v1397_v11 = vmul.f32 %v1375_v41, %v3659_v39  ;;  %v1682_v41 = vmul.f32 %v1654_v34, %v3690_v10 }
 0x1c4   : > { %v1373_v42 = vpop.permute.xlu1 %1372 }
 0x1c5   : > { %v1396_v43 = vmul.f32 %v1373_v42, %v3659_v39  ;;  %1418 = vrot.lane.b32.xlu0 %v1397_v11, %s4199_s27  ;;  %v1638_v11 = vcombine.high %v1634_v31, %v1634_v31  ;;  %v1685_v42 = vmul.f32 %v1666_v37, %v3690_v10 }
 0x1c7   : > { %1416 = vrot.lane.b32.xlu1 %v1396_v43, %s4199_s27  ;;  %v1670_v43 = vrot.slane %v1638_v11, %v3590_v21 }
 0x1c8   : > { %v1377_v46 = vpop.permute.xlu1 %1376  ;;  %v1379_v47 = vpop.permute.xlu0 %1378 }
 0x1c9   : > { %v1398_v49 = vmul.f32 %v1377_v46, %v3659_v39  ;;  %v1399_v50 = vmul.f32 %v1379_v47, %v3659_v39  ;;  %v1686_v44 = vmul.f32 %v1670_v43, %v3690_v10 }
 0x1cb   : > { %1420 = vrot.lane.b32.xlu1 %v1398_v49, %s4199_s27  ;;  %1422 = vrot.lane.b32.xlu0 %v1399_v50, %s4199_s27 }
 0x1cc   : > { %v1381_v56 = vpop.permute.xlu1 %1380  ;;  %v1383_v61 = vpop.permute.xlu0 %1382 }
 0x1cd   : > { %v1400_v1 = vmul.f32 %v1381_v56, %v3659_v39  ;;  %v1401_v6 = vmul.f32 %v1383_v61, %v3659_v39 }
 0x1cf   : > { %1424 = vrot.lane.b32.xlu1 %v1400_v1, %s4199_s27  ;;  %1426 = vrot.lane.b32.xlu0 %v1401_v6, %s4199_s27 }
 0x1d0   : > { %v1385_v13 = vpop.permute.xlu1 %1384  ;;  %v1387_v62 = vpop.permute.xlu0 %1386 }
 0x1d1   : > { %v1402_v18 = vmul.f32 %v1385_v13, %v3659_v39  ;;  %v1403_v19 = vmul.f32 %v1387_v62, %v3659_v39  ;;  %v2948_v13 = vld [vmem:[%s4164_s10] ss:$0 sm:$0xff] }
 0x1d3   : > { %1428 = vrot.lane.b32.xlu1 %v1402_v18, %s4199_s27  ;;  %1430 = vrot.lane.b32.xlu0 %v1403_v19, %s4199_s27 }
 0x1d7   : > { %1689 = vperm.xlu1 %3163, %v1679_v26   ;;  %1694 = vperm.xlu0 %3164, %v1680_v7  }
 0x1db   : > { %1699 = vperm.xlu1 %3163, %v1681_v30   ;;  %1709 = vperm.xlu0 %3164, %v1683_v36  }
 0x1df   : > { %1704 = vperm.xlu1 %3163, %v1682_v41   ;;  %1719 = vperm.xlu0 %3164, %v1685_v42  }
 0x1e3   : > { %1714 = vperm.xlu1 %3163, %v1684_v16  }
 0x1e7   : > { %1724 = vperm.xlu1 %3163, %v1686_v44  }
 0x237   : > { %v1419_v46 = vpop.permute.xlu0 %1418 }
 0x238   : > { %v1441_v50 = vadd.f32 %v1419_v46, %v3714_v45 }
 0x239   : > { %v1417_v47 = vpop.permute.xlu1 %1416 }
 0x23a   : > { %v1440_v49 = vadd.f32 %v1417_v47, %v3714_v45 }
 0x23c   : > { %3071 = vmatprep.mubr.msk.f32.mxu0 %vm1459_vm3, %v1440_v49 }
 0x23d   : > { %v1421_v51 = vpop.permute.xlu1 %1420  ;;  %3072 = vmatmul.mubr.msk.f32.vlgmr.msra.gmra.mxu0 %vm1459_vm3, %v1441_v50  ;;  %v1423_v52 = vpop.permute.xlu0 %1422 }
 0x23e   : > { %v1442_v55 = vadd.f32 %v1421_v51, %v3714_v45  ;;  %v1443_v57 = vadd.f32 %v1423_v52, %v3714_v45 }
 0x240   : > { %3074 = vmatprep.mubr.msk.f32.mxu0 %vm1459_vm3, %v1442_v55 }
 0x241   : > { %v1425_v28 = vpop.permute.xlu1 %1424  ;;  %3075 = vmatmul.mubr.msk.f32.gmra.mxu0 %vm1459_vm3, %v1443_v57  ;;  %v1427_v56 = vpop.permute.xlu0 %1426 }
 0x242   : > { %v1444_v61 = vadd.f32 %v1425_v28, %v3714_v45  ;;  %v1445_v63 = vadd.f32 %v1427_v56, %v3714_v45 }
 0x244   : > { %3077 = vmatprep.mubr.msk.f32.mxu0 %vm1459_vm3, %v1444_v61 }
 0x245   : > { %v1429_v1 = vpop.permute.xlu1 %1428  ;;  %3078 = vmatmul.mubr.msk.f32.gmra.mxu0 %vm1459_vm3, %v1445_v63  ;;  %v1431_v6 = vpop.permute.xlu0 %1430 }
 0x246   : > { %v1446_v8 = vadd.f32 %v1429_v1, %v3714_v45  ;;  %v1447_v59 = vadd.f32 %v1431_v6, %v3714_v45 }
 0x248   : > { %3080 = vmatprep.mubr.msk.f32.mxu0 %vm1459_vm3, %v1446_v8 }
 0x249   : > { %3081 = vmatmul.mubr.msk.f32.gmra.mxu0 %vm1459_vm3, %v1447_v59 }
 0x252   : > { %v1690_v60 = vpop.permute.xlu1 %1689  ;;  %v1695_v18 = vpop.permute.xlu0 %1694 }
 0x256   : > { %v1700_v9 = vpop.permute.xlu1 %1699  ;;  %v1710_v43 = vpop.permute.xlu0 %1709 }
 0x25a   : > { %v1705_v20 = vpop.permute.xlu1 %1704  ;;  %v1720_v61 = vpop.permute.xlu0 %1719 }
 0x25e   : > { %v1715_v41 = vpop.permute.xlu1 %1714 }
 0x262   : > { %v1725_v56 = vpop.permute.xlu1 %1724 }
 0x2fd   : > { %v3073_v62 = vpop.f32.mrf.mxu0 }
 0x2fe   : > { %v1556_v0 = vadd.f32 %v3073_v62, %v2948_v13 }
 0x2ff   : > { %v1550_v19 = vpop.f32.mrf.mxu0 }
 0x300   : > { %v1728_v23 = vmul.f32 %v1695_v18, %v1556_v0  ;;  %v1551_v24 = vadd.f32 %v2948_v13, %v1550_v19 }
 0x301   : > { %v3076_v25 = vpop.f32.mrf.mxu0 }
 0x302   : > { %v1727_v26 = vmul.f32 %v1690_v60, %v1551_v24  ;;  %v1566_v5 = vadd.f32 %v3076_v25, %v2948_v13  ;;  %v1736_v7 = vadd.f32 %v1728_v23, %v3428_v3 }
 0x303   : > { %v1560_v30 = vpop.f32.mrf.mxu0 }
 0x304   : > { %v1561_v31 = vadd.f32 %v2948_v13, %v1560_v30  ;;  %v1748_v34 = vsel %vm861_vm0, %v1736_v7, 0.0  ;;  %v1735_v36 = vadd.f32 %v1727_v26, %v3425_v2  ;;  %v1730_v37 = vmul.f32 %v1705_v20, %v1566_v5 }
 0x305   : > { %v3079_v38 = vpop.f32.mrf.mxu0  ;;  %1749 = vadd.xlane.f32.xlu1 %v1748_v34 }
 0x306   : > { %v1729_v11 = vmul.f32 %v1700_v9, %v1561_v31  ;;  %v1576_v42 = vadd.f32 %v3079_v38, %v2948_v13  ;;  %v1745_v16 = vsel %vm861_vm0, %v1735_v36, 0.0  ;;  %v1738_v49 = vadd.f32 %v1730_v37, %v3469_v17 }
 0x307   : > { %1746 = vadd.xlane.f32.xlu0 %v1745_v16  ;;  %v1570_v44 = vpop.f32.mrf.mxu0 }
 0x308   : > { %v1571_v46 = vadd.f32 %v2948_v13, %v1570_v44  ;;  %v1737_v3 = vadd.f32 %v1729_v11, %v3431_v4  ;;  %v1732_v50 = vmul.f32 %v1715_v41, %v1576_v42  ;;  %v1754_v63 = vsel %vm861_vm0, %v1738_v49, 0.0 }
 0x309   : > { %v3082_v47 = vpop.f32.mrf.mxu0 }
 0x30a   : > { %v1731_v51 = vmul.f32 %v1710_v43, %v1571_v46  ;;  %v1586_v2 = vadd.f32 %v3082_v47, %v2948_v13  ;;  %v1751_v52 = vsel %vm861_vm0, %v1737_v3, 0.0  ;;  %v1740_v17 = vadd.f32 %v1732_v50, %v3502_v35 }
 0x30b   : > { %1752 = vadd.xlane.f32.xlu0 %v1751_v52  ;;  %v1580_v55 = vpop.f32.mrf.mxu0 }
 0x30c   : > { %v1581_v57 = vadd.f32 %v2948_v13, %v1580_v55  ;;  %v1739_v28 = vadd.f32 %v1731_v51, %v3481_v22  ;;  %v1734_v1 = vmul.f32 %v1725_v56, %v1586_v2  ;;  %v1760_v59 = vsel %vm861_vm0, %v1740_v17, 0.0 }
 0x30e   : > { %v1733_v6 = vmul.f32 %v1720_v61, %v1581_v57  ;;  %v1757_v4 = vsel %vm861_vm0, %v1739_v28, 0.0  ;;  %v1742_v22 = vadd.f32 %v1734_v1, %v3530_v53 }
 0x30f   : > { %1755 = vadd.xlane.f32.xlu0 %v1754_v63  ;;  %1758 = vadd.xlane.f32.xlu1 %v1757_v4  ;;  %v2979_v63 = vadd.f32 -1.0, %v3690_v10  ;;  %v1878_v4 = vld [vmem:[%s4169_s15] sm:$0xff]  ;;  %v2027_v10 = vld [vmem:[%s4171_s17 + $0x18] sm:$0xff] }
 0x310   : > { %v1741_v8 = vadd.f32 %v1733_v6, %v3511_v40  ;;  %v1766_v9 = vsel %vm861_vm0, %v1742_v22, 0.0  ;;  %v1879_v6 = vld [vmem:[%s4169_s15 + $0x8] sm:$0xff]  ;;  %3099 = vmatprep.subr.mxu0 %v2027_v10 }
 0x311   : > { %v2315_v1 = vmul.f32 1e+09, %v2979_v63  ;;  %3083 = vmatprep.subr.mxu1 %v1879_v6  ;;  %3100 = vmatpush3.msra.mxu0 %v2027_v10 }
 0x312   : > { %v1763_v60 = vsel %vm861_vm0, %v1741_v8, 0.0  ;;  %3084 = vmatpush3.msra.mxu1 %v1879_v6 }
 0x313   : > { %1761 = vadd.xlane.f32.xlu0 %v1760_v59  ;;  %1764 = vadd.xlane.f32.xlu1 %v1763_v60 }
 0x314   : > { %3085 = vmatprep.subr.mxu1 %v1878_v4 }
 0x315   : > { %3086 = vmatpush3.msra.mxu1 %v1878_v4 }
 0x316   : > { %3119 = vmatprep.subr.mxu1 %v3259_v48 }
 0x317   : > { %1767 = vadd.xlane.f32.xlu0 %v1766_v9 }
 0x38e   : > { %v1750_v13 = vpop.xlane.xlu1 %1749 }
 0x38f   : > { %v1771_v62 = vmul.f32 0.0625, %v1750_v13 }
 0x390   : > { %v1747_v0 = vpop.xlane.xlu0 %1746 }
 0x391   : > { %v3751_v18 = vsub.f32 %v1736_v7, %v1771_v62  ;;  %v1770_v35 = vmul.f32 0.0625, %v1747_v0 }
 0x393   : > { %v3753_v19 = vsub.f32 %v1735_v36, %v1770_v35  ;;  %v1787_v40 = vmul.f32 %v3751_v18, %v3751_v18 }
 0x394   : > { %v1753_v20 = vpop.xlane.xlu0 %1752 }
 0x395   : > { %v1772_v23 = vmul.f32 0.0625, %v1753_v20  ;;  %v1797_v53 = vsel %vm861_vm0, %v1787_v40, 0.0  ;;  %v1786_v24 = vmul.f32 %v3753_v19, %v3753_v19 }
 0x396   : > { %1798 = vadd.xlane.f32.xlu0 %v1797_v53 }
 0x397   : > { %v3760_v25 = vsub.f32 %v1737_v3, %v1772_v23  ;;  %v1794_v26 = vsel %vm861_vm0, %v1786_v24, 0.0 }
 0x398   : > { %v1759_v5 = vpop.xlane.xlu1 %1758  ;;  %1795 = vadd.xlane.f32.xlu1 %v1794_v26  ;;  %v1756_v7 = vpop.xlane.xlu0 %1755 }
 0x399   : > { %v1774_v30 = vmul.f32 0.0625, %v1759_v5  ;;  %v1773_v31 = vmul.f32 0.0625, %v1756_v7  ;;  %v1788_v34 = vmul.f32 %v3760_v25, %v3760_v25 }
 0x39b   : > { %v3765_v36 = vsub.f32 %v1739_v28, %v1774_v30  ;;  %v3767_v37 = vsub.f32 %v1738_v49, %v1773_v31  ;;  %v1800_v38 = vsel %vm861_vm0, %v1788_v34, 0.0 }
 0x39c   : > { %v1765_v41 = vpop.xlane.xlu1 %1764  ;;  %1801 = vadd.xlane.f32.xlu1 %v1800_v38  ;;  %v1762_v11 = vpop.xlane.xlu0 %1761 }
 0x39d   : > { %v1776_v42 = vmul.f32 0.0625, %v1765_v41  ;;  %v1775_v16 = vmul.f32 0.0625, %v1762_v11  ;;  %v1790_v43 = vmul.f32 %v3765_v36, %v3765_v36  ;;  %v1789_v44 = vmul.f32 %v3767_v37, %v3767_v37 }
 0x39f   : > { %v3774_v46 = vsub.f32 %v1741_v8, %v1776_v42  ;;  %v3776_v3 = vsub.f32 %v1740_v17, %v1775_v16  ;;  %v1806_v47 = vsel %vm861_vm0, %v1790_v43, 0.0  ;;  %v1803_v49 = vsel %vm861_vm0, %v1789_v44, 0.0 }
 0x3a0   : > { %1807 = vadd.xlane.f32.xlu1 %v1806_v47  ;;  %1804 = vadd.xlane.f32.xlu0 %v1803_v49  ;;  %v1768_v50 = vpop.xlane.xlu0 %1767 }
 0x3a1   : > { %v1777_v51 = vmul.f32 0.0625, %v1768_v50  ;;  %v1792_v2 = vmul.f32 %v3774_v46, %v3774_v46  ;;  %v1791_v52 = vmul.f32 %v3776_v3, %v3776_v3 }
 0x3a3   : > { %v3784_v55 = vsub.f32 %v1742_v22, %v1777_v51  ;;  %v1812_v57 = vsel %vm861_vm0, %v1792_v2, 0.0  ;;  %v1809_v28 = vsel %vm861_vm0, %v1791_v52, 0.0 }
 0x3a4   : > { %1813 = vadd.xlane.f32.xlu1 %v1812_v57  ;;  %1810 = vadd.xlane.f32.xlu0 %v1809_v28 }
 0x3a5   : > { %v1793_v56 = vmul.f32 %v3784_v55, %v3784_v55 }
 0x3a7   : > { %v1815_v61 = vsel %vm861_vm0, %v1793_v56, 0.0 }
 0x3a8   : > { %1816 = vadd.xlane.f32.xlu0 %v1815_v61 }
 0x3b5   : > { %2318 = vperm.xlu1 %3163, %v2315_v1  }
 0x3be   : > { %2481 = vrot.lane.b32.xlu0 %v3459_v12, %s4185_s1  ;;  %s3265_s1 = smov 16  }
 0x41f   : > { %v1799_v17 = vpop.xlane.xlu0 %1798 }
 0x420   : > { %v1819_v8 = vmul.f32 0.0625, %v1799_v17 }
 0x421   : > { %v1796_v59 = vpop.xlane.xlu1 %1795 }
 0x422   : > { %v1827_v60 = vadd.f32 1e-05, %v1819_v8  ;;  %v1818_v22 = vmul.f32 0.0625, %v1796_v59 }
 0x424   : > { %3167 = vrsqrt.f32 %v1827_v60  ;;  %v1826_v40 = vadd.f32 1e-05, %v1818_v22 }
 0x425   : > { %v1802_v12 = vpop.xlane.xlu1 %1801 }
 0x426   : > { %v1820_v9 = vmul.f32 0.0625, %v1802_v12  ;;  %3169 = vrsqrt.f32 %v1826_v40 }
 0x428   : > { %v1828_v20 = vadd.f32 1e-05, %v1820_v9 }
 0x429   : > { %v1808_v13 = vpop.xlane.xlu1 %1807  ;;  %v1805_v62 = vpop.xlane.xlu0 %1804 }
 0x42a   : > { %v1822_v0 = vmul.f32 0.0625, %v1808_v13  ;;  %v1821_v35 = vmul.f32 0.0625, %v1805_v62  ;;  %3171 = vrsqrt.f32 %v1828_v20 }
 0x42c   : > { %v1830_v23 = vadd.f32 1e-05, %v1822_v0  ;;  %v1829_v26 = vadd.f32 1e-05, %v1821_v35 }
 0x42d   : > { %v1814_v53 = vpop.xlane.xlu1 %1813  ;;  %v1811_v24 = vpop.xlane.xlu0 %1810 }
 0x42e   : > { %v1824_v5 = vmul.f32 0.0625, %v1814_v53  ;;  %v1823_v7 = vmul.f32 0.0625, %v1811_v24  ;;  %3173 = vrsqrt.f32 %v1830_v23 }
 0x42f   : > { %3175 = vrsqrt.f32 %v1829_v26 }
 0x430   : > { %v1832_v30 = vadd.f32 1e-05, %v1824_v5  ;;  %v1831_v31 = vadd.f32 1e-05, %v1823_v7 }
 0x431   : > { %v3168_v34 = vpop.eup %3167  ;;  %v2319_v38 = vpop.permute.xlu1 %2318 }
 0x432   : > { %v3805_v41 = vmul.f32 %v3168_v34, %v3751_v18  ;;  %v3808_v11 = vadd.f32 %v2319_v38, %v3605_v58  ;;  %v3811_v42 = vadd.f32 %v2319_v38, %v3603_v54  ;;  %3177 = vrsqrt.f32 %v1832_v30 }
 0x433   : > { %v3814_v16 = vadd.f32 %v2319_v38, %v3616_v14  ;;  %v3817_v43 = vadd.f32 %v2319_v38, %v3618_v15  ;;  %v3820_v44 = vadd.f32 %v2319_v38, %v3629_v27  ;;  %3179 = vrsqrt.f32 %v1831_v31  ;;  %v3170_v13 = vpop.eup %3169 }
 0x434   : > { %v3823_v18 = vadd.f32 %v2319_v38, %v3631_v29  ;;  %v3826_v58 = vadd.f32 %v2319_v38, %v3637_v32  ;;  %v3829_v54 = vadd.f32 %v2319_v38, %v3639_v33  ;;  %v2329_v14 = vsel %vm1459_vm3, %v3808_v11, -inf }
 0x435   : > { %v2336_v15 = vsel %vm1459_vm3, %v3811_v42, -inf  ;;  %v2343_v27 = vsel %vm1459_vm3, %v3814_v16, -inf  ;;  %v2350_v47 = vsel %vm1459_vm3, %v3817_v43, -inf  ;;  %v2330_v29 = vrot.slane %v2329_v14, 4 }
 0x436   : > { %v2337_v49 = vrot.slane %v2336_v15, 4  ;;  %v2344_v50 = vrot.slane %v2343_v27, 4  ;;  %v2351_v32 = vrot.slane %v2350_v47, 4  ;;  %v2357_v33 = vsel %vm1459_vm3, %v3820_v44, -inf }
 0x437   : > { %v2364_v51 = vsel %vm1459_vm3, %v3823_v18, -inf  ;;  %v2371_v2 = vsel %vm1459_vm3, %v3826_v58, -inf  ;;  %v2378_v52 = vsel %vm1459_vm3, %v3829_v54, -inf  ;;  %v2331_v57 = vmax.f32 %v2329_v14, %v2330_v29  ;;  %v3172_v20 = vpop.eup %3171 }
 0x438   : > { %v2338_v28 = vmax.f32 %v2336_v15, %v2337_v49  ;;  %v2345_v56 = vmax.f32 %v2343_v27, %v2344_v50  ;;  %v2352_v61 = vmax.f32 %v2350_v47, %v2351_v32  ;;  %v2358_v63 = vrot.slane %v2357_v33, 4 }
 0x439   : > { %v2365_v1 = vrot.slane %v2364_v51, 4  ;;  %v2372_v6 = vrot.slane %v2371_v2, 4  ;;  %v2379_v4 = vrot.slane %v2378_v52, 4  ;;  %v2332_v10 = vrot.slane %v2331_v57, 2 }
 0x43a   : > { %v2339_v17 = vrot.slane %v2338_v28, 2  ;;  %v2346_v8 = vrot.slane %v2345_v56, 2  ;;  %v2353_v59 = vrot.slane %v2352_v61, 2  ;;  %v2359_v60 = vmax.f32 %v2357_v33, %v2358_v63 }
 0x43b   : > { %v2366_v12 = vmax.f32 %v2364_v51, %v2365_v1  ;;  %v2373_v22 = vmax.f32 %v2371_v2, %v2372_v6  ;;  %v2380_v9 = vmax.f32 %v2378_v52, %v2379_v4  ;;  %v2333_v62 = vmax.f32 %v2331_v57, %v2332_v10  ;;  %v3174_v5 = vpop.eup %3173 }
 0x43c   : > { %v2340_v0 = vmax.f32 %v2338_v28, %v2339_v17  ;;  %v2347_v35 = vmax.f32 %v2345_v56, %v2346_v8  ;;  %v2354_v40 = vmax.f32 %v2352_v61, %v2353_v59  ;;  %v2360_v23 = vrot.slane %v2359_v60, 2  ;;  %v3176_v38 = vpop.eup %3175  ;;  %v3850_v56 = vld [vmem:[%s4167_s13] ss:$0 sm:$0xff]  ;;  %v1817_v59 = vpop.xlane.xlu0 %1816 }
 0x43d   : > { %v2367_v53 = vrot.slane %v2366_v12, 2  ;;  %v2374_v24 = vrot.slane %v2373_v22, 2  ;;  %v2381_v26 = vrot.slane %v2380_v9, 2  ;;  %v2334_v7 = vrot.slane %v2333_v62, 1 }
 0x43e   : > { %v2341_v30 = vrot.slane %v2340_v0, 1  ;;  %v2348_v31 = vrot.slane %v2347_v35, 1  ;;  %v2355_v34 = vrot.slane %v2354_v40, 1  ;;  %v2361_v14 = vmax.f32 %v2359_v60, %v2360_v23 }
 0x43f   : > { %v2368_v15 = vmax.f32 %v2366_v12, %v2367_v53  ;;  %v2375_v27 = vmax.f32 %v2373_v22, %v2374_v24  ;;  %v2382_v47 = vmax.f32 %v2380_v9, %v2381_v26  ;;  %v3178_v29 = vpop.eup %3177  ;;  %v2335_v49 = vmax.f32 %v2333_v62, %v2334_v7 }
 0x440   : > { %v2342_v50 = vmax.f32 %v2340_v0, %v2341_v30  ;;  %v2349_v32 = vmax.f32 %v2347_v35, %v2348_v31  ;;  %v2356_v33 = vmax.f32 %v2354_v40, %v2355_v34  ;;  %v3180_v51 = vpop.eup %3179  ;;  %v2362_v2 = vrot.slane %v2361_v14, 1  ;;  %v3865_v35 = vld [vmem:[%s4168_s14] ss:$0 sm:$0xff] }
 0x441   : > { %v2369_v52 = vrot.slane %v2368_v15, 1  ;;  %v2376_v57 = vrot.slane %v2375_v27, 1  ;;  %v2383_v28 = vrot.slane %v2382_v47, 1  ;;  %v2385_v61 = vsub.f32 %v3808_v11, %v2335_v49 }
 0x442   : > { %v2386_v63 = vsub.f32 %v3811_v42, %v2342_v50  ;;  %v2387_v1 = vsub.f32 %v3814_v16, %v2349_v32  ;;  %v2388_v6 = vsub.f32 %v3817_v43, %v2356_v33  ;;  %v2363_v4 = vmax.f32 %v2361_v14, %v2362_v2 }
 0x443   : > { %v2370_v10 = vmax.f32 %v2368_v15, %v2369_v52  ;;  %v2377_v17 = vmax.f32 %v2375_v27, %v2376_v57  ;;  %v2384_v8 = vmax.f32 %v2382_v47, %v2383_v28  ;;  %v2393_v60 = vmul.f32 1.442695, %v2385_v61 }
 0x444   : > { %v2395_v12 = vmul.f32 1.442695, %v2386_v63  ;;  %v2397_v22 = vmul.f32 1.442695, %v2387_v1  ;;  %v1842_v9 = vmul.f32 %v3170_v13, %v3753_v19  ;;  %v1857_v62 = vmul.f32 %v3850_v56, %v3805_v41 }
 0x445   : > { %v2389_v11 = vsub.f32 %v3820_v44, %v2363_v4  ;;  %v2390_v42 = vsub.f32 %v3823_v18, %v2370_v10  ;;  %v2391_v16 = vsub.f32 %v3826_v58, %v2377_v17  ;;  %3181 = vpow2.f32 %v2393_v60 }
 0x446   : > { %v2399_v43 = vmul.f32 1.442695, %v2388_v6  ;;  %v1825_v0 = vmul.f32 0.0625, %v1817_v59  ;;  %v1856_v40 = vmul.f32 %v3850_v56, %v1842_v9  ;;  %v2392_v19 = vsub.f32 %v3829_v54, %v2384_v8 }
 0x447   : > { %3183 = vpow2.f32 %v2395_v12  ;;  %v2401_v41 = vmul.f32 1.442695, %v2389_v11  ;;  %v2403_v13 = vmul.f32 1.442695, %v2390_v42  ;;  %v2405_v44 = vmul.f32 1.442695, %v2391_v16 }
 0x448   : > { %3185 = vpow2.f32 %v2397_v22  ;;  %v1833_v18 = vadd.f32 1e-05, %v1825_v0  ;;  %v3870_v58 = vadd.f32 %v3865_v35, %v1856_v40  ;;  %v3873_v23 = vadd.f32 %v3865_v35, %v1857_v62 }
 0x449   : > { %3187 = vpow2.f32 %v2399_v43  ;;  %v1844_v53 = vmul.f32 %v3172_v20, %v3760_v25  ;;  %v1845_v24 = vmul.f32 %v3176_v38, %v3767_v37  ;;  %v1846_v54 = vmul.f32 %v3174_v5, %v3765_v36 }
 0x44a   : > { %3189 = vpow2.f32 %v2401_v41  ;;  %3087 = vmatprep.mubr.msk.f32.mxu1 %vm861_vm0, %v3870_v58  ;;  %v1847_v26 = vmul.f32 %v3180_v51, %v3776_v3  ;;  %v1848_v7 = vmul.f32 %v3178_v29, %v3774_v46  ;;  %v2407_v3 = vmul.f32 1.442695, %v2392_v19 }
 0x44b   : > { %3191 = vpow2.f32 %v2403_v13  ;;  %3088 = vmatmul.mubr.msk.f32.vlgmr.msra.gmra.mxu1 %vm861_vm0, %v3873_v23  ;;  %v1858_v30 = vmul.f32 %v3850_v56, %v1844_v53  ;;  %v1859_v25 = vmul.f32 %v3850_v56, %v1845_v24  ;;  %v1860_v37 = vmul.f32 %v3850_v56, %v1846_v54 }
 0x44c   : > { %3193 = vpow2.f32 %v2405_v44  ;;  %v1861_v20 = vmul.f32 %v3850_v56, %v1847_v26  ;;  %v1862_v46 = vmul.f32 %v3850_v56, %v1848_v7 }
 0x44d   : > { %v3889_v31 = vadd.f32 %v3865_v35, %v1858_v30  ;;  %v3892_v36 = vadd.f32 %v3865_v35, %v1859_v25  ;;  %3195 = vrsqrt.f32 %v1833_v18  ;;  %v3896_v5 = vadd.f32 %v3865_v35, %v1860_v37 }
 0x44e   : > { %v3903_v34 = vadd.f32 %v3865_v35, %v1861_v20  ;;  %v3908_v38 = vadd.f32 %v3865_v35, %v1862_v46  ;;  %3197 = vpow2.f32 %v2407_v3 }
 0x44f   : > { %3090 = vmatprep.mubr.msk.f32.mxu1 %vm861_vm0, %v3889_v31 }
 0x450   : > { %3091 = vmatmul.mubr.msk.f32.gmra.mxu1 %vm861_vm0, %v3892_v36 }
 0x451   : > { %3093 = vmatprep.mubr.msk.f32.mxu1 %vm861_vm0, %v3896_v5 }
 0x452   : > { %v3910_v14 = vpop.eup %3181 }
 0x453   : > { %v2409_v27 = vsel %vm1459_vm3, %v3910_v14, 0.0 }
 0x454   : > { %v3912_v15 = vpop.eup %3183  ;;  %3094 = vmatmul.mubr.msk.f32.gmra.mxu1 %vm861_vm0, %v3903_v34  ;;  %v2410_v29 = vrot.slane %v2409_v27, 4 }
 0x455   : > { %v3918_v47 = vpop.eup %3185  ;;  %v2416_v49 = vsel %vm1459_vm3, %v3912_v15, 0.0  ;;  %3096 = vmatprep.mubr.msk.f32.mxu1 %vm861_vm0, %v3908_v38 }
 0x456   : > { %v3924_v50 = vpop.eup %3187  ;;  %v2417_v32 = vrot.slane %v2416_v49, 4  ;;  %v2423_v33 = vsel %vm1459_vm3, %v3918_v47, 0.0  ;;  %v2411_v2 = vadd.f32 %v2410_v29, %v2409_v27 }
 0x457   : > { %v3928_v51 = vpop.eup %3189  ;;  %v2424_v52 = vrot.slane %v2423_v33, 4  ;;  %v2430_v57 = vsel %vm1459_vm3, %v3924_v50, 0.0 }
 0x458   : > { %v3932_v28 = vpop.eup %3191  ;;  %v2418_v61 = vadd.f32 %v2417_v32, %v2416_v49  ;;  %v2431_v63 = vrot.slane %v2430_v57, 4  ;;  %v2437_v1 = vsel %vm1459_vm3, %v3928_v51, 0.0  ;;  %v2412_v4 = vrot.slane %v2411_v2, 2 }
 0x459   : > { %v3936_v6 = vpop.eup %3193  ;;  %v2425_v10 = vadd.f32 %v2424_v52, %v2423_v33  ;;  %v2438_v17 = vrot.slane %v2437_v1, 4  ;;  %v2444_v8 = vsel %vm1459_vm3, %v3932_v28, 0.0 }
 0x45a   : > { %v2419_v59 = vrot.slane %v2418_v61, 2  ;;  %v2432_v60 = vadd.f32 %v2431_v63, %v2430_v57  ;;  %v2445_v12 = vrot.slane %v2444_v8, 4  ;;  %v2451_v22 = vsel %vm1459_vm3, %v3936_v6, 0.0  ;;  %v3196_v9 = vpop.eup %3195 }
 0x45b   : > { %v2426_v62 = vrot.slane %v2425_v10, 2  ;;  %v2439_v11 = vadd.f32 %v2438_v17, %v2437_v1  ;;  %v2452_v42 = vrot.slane %v2451_v22, 4  ;;  %v2413_v16 = vadd.f32 %v2412_v4, %v2411_v2  ;;  %v3944_v7 = vpop.eup %3197 }
 0x45c   : > { %v2433_v43 = vrot.slane %v2432_v60, 2  ;;  %v2446_v0 = vadd.f32 %v2445_v12, %v2444_v8  ;;  %v1849_v40 = vmul.f32 %v3196_v9, %v3784_v55  ;;  %v2420_v19 = vadd.f32 %v2419_v59, %v2418_v61 }
 0x45d   : > { %v2440_v41 = vrot.slane %v2439_v11, 2  ;;  %v2414_v13 = vrot.slane %v2413_v16, 1  ;;  %v2427_v44 = vadd.f32 %v2426_v62, %v2425_v10  ;;  %v2453_v18 = vadd.f32 %v2452_v42, %v2451_v22 }
 0x45e   : > { %v1863_v53 = vmul.f32 %v3850_v56, %v1849_v40  ;;  %v2421_v24 = vrot.slane %v2420_v19, 1  ;;  %v2434_v54 = vadd.f32 %v2433_v43, %v2432_v60  ;;  %v2447_v26 = vrot.slane %v2446_v0, 2  ;;  %v3955_v60 = vpop.permute.xlu0 %2481 }
 0x45f   : > { %v2415_v30 = vadd.f32 %v2414_v13, %v2413_v16  ;;  %v2428_v25 = vrot.slane %v2427_v44, 1  ;;  %v2441_v37 = vadd.f32 %v2440_v41, %v2439_v11  ;;  %v2454_v20 = vrot.slane %v2453_v18, 2 }
 0x460   : > { %v3947_v46 = vadd.f32 %v3865_v35, %v1863_v53  ;;  %v2422_v55 = vadd.f32 %v2421_v24, %v2420_v19  ;;  %v2435_v3 = vrot.slane %v2434_v54, 1  ;;  %v2448_v27 = vadd.f32 %v2447_v26, %v2446_v0 }
 0x461   : > { %v2429_v29 = vadd.f32 %v2428_v25, %v2427_v44  ;;  %v2442_v49 = vrot.slane %v2441_v37, 1  ;;  %3199 = vrcp.f32 %v2415_v30  ;;  %v2455_v32 = vadd.f32 %v2454_v20, %v2453_v18 }
 0x462   : > { %3097 = vmatmul.mubr.msk.f32.gmra.mxu1 %vm861_vm0, %v3947_v46  ;;  %v2436_v56 = vadd.f32 %v2435_v3, %v2434_v54  ;;  %3201 = vrcp.f32 %v2422_v55  ;;  %v2449_v33 = vrot.slane %v2448_v27, 1  ;;  %v2458_v2 = vsel %vm1459_vm3, %v3944_v7, 0.0 }
 0x463   : > { %v2443_v52 = vadd.f32 %v2442_v49, %v2441_v37  ;;  %3203 = vrcp.f32 %v2429_v29  ;;  %v2456_v35 = vrot.slane %v2455_v32, 1  ;;  %v2459_v57 = vrot.slane %v2458_v2, 4  ;;  %3127 = vmatprep.mubr.msk.f32.mxu1 %vm3260_vm2, %v3259_v48 }
 0x464   : > { %3205 = vrcp.f32 %v2436_v56  ;;  %v2450_v61 = vadd.f32 %v2449_v33, %v2448_v27 }
 0x465   : > { %3207 = vrcp.f32 %v2443_v52  ;;  %v2457_v63 = vadd.f32 %v2456_v35, %v2455_v32  ;;  %v2460_v1 = vadd.f32 %v2459_v57, %v2458_v2 }
 0x466   : > { %3209 = vrcp.f32 %v2450_v61 }
 0x467   : > { %v2461_v4 = vrot.slane %v2460_v1, 2  ;;  %3211 = vrcp.f32 %v2457_v63 }
 0x469   : > { %v2462_v10 = vadd.f32 %v2461_v4, %v2460_v1 }
 0x46b   : > { %v2463_v17 = vrot.slane %v2462_v10, 1 }
 0x46d   : > { %v2464_v8 = vadd.f32 %v2463_v17, %v2462_v10 }
 0x46e   : > { %v3200_v59 = vpop.eup %3199 }
 0x46f   : > { %v3202_v12 = vpop.eup %3201  ;;  %v2466_v22 = vmul.f32 %v3200_v59, %v3910_v14  ;;  %3213 = vrcp.f32 %v2464_v8 }
 0x470   : > { %v3204_v9 = vpop.eup %3203  ;;  %v2468_v62 = vmul.f32 %v3202_v12, %v3912_v15 }
 0x471   : > { %v3206_v11 = vpop.eup %3205  ;;  %v2470_v42 = vmul.f32 %v3204_v9, %v3918_v47  ;;  %v2484_v16 = vmul.f32 %v3955_v60, %v2466_v22 }
 0x472   : > { %v3208_v43 = vpop.eup %3207  ;;  %v2472_v0 = vmul.f32 %v3206_v11, %v3924_v50  ;;  %v2485_v40 = vmul.f32 %v3955_v60, %v2468_v62 }
 0x473   : > { %v3210_v19 = vpop.eup %3209  ;;  %v2474_v41 = vmul.f32 %v3208_v43, %v3928_v51  ;;  %v2486_v13 = vmul.f32 %v3955_v60, %v2470_v42  ;;  %v2492_v14 = vsel %vm1459_vm3, %v2484_v16, 0.0 }
 0x474   : > { %v3212_v44 = vpop.eup %3211  ;;  %v2487_v15 = vmul.f32 %v3955_v60, %v2472_v0  ;;  %v2493_v18 = vrot.slane %v2492_v14, 4  ;;  %v2499_v47 = vsel %vm1459_vm3, %v2485_v40, 0.0  ;;  %v2476_v53 = vmul.f32 %v3210_v19, %v3932_v28 }
 0x475   : > { %v2488_v24 = vmul.f32 %v3955_v60, %v2474_v41  ;;  %v2500_v50 = vrot.slane %v2499_v47, 4  ;;  %v2506_v54 = vsel %vm1459_vm3, %v2486_v13, 0.0  ;;  %v2478_v26 = vmul.f32 %v3212_v44, %v3936_v6 }
 0x476   : > { %v2494_v51 = vadd.f32 %v2493_v18, %v2492_v14  ;;  %v2507_v30 = vrot.slane %v2506_v54, 4  ;;  %v2489_v25 = vmul.f32 %v3955_v60, %v2476_v53  ;;  %v2513_v37 = vsel %vm1459_vm3, %v2487_v15, 0.0 }
 0x477   : > { %v2501_v20 = vadd.f32 %v2500_v50, %v2499_v47  ;;  %v2490_v55 = vmul.f32 %v3955_v60, %v2478_v26  ;;  %v2514_v3 = vrot.slane %v2513_v37, 4  ;;  %v2520_v28 = vsel %vm1459_vm3, %v2488_v24, 0.0 }
 0x478   : > { %v2495_v27 = vrot.slane %v2494_v51, 2  ;;  %v2508_v29 = vadd.f32 %v2507_v30, %v2506_v54  ;;  %v2521_v49 = vrot.slane %v2520_v28, 4  ;;  %v2527_v32 = vsel %vm1459_vm3, %v2489_v25, 0.0 }
 0x479   : > { %v2502_v56 = vrot.slane %v2501_v20, 2  ;;  %v2515_v6 = vadd.f32 %v2514_v3, %v2513_v37  ;;  %v2528_v33 = vrot.slane %v2527_v32, 4  ;;  %v2534_v2 = vsel %vm1459_vm3, %v2490_v55, 0.0 }
 0x47a   : > { %v2496_v52 = vadd.f32 %v2495_v27, %v2494_v51  ;;  %v2509_v35 = vrot.slane %v2508_v29, 2  ;;  %v2522_v57 = vadd.f32 %v2521_v49, %v2520_v28  ;;  %v2535_v61 = vrot.slane %v2534_v2, 4 }
 0x47b   : > { %v2503_v63 = vadd.f32 %v2502_v56, %v2501_v20  ;;  %v2516_v1 = vrot.slane %v2515_v6, 2  ;;  %v2529_v4 = vadd.f32 %v2528_v33, %v2527_v32  ;;  %v2025_v56 = vld [vmem:[%s4171_s17 + $0x8] sm:$0xff] }
 0x47c   : > { %v3214_v10 = vpop.eup %3213  ;;  %v2497_v17 = vrot.slane %v2496_v52, 1  ;;  %v2510_v8 = vadd.f32 %v2509_v35, %v2508_v29  ;;  %v2523_v59 = vrot.slane %v2522_v57, 2  ;;  %v2536_v12 = vadd.f32 %v2535_v61, %v2534_v2 }
 0x47d   : > { %v2480_v22 = vmul.f32 %v3214_v10, %v3944_v7  ;;  %v2504_v9 = vrot.slane %v2503_v63, 1  ;;  %v2517_v62 = vadd.f32 %v2516_v1, %v2515_v6  ;;  %v2530_v11 = vrot.slane %v2529_v4, 2  ;;  %v2024_v6 = vld [vmem:[%s4171_s17] sm:$0xff] }
 0x47e   : > { %v2498_v42 = vadd.f32 %v2497_v17, %v2496_v52  ;;  %v2511_v16 = vrot.slane %v2510_v8, 1  ;;  %v2524_v43 = vadd.f32 %v2523_v59, %v2522_v57  ;;  %v2537_v0 = vrot.slane %v2536_v12, 2  ;;  %v2959_v52 = vld [vmem:[%s4170_s16] ss:$0 sm:$0xff] }
 0x47f   : > { %v2491_v40 = vmul.f32 %v3955_v60, %v2480_v22  ;;  %v2505_v19 = vadd.f32 %v2504_v9, %v2503_v63  ;;  %v2518_v41 = vrot.slane %v2517_v62, 1  ;;  %v2531_v13 = vadd.f32 %v2530_v11, %v2529_v4  ;;  %v2026_v60 = vld [vmem:[%s4171_s17 + $0x10] sm:$0xff] }
 0x480   : > { %v2512_v14 = vadd.f32 %v2511_v16, %v2510_v8  ;;  %v2525_v44 = vrot.slane %v2524_v43, 1  ;;  %v2538_v18 = vadd.f32 %v2537_v0, %v2536_v12  ;;  %3101 = vmatprep.subr.mxu0 %v2026_v60 }
 0x481   : > { %v2519_v15 = vadd.f32 %v2518_v41, %v2517_v62  ;;  %v2541_v47 = vsel %vm1459_vm3, %v2491_v40, 0.0  ;;  %v2557_v7 = vsel %vm2556_vm4, %v2505_v19, %v2498_v42  ;;  %v2532_v53 = vrot.slane %v2531_v13, 1  ;;  %3102 = vmatpush3.msra.mxu0 %v2026_v60 }
 0x482   : > { %v2542_v24 = vrot.slane %v2541_v47, 4  ;;  %v2559_v50 = vsel %vm2558_vm5, %v2512_v14, %v2557_v7  ;;  %v2526_v54 = vadd.f32 %v2525_v44, %v2524_v43  ;;  %v2539_v30 = vrot.slane %v2538_v18, 1  ;;  %3103 = vmatprep.subr.mxu0 %v2025_v56  ;;  %v2582_v14 = vld [vmem:[%s4165_s11 + $0x18] sm:$0xff]  ;;  %v2581_v44 = vld [vmem:[%s4165_s11 + $0x10] sm:$0xff] }
 0x483   : > { %v2561_v26 = vsel %vm2560_vm6, %v2519_v15, %v2559_v50  ;;  %v2533_v37 = vadd.f32 %v2532_v53, %v2531_v13  ;;  %3104 = vmatpush3.msra.mxu0 %v2025_v56  ;;  %3120 = vmatpush3.msra.mxu1 %v2582_v14  ;;  %v2580_v15 = vld [vmem:[%s4165_s11 + $0x8] sm:$0xff]  ;;  %v2968_v53 = vld [vmem:[%s4172_s18] ss:$0 sm:$0xff] }
 0x484   : > { %v2543_v51 = vadd.f32 %v2542_v24, %v2541_v47  ;;  %v2563_v25 = vsel %vm2562_vm7, %v2526_v54, %v2561_v26  ;;  %v2540_v28 = vadd.f32 %v2539_v30, %v2538_v18  ;;  %3105 = vmatprep.subr.mxu0 %v2024_v6  ;;  %3121 = vmatprep.subr.mxu1 %v3259_v48  ;;  %v2579_v47 = vld [vmem:[%s4165_s11] sm:$0xff] }
 0x485   : > { %v2565_v3 = vsel %vm2564_vm8, %v2533_v37, %v2563_v25  ;;  %3106 = vmatpush3.msra.mxu0 %v2024_v6  ;;  %3122 = vmatpush3.msra.mxu1 %v2581_v44 }
 0x486   : > { %v2544_v20 = vrot.slane %v2543_v51, 2  ;;  %v2567_v29 = vsel %vm2566_vm9, %v2540_v28, %v2565_v3  ;;  %3123 = vmatprep.subr.mxu1 %v3259_v48 }
 0x487   : > { %3124 = vmatpush3.msra.mxu1 %v2580_v15 }
 0x488   : > { %v2545_v55 = vadd.f32 %v2544_v20, %v2543_v51  ;;  %3125 = vmatprep.subr.mxu1 %v3259_v48 }
 0x489   : > { %3126 = vmatpush3.msra.mxu1 %v2579_v47 }
 0x48a   : > { %v2546_v27 = vrot.slane %v2545_v55, 1 }
 0x48c   : > { %v2547_v49 = vadd.f32 %v2546_v27, %v2545_v55 }
 0x48e   : > { %v2569_v32 = vsel %vm2568_vm10, %v2547_v49, %v2567_v29 }
 0x48f   : > { %2570 = vrot.lane.b32.xlu1 %v2569_v32, %s4199_s27 }
 0x501   : > { %v2571_v33 = vpop.permute.xlu1 %2570 }
 0x502   : > { %v2573_v2 = vmul.f32 %v2571_v33, %v3659_v39 }
 0x504   : > { %2575 = vrot.lane.b32.xlu1 %v2573_v2, %s4199_s27  ;;  %s4203_s27 = smov 64  }
 0x50b   : > { %v3089_v35 = vpop.f32.mrf.mxu1 }
 0x50c   : > { %v1983_v57 = vadd.f32 %v3089_v35, %v2959_v52 }
 0x50d   : > { %v1977_v61 = vpop.f32.mrf.mxu1 }
 0x50e   : > { %v1978_v63 = vadd.f32 %v2959_v52, %v1977_v61  ;;  %v2017_v10 = vmax.f32 %v1983_v57, 0.0 }
 0x510   : > { %v2016_v1 = vmax.f32 %v1978_v63, 0.0  ;;  %v3092_v4 = vpop.f32.mrf.mxu1 }
 0x511   : > { %v1993_v17 = vadd.f32 %v3092_v4, %v2959_v52 }
 0x512   : > { %3107 = vmatprep.mubr.msk.f32.mxu0 %vm1459_vm3, %v2016_v1  ;;  %v1987_v8 = vpop.f32.mrf.mxu1 }
 0x513   : > { %3108 = vmatmul.mubr.msk.f32.vlgmr.msra.gmra.mxu0 %vm1459_vm3, %v2017_v10  ;;  %v1988_v39 = vadd.f32 %v2959_v52, %v1987_v8  ;;  %v2019_v22 = vmax.f32 %v1993_v17, 0.0  ;;  %v2674_v10 = vld [vmem:[#allocation2] sm:$0x1] }
 0x514   : > { %v3095_v59 = vpop.f32.mrf.mxu1 }
 0x515   : > { %v2018_v12 = vmax.f32 %v1988_v39, 0.0  ;;  %v2003_v9 = vadd.f32 %v3095_v59, %v2959_v52  ;;  %v4049_v59 = vmul.f32 0.015625, %v2674_v10 }
 0x516   : > { %v1997_v62 = vpop.f32.mrf.mxu1 }
 0x517   : > { %v1998_v11 = vadd.f32 %v2959_v52, %v1997_v62  ;;  %3110 = vmatprep.mubr.msk.f32.mxu0 %vm1459_vm3, %v2018_v12  ;;  %v2021_v16 = vmax.f32 %v2003_v9, 0.0 }
 0x518   : > { %3111 = vmatmul.mubr.msk.f32.gmra.mxu0 %vm1459_vm3, %v2019_v22 }
 0x519   : > { %v2020_v42 = vmax.f32 %v1998_v11, 0.0 }
 0x51b   : > { %3113 = vmatprep.mubr.msk.f32.mxu0 %vm1459_vm3, %v2020_v42 }
 0x51c   : > { %3114 = vmatmul.mubr.msk.f32.gmra.mxu0 %vm1459_vm3, %v2021_v16 }
 0x522   : > { %v3098_v43 = vpop.f32.mrf.mxu1 }
 0x523   : > { %v2013_v0 = vadd.f32 %v3098_v43, %v2959_v52  ;;  %v2677_v43 = vmul.f32 64.0, %v4049_v59 }
 0x524   : > { %v2007_v40 = vpop.f32.mrf.mxu1 }
 0x525   : > { %v2008_v19 = vadd.f32 %v2959_v52, %v2007_v40  ;;  %v2023_v13 = vmax.f32 %v2013_v0, 0.0  ;;  %v2678_v47 = vmul.f32 %v2677_v43, %v4049_v59 }
 0x527   : > { %v2022_v41 = vmax.f32 %v2008_v19, 0.0 }
 0x529   : > { %3116 = vmatprep.mubr.msk.f32.mxu0 %vm1459_vm3, %v2022_v41 }
 0x52a   : > { %3117 = vmatmul.mubr.msk.f32.gmra.mxu0 %vm1459_vm3, %v2023_v13 }
 0x576   : > { %v2576_v18 = vpop.permute.xlu1 %2575 }
 0x577   : > { %v2578_v7 = vadd.f32 %v2576_v18, %v3714_v45 }
 0x579   : > { %2591 = vrot.lane.b32.xlu0 %v2578_v7, %s4203_s27  ;;  %s849_s27 = scalar_lea.vmem %s4176_s22, %s3415_s7 }
 0x5d3   : > { %v3109_v24 = vpop.f32.mrf.mxu0 }
 0x5d4   : > { %v2131_v50 = vadd.f32 %v3109_v24, %v2968_v53  ;;  %v2676_v24 = vld [vmem:[#allocation3] sm:$0x1] }
 0x5d5   : > { %v2125_v60 = vpop.f32.mrf.mxu0 }
 0x5d6   : > { %v2126_v54 = vadd.f32 %v2968_v53, %v2125_v60  ;;  %v2165_v26 = vadd.f32 %v2131_v50, %v3873_v23 }
 0x5d8   : > { %v2177_v51 = vsel %vm861_vm0, %v2165_v26, 0.0  ;;  %v3112_v30 = vpop.f32.mrf.mxu0  ;;  %v2164_v45 = vadd.f32 %v2126_v54, %v3870_v58 }
 0x5d9   : > { %2178 = vadd.xlane.f32.xlu0 %v2177_v51  ;;  %v2141_v48 = vadd.f32 %v3112_v30, %v2968_v53 }
 0x5da   : > { %v2174_v25 = vsel %vm861_vm0, %v2164_v45, 0.0  ;;  %v2135_v37 = vpop.f32.mrf.mxu0 }
 0x5db   : > { %2175 = vadd.xlane.f32.xlu1 %v2174_v25  ;;  %v2136_v20 = vadd.f32 %v2968_v53, %v2135_v37  ;;  %v2167_v55 = vadd.f32 %v2141_v48, %v3892_v36 }
 0x5dc   : > { %v3115_v3 = vpop.f32.mrf.mxu0 }
 0x5dd   : > { %v2151_v28 = vadd.f32 %v3115_v3, %v2968_v53  ;;  %v2183_v27 = vsel %vm861_vm0, %v2167_v55, 0.0  ;;  %v2166_v23 = vadd.f32 %v2136_v20, %v3889_v31 }
 0x5de   : > { %v2145_v29 = vpop.f32.mrf.mxu0 }
 0x5df   : > { %v2146_v49 = vadd.f32 %v2968_v53, %v2145_v29  ;;  %2184 = vadd.xlane.f32.xlu1 %v2183_v27  ;;  %v2180_v58 = vsel %vm861_vm0, %v2166_v23, 0.0  ;;  %v2169_v32 = vadd.f32 %v2151_v28, %v3903_v34 }
 0x5e0   : > { %2181 = vadd.xlane.f32.xlu0 %v2180_v58  ;;  %v2982_v58 = vld [vmem:[#allocation4] ss:$0 sm:$0xff] }
 0x5e1   : > { %v2189_v56 = vsel %vm861_vm0, %v2169_v32, 0.0  ;;  %v2168_v6 = vadd.f32 %v2146_v49, %v3896_v5 }
 0x5e3   : > { %2190 = vadd.xlane.f32.xlu1 %v2189_v56  ;;  %v2186_v36 = vsel %vm861_vm0, %v2168_v6, 0.0 }
 0x5e4   : > { %2187 = vadd.xlane.f32.xlu0 %v2186_v36 }
 0x5ea   : > { %v3118_v33 = vpop.f32.mrf.mxu0 }
 0x5eb   : > { %v2161_v2 = vadd.f32 %v3118_v33, %v2968_v53  ;;  %v2592_v52 = vpop.permute.xlu0 %2591 }
 0x5ec   : > { %v2155_v31 = vpop.f32.mrf.mxu0  ;;  %3128 = vmatmul.mubr.msk.f32.vlgmr.msra.gmra.mxu1 %vm1459_vm3, %v2592_v52 }
 0x5ed   : > { %v2156_v35 = vadd.f32 %v2968_v53, %v2155_v31  ;;  %v2171_v57 = vadd.f32 %v2161_v2, %v3947_v46  ;;  %v3233_v2 = vld [vmem:[%s3665_s28] sm:$0xff] }
 0x5ef   : > { %v2195_v34 = vsel %vm861_vm0, %v2171_v57, 0.0  ;;  %v2170_v61 = vadd.f32 %v2156_v35, %v3908_v38 }
 0x5f0   : > { %2196 = vadd.xlane.f32.xlu1 %v2195_v34 }
 0x5f1   : > { %v2192_v5 = vsel %vm861_vm0, %v2170_v61, 0.0 }
 0x5f2   : > { %2193 = vadd.xlane.f32.xlu0 %v2192_v5 }
 0x662   : > { %v2179_v63 = vpop.xlane.xlu0 %2178 }
 0x663   : > { %v2199_v1 = vmul.f32 0.0625, %v2179_v63 }
 0x664   : > { %v2176_v4 = vpop.xlane.xlu1 %2175 }
 0x665   : > { %v4043_v17 = vsub.f32 %v2165_v26, %v2199_v1  ;;  %v2198_v8 = vmul.f32 0.0625, %v2176_v4  ;;  %v2679_v26 = vsub.f32 %v2676_v24, %v2678_v47 }
 0x667   : > { %v4045_v39 = vsub.f32 %v2164_v45, %v2198_v8  ;;  %v2215_v46 = vmul.f32 %v4043_v17, %v4043_v17  ;;  %v2681_v30 = vmul.f32 0.015873017, %v2679_v26 }
 0x668   : > { %v2185_v12 = vpop.xlane.xlu1 %2184 }
 0x669   : > { %v2201_v38 = vmul.f32 0.0625, %v2185_v12  ;;  %v2225_v22 = vsel %vm861_vm0, %v2215_v46, 0.0  ;;  %v2182_v9 = vpop.xlane.xlu0 %2181  ;;  %v2214_v62 = vmul.f32 %v4045_v39, %v4045_v39  ;;  %v2682_v37 = vmax.f32 %v2681_v30, 0.0 }
 0x66a   : > { %2226 = vadd.xlane.f32.xlu1 %v2225_v22  ;;  %v2200_v11 = vmul.f32 0.0625, %v2182_v9 }
 0x66b   : > { %v4054_v42 = vsub.f32 %v2167_v55, %v2201_v38  ;;  %v2222_v16 = vsel %vm861_vm0, %v2214_v62, 0.0  ;;  %3215 = vrsqrt.f32 %v2682_v37  ;;  %vm2685_vm11 = vcmp.eq.f32.partialorder %v2682_v37, inf }
 0x66c   : > { %v4058_v0 = vsub.f32 %v2166_v23, %v2200_v11  ;;  %2223 = vadd.xlane.f32.xlu0 %v2222_v16  ;;  %v2191_v40 = vpop.xlane.xlu1 %2190  ;;  %v2688_v56 = vand.u32 2147483648, %v2682_v37  ;;  %vm2687_vm12 = vcmp.eq.f32.partialorder %v2682_v37, 0.0 }
 0x66d   : > { %v2203_v19 = vmul.f32 0.0625, %v2191_v40  ;;  %v2188_v41 = vpop.xlane.xlu0 %2187  ;;  %v2217_v13 = vmul.f32 %v4054_v42, %v4054_v42  ;;  %v2977_v40 = vld [vmem:[%s4173_s19] ss:$0 sm:$0xff] }
 0x66e   : > { %v2202_v14 = vmul.f32 0.0625, %v2188_v41  ;;  %v2216_v44 = vmul.f32 %v4058_v0, %v4058_v0 }
 0x66f   : > { %v4064_v15 = vsub.f32 %v2169_v32, %v2203_v19  ;;  %v2231_v18 = vsel %vm861_vm0, %v2217_v13, 0.0  ;;  %v2978_v13 = vld [vmem:[%s4174_s20] ss:$0 sm:$0xff] }
 0x670   : > { %v4068_v7 = vsub.f32 %v2168_v6, %v2202_v14  ;;  %2232 = vadd.xlane.f32.xlu1 %v2231_v18  ;;  %v2228_v53 = vsel %vm861_vm0, %v2216_v44, 0.0  ;;  %v2983_v6 = vld [vmem:[#allocation5] ss:$0 sm:$0xff] }
 0x671   : > { %2229 = vadd.xlane.f32.xlu0 %v2228_v53  ;;  %v2219_v50 = vmul.f32 %v4064_v15, %v4064_v15 }
 0x672   : > { %v2218_v60 = vmul.f32 %v4068_v7, %v4068_v7 }
 0x673   : > { %v2237_v54 = vsel %vm861_vm0, %v2219_v50, 0.0 }
 0x674   : > { %2238 = vadd.xlane.f32.xlu1 %v2237_v54  ;;  %v2234_v51 = vsel %vm861_vm0, %v2218_v60, 0.0 }
 0x675   : > { %2235 = vadd.xlane.f32.xlu0 %v2234_v51 }
 0x678   : > { %v3216_v49 = vpop.eup %3215 }
 0x679   : > { %v2197_v45 = vpop.xlane.xlu1 %2196  ;;  %v2684_v32 = vmul.f32 %v3216_v49, %v2682_v37 }
 0x67a   : > { %v2205_v48 = vmul.f32 0.0625, %v2197_v45 }
 0x67b   : > { %v2194_v25 = vpop.xlane.xlu0 %2193  ;;  %v2686_v36 = vsel %vm2685_vm11, %v2682_v37, %v2684_v32 }
 0x67c   : > { %v4077_v20 = vsub.f32 %v2171_v57, %v2205_v48  ;;  %v2204_v55 = vmul.f32 0.0625, %v2194_v25  ;;  %v2689_v33 = vsel %vm2687_vm12, %v2688_v56, %v2686_v36 }
 0x67d   : > { %v2712_v52 = vrot.slane %v2689_v33, %v3590_v21 }
 0x67e   : > { %v4079_v3 = vsub.f32 %v2170_v61, %v2204_v55  ;;  %v2221_v28 = vmul.f32 %v4077_v20, %v4077_v20 }
 0x680   : > { %v2243_v27 = vsel %vm861_vm0, %v2221_v28, 0.0  ;;  %v2220_v23 = vmul.f32 %v4079_v3, %v4079_v3 }
 0x681   : > { %2244 = vadd.xlane.f32.xlu1 %v2243_v27 }
 0x682   : > { %v2240_v29 = vsel %vm861_vm0, %v2220_v23, 0.0 }
 0x683   : > { %2241 = vadd.xlane.f32.xlu0 %v2240_v29 }
 0x692   : > { %2697 = vrot.lane.b32.xlu1 %v2982_v58, %s3265_s1  ;;  %s852_s1 = scalar_lea.vmem %s4177_s23, %s4211_s4 }
 0x696   : > { %2705 = vrot.lane.b32.xlu1 %v2983_v6, %s4204_s2  ;;  %s4105_s2 = scalar_lea.vmem %s4175_s21, %s4205_s5 }
 0x699   : > { %2666 = vperm.xlu0 %3164, %v3233_v2  }
 0x69d   : > { %2713 = vrot.lane.b32.xlu0 %v2712_v52, %s3266_s6 }
 0x6ac   : > { %v4090_v31 = vpop.f32.mrf.mxu1 }
 0x6ae   : > { %v3129_v35 = vpop.f32.mrf.mxu1 }
 0x6f3   : > { %v2227_v57 = vpop.xlane.xlu1 %2226 }
 0x6f4   : > { %v2247_v34 = vmul.f32 0.0625, %v2227_v57 }
 0x6f5   : > { %v2224_v61 = vpop.xlane.xlu0 %2223 }
 0x6f6   : > { %v2255_v5 = vadd.f32 1e-05, %v2247_v34  ;;  %v2246_v63 = vmul.f32 0.0625, %v2224_v61 }
 0x6f8   : > { %3217 = vrsqrt.f32 %v2255_v5  ;;  %v2254_v1 = vadd.f32 1e-05, %v2246_v63 }
 0x6f9   : > { %v2233_v4 = vpop.xlane.xlu1 %2232 }
 0x6fa   : > { %3219 = vrsqrt.f32 %v2254_v1  ;;  %v2249_v10 = vmul.f32 0.0625, %v2233_v4  ;;  %v2230_v8 = vpop.xlane.xlu0 %2229 }
 0x6fb   : > { %v2248_v46 = vmul.f32 0.0625, %v2230_v8 }
 0x6fc   : > { %v2257_v12 = vadd.f32 1e-05, %v2249_v10 }
 0x6fd   : > { %v2256_v38 = vadd.f32 1e-05, %v2248_v46  ;;  %v2239_v21 = vpop.xlane.xlu1 %2238 }
 0x6fe   : > { %3221 = vrsqrt.f32 %v2257_v12  ;;  %v2251_v22 = vmul.f32 0.0625, %v2239_v21  ;;  %v2236_v9 = vpop.xlane.xlu0 %2235 }
 0x6ff   : > { %3223 = vrsqrt.f32 %v2256_v38  ;;  %v2250_v62 = vmul.f32 0.0625, %v2236_v9 }
 0x700   : > { %v2259_v11 = vadd.f32 1e-05, %v2251_v22 }
 0x701   : > { %v2258_v16 = vadd.f32 1e-05, %v2250_v62 }
 0x702   : > { %3225 = vrsqrt.f32 %v2259_v11 }
 0x703   : > { %3227 = vrsqrt.f32 %v2258_v16 }
 0x705   : > { %v3218_v43 = vpop.eup %3217 }
 0x706   : > { %v2271_v19 = vmul.f32 %v3218_v43, %v4043_v17 }
 0x707   : > { %v3220_v41 = vpop.eup %3219 }
 0x708   : > { %v2285_v14 = vmul.f32 %v2977_v40, %v2271_v19  ;;  %v2270_v44 = vmul.f32 %v3220_v41, %v4045_v39 }
 0x70a   : > { %v2299_v18 = vadd.f32 %v2978_v13, %v2285_v14  ;;  %v2284_v47 = vmul.f32 %v2977_v40, %v2270_v44  ;;  %v2245_v53 = vpop.xlane.xlu1 %2244 }
 0x70b   : > { %v3222_v17 = vpop.eup %3221  ;;  %v2253_v24 = vmul.f32 0.0625, %v2245_v53 }
 0x70c   : > { %v3224_v50 = vpop.eup %3223  ;;  %2307 = vst.msk [vmem:[%s4105_s2 + $0x8] sm:$0xff] %vm861_vm0, %v2299_v18  ;;  %v2298_v60 = vadd.f32 %v2978_v13, %v2284_v47  ;;  %v2273_v54 = vmul.f32 %v3222_v17, %v4054_v42  ;;  %v2242_v39 = vpop.xlane.xlu0 %2241  ;;  %v2980_v42 = vld [vmem:[%s4166_s12] ss:$0 sm:$0xff] }
 0x70d   : > { %v2272_v26 = vmul.f32 %v3224_v50, %v4058_v0  ;;  %v2261_v51 = vadd.f32 1e-05, %v2253_v24  ;;  %v2252_v30 = vmul.f32 0.0625, %v2242_v39  ;;  %v2662_v58 = vadd.f32 %v2980_v42, %v4090_v31 }
 0x70e   : > { %2306 = vst.msk [vmem:[%s4105_s2] sm:$0xff] %vm861_vm0, %v2298_v60  ;;  %v2287_v45 = vmul.f32 %v2977_v40, %v2273_v54  ;;  %v2698_v48 = vpop.permute.xlu1 %2697 }
 0x70f   : > { %v3226_v25 = vpop.eup %3225  ;;  %v2286_v37 = vmul.f32 %v2977_v40, %v2272_v26  ;;  %3229 = vrsqrt.f32 %v2261_v51  ;;  %v2260_v55 = vadd.f32 1e-05, %v2252_v30  ;;  %v2716_v56 = vsel %vm861_vm0, %v4049_v59, %v2698_v48 }
 0x710   : > { %v3228_v28 = vpop.eup %3227  ;;  %v2301_v27 = vadd.f32 %v2978_v13, %v2287_v45  ;;  %v2275_v0 = vmul.f32 %v3226_v25, %v4064_v15 }
 0x711   : > { %v2300_v23 = vadd.f32 %v2978_v13, %v2286_v37  ;;  %v2274_v29 = vmul.f32 %v3228_v28, %v4068_v7  ;;  %3231 = vrsqrt.f32 %v2260_v55 }
 0x712   : > { %2309 = vst.msk [vmem:[%s4105_s2 + $0x18] sm:$0xff] %vm861_vm0, %v2301_v27  ;;  %v2289_v49 = vmul.f32 %v2977_v40, %v2275_v0  ;;  %v2706_v6 = vpop.permute.xlu1 %2705 }
 0x713   : > { %2308 = vst.msk [vmem:[%s4105_s2 + $0x10] sm:$0xff] %vm861_vm0, %v2300_v23  ;;  %v2288_v32 = vmul.f32 %v2977_v40, %v2274_v29  ;;  %v2717_v2 = vsel %vm1459_vm3, %v2716_v56, %v2706_v6 }
 0x714   : > { %v2303_v15 = vadd.f32 %v2978_v13, %v2289_v49  ;;  %v2667_v7 = vpop.permute.xlu0 %2666 }
 0x715   : > { %v2302_v36 = vadd.f32 %v2978_v13, %v2288_v32  ;;  %v2669_v33 = vmul.f32 %v2667_v7, %v2662_v58 }
 0x716   : > { %2311 = vst.msk [vmem:[%s4105_s2 + $0x28] sm:$0xff] %vm861_vm0, %v2303_v15 }
 0x717   : > { %2310 = vst.msk [vmem:[%s4105_s2 + $0x20] sm:$0xff] %vm861_vm0, %v2302_v36 }
 0x718   : > { %2670 = vst.msk [vmem:[%s849_s27] sm:$0xff] %vm1459_vm3, %v2669_v33  ;;  %v2714_v59 = vpop.permute.xlu0 %2713 }
 0x719   : > { %v2719_v52 = vsel %vm2718_vm13, %v2717_v2, %v2714_v59 }
 0x71a   : > { %2721 = vst.msk [vmem:[%s852_s1] sm:$0x1] %vm2720_vm14, %v2719_v52 }
 0x71c   : > { %v3230_v31 = vpop.eup %3229 }
 0x71d   : > { %v2277_v35 = vmul.f32 %v3230_v31, %v4077_v20 }
 0x71e   : > { %v3232_v57 = vpop.eup %3231 }
 0x71f   : > { %v2291_v34 = vmul.f32 %v2977_v40, %v2277_v35  ;;  %v2276_v61 = vmul.f32 %v3232_v57, %v4079_v3 }
 0x721   : > { %v2305_v5 = vadd.f32 %v2978_v13, %v2291_v34  ;;  %v2290_v63 = vmul.f32 %v2977_v40, %v2276_v61 }
 0x723   : > { %2313 = vst.msk [vmem:[%s4105_s2 + $0x38] sm:$0xff] %vm861_vm0, %v2305_v5  ;;  %v2304_v1 = vadd.f32 %v2978_v13, %v2290_v63 }
 0x725   : > { %2312 = vst.msk [vmem:[%s4105_s2 + $0x30] sm:$0xff] %vm861_vm0, %v2304_v1 }
 0x726 PF: > { %s34_s24 = sadd.s32 1, %s3256_s24   ;;  %s4206_s4 = smov %s3252_s30 }
 0x727   : > { %p31_p5 = scmp.ge.s32.totalorder %s34_s24, 4   ;;  %s4207_s30 = smov %s4209_s25 }
 0x729   :  { %33 = sbr.rel (!%p31_p5) target bundleno = 9 (0x9), region = 183 }

// kernel: _lambda_.26
= control target key start
LH: loop header
LB: loop body
LE: loop exit
PB: predicated region body
PF: predicated region fallthrough
CT: control target
= control target key end

     0   :  { %s713_s18 = smov 0   ;;  %s779_s0 = inlined_call_operand.vmem [shape: f32[128,16], index: 0, kind: input, shape index: {}]   ;;  %s780_s1 = inlined_call_operand.vmem [shape: f32[16,16], index: 1, kind: input, shape index: {}]   ;;  %s781_s2 = inlined_call_operand.vmem [shape: f32[1,16], index: 2, kind: input, shape index: {}]   ;;  %s782_s3 = inlined_call_operand.vmem [shape: f32[16,2], index: 3, kind: input, shape index: {}]   ;;  %s783_s4 = inlined_call_operand.vmem [shape: f32[1,2], index: 4, kind: input, shape index: {}]   ;;  %s784_s5 = inlined_call_operand.vmem [shape: f32[128,2], index: 5, kind: output, shape index: {}]  }
   0x1 LB: > { %s586_s19 = sadd.s32 4294967295, %s681_s18   ;;  %p590_p0 = scmp.ge.s32.totalorder %s681_s18, 1  ;;  %s681_s18 = sphi %s713_s18, %s15_s18  }
   0x2   : > { %p188_p1 = scmp.lt.s32.totalorder %s681_s18, 3 }
   0x4   : > { %p189_p2 = pnand %p590_p0, %p188_p1 }
   0x5   : > { %s591_s24 = sshll.u32 (!%p189_p2), %s586_s19, 3 }
   0x6   : > { %192 = sbr.rel (%p189_p2) target bundleno = 426 (0x1aa), region = 40  ;;  %p217_p3 = scmp.lt.s32.totalorder (!%p189_p2), %s591_s24, 15 }
   0xb   : > { %v237_v0 = vld [vmem:[%s780_s1 + $0x8] sm:$0xff]  ;;  %v236_v1 = vld [vmem:[%s780_s1] sm:$0xff]  ;;  %s786_s24 = smov (!%p217_p3, %s591_s24), 15  ;;  %vm245_vm0 = vcmask 130048   ;;  %vm521_vm1 = vcmask 15360  }
   0xc   : > { %635 = vmatprep.subr.mxu0 %v237_v0  ;;  %s592_s25 = sshll.u32 %s786_s24, 3  ;;  %v384_v10 = vld [vmem:[%s782_s3 + $0x8] sm:$0xff]  ;;  %v383_v11 = vld [vmem:[%s782_s3] sm:$0xff] }
   0xd   : > { %636 = vmatpush3.msra.mxu0 %v237_v0  ;;  %s220_s28 = scalar_lea.vmem %s779_s0, %s592_s25  ;;  %651 = vmatprep.subr.mxu1 %v384_v10  ;;  %v595_v12 = vld [vmem:[%s781_s2] ss:$0 sm:$0xff]  ;;  %s226_s14 = scalar_lea.vmem %s784_s5, %s592_s25 }
   0xe   : > { %637 = vmatprep.subr.mxu0 %v236_v1  ;;  %v228_v2 = vld [vmem:[%s220_s28] sm:$0xff]  ;;  %v229_v3 = vld [vmem:[%s220_s28 + $0x8] sm:$0xff]  ;;  %v230_v4 = vld [vmem:[%s220_s28 + $0x10] sm:$0xff]  ;;  %652 = vmatpush3.msra.mxu1 %v384_v10 }
   0xf   : > { %638 = vmatpush3.msra.mxu0 %v236_v1  ;;  %639 = vmatprep.mubr.msk.f32.mxu0 %vm245_vm0, %v228_v2  ;;  %v231_v5 = vld [vmem:[%s220_s28 + $0x18] sm:$0xff]  ;;  %v232_v6 = vld [vmem:[%s220_s28 + $0x20] sm:$0xff]  ;;  %v233_v7 = vld [vmem:[%s220_s28 + $0x28] sm:$0xff] }
  0x10   : > { %640 = vmatmul.mubr.msk.f32.vlgmr.msra.gmra.mxu0 %vm245_vm0, %v229_v3  ;;  %v234_v8 = vld [vmem:[%s220_s28 + $0x30] sm:$0xff]  ;;  %v235_v9 = vld [vmem:[%s220_s28 + $0x38] sm:$0xff]  ;;  %653 = vmatprep.subr.mxu1 %v383_v11  ;;  %v604_v37 = vld [vmem:[%s783_s4] ss:$0 sm:$0xff] }
  0x11   : > { %642 = vmatprep.mubr.msk.f32.mxu0 %vm245_vm0, %v230_v4  ;;  %654 = vmatpush3.msra.mxu1 %v383_v11 }
  0x14   : > { %643 = vmatmul.mubr.msk.f32.gmra.mxu0 %vm245_vm0, %v231_v5 }
  0x15   : > { %645 = vmatprep.mubr.msk.f32.mxu0 %vm245_vm0, %v232_v6 }
  0x18   : > { %646 = vmatmul.mubr.msk.f32.gmra.mxu0 %vm245_vm0, %v233_v7 }
  0x19   : > { %648 = vmatprep.mubr.msk.f32.mxu0 %vm245_vm0, %v234_v8 }
  0x1c   : > { %649 = vmatmul.mubr.msk.f32.gmra.mxu0 %vm245_vm0, %v235_v9 }
  0xd0   : > { %v641_v13 = vpop.f32.mrf.mxu0 }
  0xd1   : > { %v342_v14 = vadd.f32 %v641_v13, %v595_v12 }
  0xd2   : > { %v336_v15 = vpop.f32.mrf.mxu0 }
  0xd3   : > { %v337_v16 = vadd.f32 %v595_v12, %v336_v15  ;;  %v376_v19 = vmax.f32 %v342_v14, 0.0 }
  0xd4   : > { %v644_v17 = vpop.f32.mrf.mxu0 }
  0xd5   : > { %v375_v18 = vmax.f32 %v337_v16, 0.0  ;;  %v352_v20 = vadd.f32 %v644_v17, %v595_v12 }
  0xd6   : > { %v346_v21 = vpop.f32.mrf.mxu0 }
  0xd7   : > { %v347_v22 = vadd.f32 %v595_v12, %v346_v21  ;;  %655 = vmatprep.mubr.msk.f32.mxu1 %vm245_vm0, %v375_v18  ;;  %v378_v25 = vmax.f32 %v352_v20, 0.0 }
  0xd8   : > { %v647_v23 = vpop.f32.mrf.mxu0  ;;  %656 = vmatmul.mubr.msk.f32.vlgmr.msra.gmra.mxu1 %vm245_vm0, %v376_v19 }
  0xd9   : > { %v377_v24 = vmax.f32 %v347_v22, 0.0  ;;  %v362_v26 = vadd.f32 %v647_v23, %v595_v12 }
  0xda   : > { %v356_v27 = vpop.f32.mrf.mxu0 }
  0xdb   : > { %v357_v28 = vadd.f32 %v595_v12, %v356_v27  ;;  %658 = vmatprep.mubr.msk.f32.mxu1 %vm245_vm0, %v377_v24  ;;  %v380_v31 = vmax.f32 %v362_v26, 0.0 }
  0xdc   : > { %v650_v29 = vpop.f32.mrf.mxu0  ;;  %659 = vmatmul.mubr.msk.f32.gmra.mxu1 %vm245_vm0, %v378_v25 }
  0xdd   : > { %v379_v30 = vmax.f32 %v357_v28, 0.0  ;;  %v372_v32 = vadd.f32 %v650_v29, %v595_v12 }
  0xde   : > { %v366_v33 = vpop.f32.mrf.mxu0 }
  0xdf   : > { %v367_v34 = vadd.f32 %v595_v12, %v366_v33  ;;  %661 = vmatprep.mubr.msk.f32.mxu1 %vm245_vm0, %v379_v30  ;;  %v382_v36 = vmax.f32 %v372_v32, 0.0 }
  0xe0   : > { %662 = vmatmul.mubr.msk.f32.gmra.mxu1 %vm245_vm0, %v380_v31 }
  0xe1   : > { %v381_v35 = vmax.f32 %v367_v34, 0.0 }
  0xe3   : > { %664 = vmatprep.mubr.msk.f32.mxu1 %vm245_vm0, %v381_v35 }
  0xe4   : > { %665 = vmatmul.mubr.msk.f32.gmra.mxu1 %vm245_vm0, %v382_v36 }
 0x198   : > { %v657_v38 = vpop.f32.mrf.mxu1 }
 0x199   : > { %v488_v39 = vadd.f32 %v657_v38, %v604_v37 }
 0x19a   : > { %v482_v40 = vpop.f32.mrf.mxu1 }
 0x19b   : > { %523 = vst.msk [vmem:[%s226_s14 + $0x8] sm:$0xff] %vm521_vm1, %v488_v39  ;;  %v483_v41 = vadd.f32 %v604_v37, %v482_v40 }
 0x19c   : > { %v660_v42 = vpop.f32.mrf.mxu1 }
 0x19d   : > { %522 = vst.msk [vmem:[%s226_s14] sm:$0xff] %vm521_vm1, %v483_v41  ;;  %v498_v43 = vadd.f32 %v660_v42, %v604_v37 }
 0x19e   : > { %v492_v44 = vpop.f32.mrf.mxu1 }
 0x19f   : > { %525 = vst.msk [vmem:[%s226_s14 + $0x18] sm:$0xff] %vm521_vm1, %v498_v43  ;;  %v493_v45 = vadd.f32 %v604_v37, %v492_v44 }
 0x1a0   : > { %v663_v46 = vpop.f32.mrf.mxu1 }
 0x1a1   : > { %524 = vst.msk [vmem:[%s226_s14 + $0x10] sm:$0xff] %vm521_vm1, %v493_v45  ;;  %v508_v47 = vadd.f32 %v663_v46, %v604_v37 }
 0x1a2   : > { %v502_v48 = vpop.f32.mrf.mxu1 }
 0x1a3   : > { %527 = vst.msk [vmem:[%s226_s14 + $0x28] sm:$0xff] %vm521_vm1, %v508_v47  ;;  %v503_v49 = vadd.f32 %v604_v37, %v502_v48 }
 0x1a4   : > { %v666_v50 = vpop.f32.mrf.mxu1 }
 0x1a5   : > { %526 = vst.msk [vmem:[%s226_s14 + $0x20] sm:$0xff] %vm521_vm1, %v503_v49  ;;  %v518_v51 = vadd.f32 %v666_v50, %v604_v37 }
 0x1a6   : > { %v512_v52 = vpop.f32.mrf.mxu1 }
 0x1a7   : > { %529 = vst.msk [vmem:[%s226_s14 + $0x38] sm:$0xff] %vm521_vm1, %v518_v51  ;;  %v513_v53 = vadd.f32 %v604_v37, %v512_v52 }
 0x1a9   : > { %528 = vst.msk [vmem:[%s226_s14 + $0x30] sm:$0xff] %vm521_vm1, %v513_v53 }
 0x1aa PF: > { %s15_s18 = sadd.s32 1, %s681_s18  }
 0x1ab   : > { %p12_p4 = scmp.ge.s32.totalorder %s15_s18, 4  }
 0x1ad   :  { %14 = sbr.rel (!%p12_p4) target bundleno = 1 (0x1), region = 70 }

// kernel: _lambda_.20
= control target key start
LH: loop header
LB: loop body
LE: loop exit
PB: predicated region body
PF: predicated region fallthrough
CT: control target
= control target key end

     0   :  { %v2246_v0 = vmov 0.0   ;;  %vm88_vm0 = vcmask 654336   ;;  %vm2247_vm1 = vmmov 0   ;;  %vm171_vm2 = vcmask 130048   ;;  %s3486_s2 = inlined_call_operand.vmem [shape: f32[208,16], index: 2, kind: input, shape index: {}]   ;;  %s3487_s1 = inlined_call_operand.vmem [shape: f32[8,208], index: 1, kind: input, shape index: {}]   ;;  %s3488_s4 = inlined_call_operand.vmem [shape: f32[16,16], index: 4, kind: input, shape index: {}]   ;;  %s3489_s3 = inlined_call_operand.vmem [shape: f32[1,16], index: 3, kind: input, shape index: {}]   ;;  %s3490_s6 = inlined_call_operand.vmem [shape: f32[16,16], index: 6, kind: input, shape index: {}]   ;;  %s3491_s5 = inlined_call_operand.vmem [shape: f32[1,16], index: 5, kind: input, shape index: {}]   ;;  %s3492_s7 = inlined_call_operand.vmem [shape: f32[1,16], index: 7, kind: input, shape index: {}]   ;;  %s3493_s0 = inlined_call_operand.vmem [shape: f32[8,16], index: 0, kind: input, shape index: {}]   ;;  %s3494_s10 = inlined_call_operand.vmem [shape: f32[16,2048], index: 10, kind: input, shape index: {}]   ;;  %s3495_s12 = inlined_call_operand.vmem [shape: f32[2048,16], index: 12, kind: input, shape index: {}]   ;;  %s3496_s8 = inlined_call_operand.vmem [shape: f32[1,16], index: 8, kind: input, shape index: {}]   ;;  %s3497_s9 = inlined_call_operand.vmem [shape: f32[1,16], index: 9, kind: input, shape index: {}]   ;;  %s3498_s11 = inlined_call_operand.vmem [shape: f32[1,2048], index: 11, kind: input, shape index: {}]   ;;  %s3499_s13 = inlined_call_operand.vmem [shape: f32[1,16], index: 13, kind: input, shape index: {}]   ;;  %s3500_s14 = inlined_call_operand.vmem [shape: f32[1,16], index: 14, kind: input, shape index: {}]   ;;  %s3501_s15 = inlined_call_operand.vmem [shape: f32[1,16], index: 15, kind: input, shape index: {}]   ;;  %s3502_s16 = inlined_call_operand.vmem [shape: f32[8,16], index: 16, kind: output, shape index: {}]  }
   0x1   :  { %3504 = sst [smem:[#allocation2_spill]] %s3486_s2  ;;  %92 = vmatprep.subr.mxu0 %v2246_v0  ;;  %2226 = vmatprep.subr.mxu1 %v2246_v0  ;;  %v54_v7 = vld [vmem:[%s3487_s1 + $0x8] sm:$0xff]  ;;  %v53_v28 = vld [vmem:[%s3487_s1] sm:$0xff]  ;;  %v379_v58 = vld [vmem:[%s3494_s10 + $0x98] sm:$0xff] }
   0x2   :  { %s3505_s23 = sld [smem:[#allocation2_spill]]  ;;  %1922 = vmatprep.mubr.msk.f32.mxu0 %vm88_vm0, %v54_v7  ;;  %v163_v29 = vld [vmem:[%s3488_s4 + $0x8] sm:$0xff]  ;;  %v162_v30 = vld [vmem:[%s3488_s4] sm:$0xff]  ;;  %2230 = vmatprep.mubr.msk.f32.mxu1 %vm2247_vm1, %v2246_v0  ;;  %v1126_v59 = vld [vmem:[%s3495_s12 + $0x1f8] sm:$0xff] }
   0x3   :  { %2227 = vmatpush3.msra.mxu1 %v163_v29  ;;  %v1921_v31 = vld [vmem:[%s3489_s3] ss:$0 sm:$0xff]  ;;  %v247_v35 = vld [vmem:[%s3490_s6 + $0x8] sm:$0xff]  ;;  %v1110_v60 = vld [vmem:[%s3495_s12 + $0x178] sm:$0xff] }
   0x4   :  { %2228 = vmatprep.subr.mxu1 %v2246_v0  ;;  %v246_v36 = vld [vmem:[%s3490_s6] sm:$0xff]  ;;  %v377_v54 = vld [vmem:[%s3494_s10 + $0x88] sm:$0xff]  ;;  %v1125_v61 = vld [vmem:[%s3495_s12 + $0x1f0] sm:$0xff] }
   0x5   :  { %2229 = vmatpush3.msra.mxu1 %v162_v30  ;;  %v1923_v37 = vld [vmem:[%s3491_s5] ss:$0 sm:$0xff]  ;;  %v361_v56 = vld [vmem:[%s3494_s10 + $0x8] sm:$0xff]  ;;  %v1109_v62 = vld [vmem:[%s3495_s12 + $0x170] sm:$0xff] }
   0x6   :  { %2233 = vmatprep.subr.mxu1 %v2246_v0  ;;  %v1925_v42 = vld [vmem:[%s3492_s7] ss:$0 sm:$0xff]  ;;  %v1124_v63 = vld [vmem:[%s3495_s12 + $0x1e8] sm:$0xff]  ;;  %v1105_v7 = vld [vmem:[%s3495_s12 + $0x150] sm:$0xff] }
   0x7   :  { %v328_v44 = vld [vmem:[%s3493_s0] sm:$0xff]  ;;  %v381_v29 = vld [vmem:[%s3494_s10 + $0xa8] sm:$0xff] }
   0x8   :  { %v70_v1 = vld [vmem:[%s3505_s23 + $0x78] sm:$0xff]  ;;  %v69_v2 = vld [vmem:[%s3505_s23 + $0x70] sm:$0xff]  ;;  %v68_v3 = vld [vmem:[%s3505_s23 + $0x68] sm:$0xff] }
   0x9   :  { %93 = vmatpush1.msra.mxu0 %v70_v1  ;;  %v67_v4 = vld [vmem:[%s3505_s23 + $0x60] sm:$0xff]  ;;  %v66_v5 = vld [vmem:[%s3505_s23 + $0x58] sm:$0xff]  ;;  %v65_v6 = vld [vmem:[%s3505_s23 + $0x50] sm:$0xff] }
   0xa   :  { %94 = vmatprep.subr.mxu0 %v2246_v0  ;;  %v64_v8 = vld [vmem:[%s3505_s23 + $0x48] sm:$0xff]  ;;  %v63_v9 = vld [vmem:[%s3505_s23 + $0x40] sm:$0xff]  ;;  %v62_v10 = vld [vmem:[%s3505_s23 + $0x38] sm:$0xff] }
   0xb   :  { %95 = vmatpush1.msra.mxu0 %v69_v2  ;;  %v61_v11 = vld [vmem:[%s3505_s23 + $0x30] sm:$0xff]  ;;  %v60_v12 = vld [vmem:[%s3505_s23 + $0x28] sm:$0xff]  ;;  %v59_v13 = vld [vmem:[%s3505_s23 + $0x20] sm:$0xff] }
   0xc   :  { %96 = vmatprep.subr.mxu0 %v2246_v0  ;;  %v58_v14 = vld [vmem:[%s3505_s23 + $0x18] sm:$0xff]  ;;  %v57_v15 = vld [vmem:[%s3505_s23 + $0x10] sm:$0xff]  ;;  %v56_v16 = vld [vmem:[%s3505_s23 + $0x8] sm:$0xff] }
   0xd   :  { %97 = vmatpush1.msra.mxu0 %v68_v3  ;;  %v55_v17 = vld [vmem:[%s3505_s23] sm:$0xff]  ;;  %v80_v18 = vld [vmem:[%s3505_s23 + $0xc8] sm:$0xff]  ;;  %v78_v20 = vld [vmem:[%s3505_s23 + $0xb8] sm:$0xff] }
   0xe   :  { %98 = vmatprep.subr.mxu0 %v2246_v0  ;;  %v79_v19 = vld [vmem:[%s3505_s23 + $0xc0] sm:$0xff]  ;;  %v77_v21 = vld [vmem:[%s3505_s23 + $0xb0] sm:$0xff]  ;;  %v76_v22 = vld [vmem:[%s3505_s23 + $0xa8] sm:$0xff] }
   0xf   :  { %99 = vmatpush1.msra.mxu0 %v67_v4  ;;  %v75_v23 = vld [vmem:[%s3505_s23 + $0xa0] sm:$0xff]  ;;  %v74_v24 = vld [vmem:[%s3505_s23 + $0x98] sm:$0xff]  ;;  %v73_v25 = vld [vmem:[%s3505_s23 + $0x90] sm:$0xff] }
  0x10   :  { %100 = vmatprep.subr.mxu0 %v2246_v0  ;;  %v72_v26 = vld [vmem:[%s3505_s23 + $0x88] sm:$0xff]  ;;  %v71_v27 = vld [vmem:[%s3505_s23 + $0x80] sm:$0xff]  ;;  %v1122_v4 = vld [vmem:[%s3495_s12 + $0x1d8] sm:$0xff] }
  0x11   :  { %101 = vmatpush1.msra.mxu0 %v66_v5  ;;  %v376_v55 = vld [vmem:[%s3494_s10 + $0x80] sm:$0xff]  ;;  %v1108_v1 = vld [vmem:[%s3495_s12 + $0x168] sm:$0xff]  ;;  %v1106_v5 = vld [vmem:[%s3495_s12 + $0x158] sm:$0xff] }
  0x12   :  { %102 = vmatprep.subr.mxu0 %v2246_v0  ;;  %v360_v57 = vld [vmem:[%s3494_s10] sm:$0xff] }
  0x13   :  { %103 = vmatpush1.msra.mxu0 %v65_v6  ;;  %v1123_v2 = vld [vmem:[%s3495_s12 + $0x1e0] sm:$0xff]  ;;  %v1121_v6 = vld [vmem:[%s3495_s12 + $0x1d0] sm:$0xff] }
  0x14   :  { %104 = vmatprep.subr.mxu0 %v2246_v0  ;;  %v1107_v3 = vld [vmem:[%s3495_s12 + $0x160] sm:$0xff] }
  0x15   :  { %105 = vmatpush1.msra.mxu0 %v64_v8  ;;  %v1120_v8 = vld [vmem:[%s3495_s12 + $0x1c8] sm:$0xff]  ;;  %v380_v30 = vld [vmem:[%s3494_s10 + $0xa0] sm:$0xff] }
  0x16   :  { %106 = vmatprep.subr.mxu0 %v2246_v0 }
  0x17   :  { %107 = vmatpush1.msra.mxu0 %v63_v9  ;;  %v1104_v9 = vld [vmem:[%s3495_s12 + $0x148] sm:$0xff] }
  0x18   :  { %108 = vmatprep.subr.mxu0 %v2246_v0 }
  0x19   :  { %109 = vmatpush1.msra.mxu0 %v62_v10  ;;  %v1119_v10 = vld [vmem:[%s3495_s12 + $0x1c0] sm:$0xff] }
  0x1a   :  { %110 = vmatprep.subr.mxu0 %v2246_v0 }
  0x1b   :  { %111 = vmatpush1.msra.mxu0 %v61_v11  ;;  %v1103_v11 = vld [vmem:[%s3495_s12 + $0x140] sm:$0xff] }
  0x1c   :  { %112 = vmatprep.subr.mxu0 %v2246_v0 }
  0x1d   :  { %113 = vmatpush1.msra.mxu0 %v60_v12  ;;  %v1118_v12 = vld [vmem:[%s3495_s12 + $0x1b8] sm:$0xff] }
  0x1e   :  { %114 = vmatprep.subr.mxu0 %v2246_v0 }
  0x1f   :  { %115 = vmatpush1.msra.mxu0 %v59_v13  ;;  %v1102_v13 = vld [vmem:[%s3495_s12 + $0x138] sm:$0xff] }
  0x20   :  { %116 = vmatprep.subr.mxu0 %v2246_v0 }
  0x21   :  { %117 = vmatpush1.msra.mxu0 %v58_v14  ;;  %v1117_v14 = vld [vmem:[%s3495_s12 + $0x1b0] sm:$0xff] }
  0x22   :  { %118 = vmatprep.subr.mxu0 %v2246_v0 }
  0x23   :  { %119 = vmatpush1.msra.mxu0 %v57_v15  ;;  %v1101_v15 = vld [vmem:[%s3495_s12 + $0x130] sm:$0xff] }
  0x24   :  { %120 = vmatprep.subr.mxu0 %v2246_v0 }
  0x25   :  { %121 = vmatpush1.msra.mxu0 %v56_v16  ;;  %v1116_v16 = vld [vmem:[%s3495_s12 + $0x1a8] sm:$0xff] }
  0x26   :  { %122 = vmatprep.subr.mxu0 %v2246_v0 }
  0x27   :  { %123 = vmatpush1.msra.mxu0 %v55_v17 }
  0x28   :  { %136 = vmatprep.subr.mxu0 %v2246_v0 }
  0x29   :  { %137 = vmatpush2.msra.mxu0 %v80_v18 }
  0x2a   :  { %138 = vmatprep.subr.mxu0 %v2246_v0 }
  0x2b   :  { %139 = vmatpush2.msra.mxu0 %v79_v19 }
  0x2c   :  { %140 = vmatprep.subr.mxu0 %v2246_v0 }
  0x2d   :  { %141 = vmatpush2.msra.mxu0 %v78_v20 }
  0x2e   :  { %142 = vmatprep.subr.mxu0 %v2246_v0 }
  0x2f   :  { %143 = vmatpush2.msra.mxu0 %v77_v21  ;;  %v1927_v21 = vld [vmem:[%s3496_s8] ss:$0 sm:$0xff] }
  0x30   :  { %144 = vmatprep.subr.mxu0 %v2246_v0 }
  0x31   :  { %145 = vmatpush2.msra.mxu0 %v76_v22 }
  0x32   :  { %146 = vmatprep.subr.mxu0 %v2246_v0 }
  0x33   :  { %147 = vmatpush2.msra.mxu0 %v75_v23  ;;  %v1928_v23 = vld [vmem:[%s3497_s9] ss:$0 sm:$0xff] }
  0x34   :  { %148 = vmatprep.subr.mxu0 %v2246_v0 }
  0x35   :  { %149 = vmatpush2.msra.mxu0 %v74_v24 }
  0x36   :  { %150 = vmatprep.subr.mxu0 %v2246_v0 }
  0x37   :  { %151 = vmatpush2.msra.mxu0 %v73_v25 }
  0x38   :  { %152 = vmatprep.subr.mxu0 %v2246_v0 }
  0x39   :  { %153 = vmatpush2.msra.mxu0 %v72_v26  ;;  %v378_v26 = vld [vmem:[%s3494_s10 + $0x90] sm:$0xff] }
  0x3a   :  { %154 = vmatprep.subr.mxu0 %v2246_v0 }
  0x3b   :  { %155 = vmatpush2.msra.mxu0 %v71_v27  ;;  %v363_v27 = vld [vmem:[%s3494_s10 + $0x18] sm:$0xff] }
  0x3c   :  { %157 = vmatmul.mubr.f32.vlgmr.msra.gmra.mxu0 %v53_v28  ;;  %1981 = vmatprep.subr.mxu0 %v1126_v59  ;;  %v362_v28 = vld [vmem:[%s3494_s10 + $0x10] sm:$0xff]  ;;  %v1075_v59 = vld [vmem:[%s3495_s12 + $0x60] sm:$0xff] }
  0x3d   :  { %1982 = vmatpush3.msra.mxu0 %v1110_v60  ;;  %v1090_v60 = vld [vmem:[%s3495_s12 + $0xd8] sm:$0xff] }
  0x3e   :  { %1983 = vmatprep.subr.mxu0 %v1125_v61  ;;  %v1074_v61 = vld [vmem:[%s3495_s12 + $0x58] sm:$0xff] }
  0x3f   :  { %1984 = vmatpush3.msra.mxu0 %v1109_v62  ;;  %v1089_v62 = vld [vmem:[%s3495_s12 + $0xd0] sm:$0xff] }
  0x40   :  { %1985 = vmatprep.subr.mxu0 %v1124_v63  ;;  %v1073_v63 = vld [vmem:[%s3495_s12 + $0x50] sm:$0xff] }
  0x41   :  { %1986 = vmatpush3.msra.mxu0 %v1108_v1  ;;  %v1088_v1 = vld [vmem:[%s3495_s12 + $0xc8] sm:$0xff] }
  0x42   :  { %1987 = vmatprep.subr.mxu0 %v1123_v2  ;;  %v1072_v2 = vld [vmem:[%s3495_s12 + $0x48] sm:$0xff] }
  0x43   :  { %1988 = vmatpush3.msra.mxu0 %v1107_v3  ;;  %v1087_v3 = vld [vmem:[%s3495_s12 + $0xc0] sm:$0xff] }
  0x44   :  { %1989 = vmatprep.subr.mxu0 %v1122_v4  ;;  %v1071_v4 = vld [vmem:[%s3495_s12 + $0x40] sm:$0xff] }
  0x45   :  { %1990 = vmatpush3.msra.mxu0 %v1106_v5  ;;  %v1086_v5 = vld [vmem:[%s3495_s12 + $0xb8] sm:$0xff] }
  0x46   :  { %1991 = vmatprep.subr.mxu0 %v1121_v6  ;;  %v1070_v6 = vld [vmem:[%s3495_s12 + $0x38] sm:$0xff] }
  0x47   :  { %1992 = vmatpush3.msra.mxu0 %v1105_v7  ;;  %v1085_v7 = vld [vmem:[%s3495_s12 + $0xb0] sm:$0xff] }
  0x48   :  { %1993 = vmatprep.subr.mxu0 %v1120_v8  ;;  %v1069_v8 = vld [vmem:[%s3495_s12 + $0x30] sm:$0xff] }
  0x49   :  { %1994 = vmatpush3.msra.mxu0 %v1104_v9  ;;  %v1084_v9 = vld [vmem:[%s3495_s12 + $0xa8] sm:$0xff] }
  0x4a   :  { %1995 = vmatprep.subr.mxu0 %v1119_v10  ;;  %v1068_v10 = vld [vmem:[%s3495_s12 + $0x28] sm:$0xff] }
  0x4b   :  { %1996 = vmatpush3.msra.mxu0 %v1103_v11  ;;  %v1083_v11 = vld [vmem:[%s3495_s12 + $0xa0] sm:$0xff] }
  0x4c   :  { %1997 = vmatprep.subr.mxu0 %v1118_v12  ;;  %v1067_v12 = vld [vmem:[%s3495_s12 + $0x20] sm:$0xff] }
  0x4d   :  { %1998 = vmatpush3.msra.mxu0 %v1102_v13  ;;  %v1082_v13 = vld [vmem:[%s3495_s12 + $0x98] sm:$0xff] }
  0x4e   :  { %1999 = vmatprep.subr.mxu0 %v1117_v14  ;;  %v1066_v14 = vld [vmem:[%s3495_s12 + $0x18] sm:$0xff] }
  0x4f   :  { %2000 = vmatpush3.msra.mxu0 %v1101_v15  ;;  %v1100_v15 = vld [vmem:[%s3495_s12 + $0x128] sm:$0xff] }
  0x50   :  { %2001 = vmatprep.subr.mxu0 %v1116_v16  ;;  %v1081_v16 = vld [vmem:[%s3495_s12 + $0x90] sm:$0xff] }
  0x51   :  { %2002 = vmatpush3.msra.mxu0 %v1100_v15  ;;  %v1139_v15 = vld [vmem:[%s3495_s12 + $0x260] sm:$0xff] }
  0xfc   :  { %v158_v32 = vpop.f32.mrf.mxu0 }
  0xfd   :  { %v159_v33 = vadd.f32 %v1921_v31, %v158_v32  ;;  %v365_v31 = vld [vmem:[%s3494_s10 + $0x28] sm:$0xff]  ;;  %v364_v32 = vld [vmem:[%s3494_s10 + $0x20] sm:$0xff] }
  0xfe   :  { %v160_v34 = vpop.f32.mrf.mxu0 }
  0xff   :  { %2231 = vmatmul.mubr.msk.f32.vlgmr.msra.gmra.mxu1 %vm171_vm2, %v159_v33  ;;  %v383_v33 = vld [vmem:[%s3494_s10 + $0xb8] sm:$0xff]  ;;  %v382_v34 = vld [vmem:[%s3494_s10 + $0xb0] sm:$0xff] }
 0x100   :  { %2237 = vmatprep.mubr.msk.f32.mxu1 %vm2247_vm1, %v2246_v0  ;;  %2234 = vmatpush3.msra.mxu1 %v247_v35  ;;  %v367_v35 = vld [vmem:[%s3494_s10 + $0x38] sm:$0xff] }
 0x101   :  { %2235 = vmatprep.subr.mxu1 %v2246_v0 }
 0x102   :  { %2236 = vmatpush3.msra.mxu1 %v246_v36  ;;  %v366_v36 = vld [vmem:[%s3494_s10 + $0x30] sm:$0xff] }
 0x103   :  { %507 = vmatprep.subr.mxu1 %v377_v54  ;;  %v1078_v54 = vld [vmem:[%s3495_s12 + $0x78] sm:$0xff] }
 0x1bf   :  { %v241_v38 = vpop.f32.mrf.mxu1 }
 0x1c0   :  { %v242_v39 = vadd.f32 %v1923_v37, %v241_v38  ;;  %v385_v37 = vld [vmem:[%s3494_s10 + $0xc8] sm:$0xff]  ;;  %v384_v38 = vld [vmem:[%s3494_s10 + $0xc0] sm:$0xff] }
 0x1c1   :  { %v2232_v40 = vpop.f32.mrf.mxu1 }
 0x1c2   :  { %v245_v41 = vmax.f32 %v242_v39, 0.0  ;;  %v369_v39 = vld [vmem:[%s3494_s10 + $0x48] sm:$0xff]  ;;  %v368_v40 = vld [vmem:[%s3494_s10 + $0x40] sm:$0xff] }
 0x1c4   :  { %2238 = vmatmul.mubr.msk.f32.vlgmr.msra.gmra.mxu1 %vm171_vm2, %v245_v41  ;;  %v387_v41 = vld [vmem:[%s3494_s10 + $0xd8] sm:$0xff] }
 0x1c5   :  { %543 = vmatprep.mubr.f32.mxu1 %v2246_v0  ;;  %508 = vmatpush1.msra.mxu1 %v376_v55  ;;  %v1093_v55 = vld [vmem:[%s3495_s12 + $0xf0] sm:$0xff] }
 0x1c6   :  { %509 = vmatprep.subr.mxu1 %v361_v56  ;;  %v1092_v56 = vld [vmem:[%s3495_s12 + $0xe8] sm:$0xff] }
 0x1c7   :  { %510 = vmatpush1.msra.mxu1 %v360_v57  ;;  %v1076_v57 = vld [vmem:[%s3495_s12 + $0x68] sm:$0xff] }
 0x1c8   :  { %578 = vmatprep.subr.mxu1 %v379_v58  ;;  %v1091_v58 = vld [vmem:[%s3495_s12 + $0xe0] sm:$0xff] }
 0x284   :  { %v324_v43 = vpop.f32.mrf.mxu1 }
 0x285   :  { %v325_v45 = vadd.f32 %v1925_v42, %v324_v43  ;;  %v386_v42 = vld [vmem:[%s3494_s10 + $0xd0] sm:$0xff]  ;;  %v371_v43 = vld [vmem:[%s3494_s10 + $0x58] sm:$0xff] }
 0x286   :  { %v2239_v46 = vpop.f32.mrf.mxu1 }
 0x287   :  { %v329_v47 = vadd.f32 %v328_v44, %v325_v45  ;;  %v370_v44 = vld [vmem:[%s3494_s10 + $0x50] sm:$0xff]  ;;  %v389_v45 = vld [vmem:[%s3494_s10 + $0xe8] sm:$0xff]  ;;  %v388_v46 = vld [vmem:[%s3494_s10 + $0xe0] sm:$0xff] }
 0x289   :  { %v332_v48 = vsel %vm171_vm2, %v329_v47, 0.0 }
 0x28a   :  { %333 = vadd.xlane.f32.xlu0 %v332_v48  ;;  %v372_v48 = vld [vmem:[%s3494_s10 + $0x60] sm:$0xff] }
 0x313   :  { %v334_v49 = vpop.xlane.xlu0 %333 }
 0x314   :  { %v336_v50 = vmul.f32 0.0625, %v334_v49  ;;  %v391_v49 = vld [vmem:[%s3494_s10 + $0xf8] sm:$0xff] }
 0x316   :  { %v2477_v51 = vsub.f32 %v329_v47, %v336_v50  ;;  %v373_v47 = vld [vmem:[%s3494_s10 + $0x68] sm:$0xff]  ;;  %v390_v50 = vld [vmem:[%s3494_s10 + $0xf0] sm:$0xff] }
 0x318   :  { %v338_v52 = vmul.f32 %v2477_v51, %v2477_v51 }
 0x31a   :  { %v339_v53 = vsel %vm171_vm2, %v338_v52, 0.0  ;;  %v374_v52 = vld [vmem:[%s3494_s10 + $0x70] sm:$0xff] }
 0x31b   :  { %340 = vadd.xlane.f32.xlu0 %v339_v53  ;;  %v1094_v53 = vld [vmem:[%s3495_s12 + $0xf8] sm:$0xff] }
 0x3a4   :  { %v341_v17 = vpop.xlane.xlu0 %340 }
 0x3a5   :  { %v342_v18 = vmul.f32 0.0625, %v341_v17  ;;  %v1115_v17 = vld [vmem:[%s3495_s12 + $0x1a0] sm:$0xff] }
 0x3a6   :  { %2003 = vmatprep.subr.mxu0 %v1115_v17 }
 0x3a7   :  { %v343_v19 = vadd.f32 1e-05, %v342_v18  ;;  %v1065_v18 = vld [vmem:[%s3495_s12 + $0x10] sm:$0xff] }
 0x3a9   :  { %2242 = vrsqrt.f32 %v343_v19  ;;  %v1099_v19 = vld [vmem:[%s3495_s12 + $0x120] sm:$0xff] }
 0x3aa   :  { %2004 = vmatpush3.msra.mxu0 %v1099_v19 }
 0x3b6   :  { %v2243_v20 = vpop.eup %2242 }
 0x3b7   :  { %v345_v22 = vmul.f32 %v2243_v20, %v2477_v51  ;;  %v375_v51 = vld [vmem:[%s3494_s10 + $0x78] sm:$0xff]  ;;  %v1080_v20 = vld [vmem:[%s3495_s12 + $0x88] sm:$0xff] }
 0x3b9   :  { %v352_v24 = vmul.f32 %v1927_v21, %v345_v22  ;;  %v1114_v21 = vld [vmem:[%s3495_s12 + $0x198] sm:$0xff]  ;;  %v1064_v22 = vld [vmem:[%s3495_s12 + $0x8] sm:$0xff] }
 0x3ba   :  { %2005 = vmatprep.subr.mxu0 %v1114_v21  ;;  %v1138_v21 = vld [vmem:[%s3495_s12 + $0x258] sm:$0xff] }
 0x3bb   :  { %v2567_v25 = vadd.f32 %v1928_v23, %v352_v24  ;;  %v1098_v23 = vld [vmem:[%s3495_s12 + $0x118] sm:$0xff]  ;;  %v1079_v24 = vld [vmem:[%s3495_s12 + $0x80] sm:$0xff] }
 0x3bc   :  { %2006 = vmatpush3.msra.mxu0 %v1098_v23  ;;  %v1172_v23 = vld [vmem:[%s3495_s12 + $0x368] sm:$0xff] }
 0x3bd   :  { %1929 = vmatmul.mubr.msk.f32.vlgmr.msra.gmra.mxu1 %vm171_vm2, %v2567_v25 }
 0x3be   :  { %579 = vmatpush1.msra.mxu1 %v378_v26  ;;  %614 = vmatprep.mubr.f32.mxu1 %v2246_v0  ;;  %v1113_v26 = vld [vmem:[%s3495_s12 + $0x190] sm:$0xff] }
 0x3bf   :  { %580 = vmatprep.subr.mxu1 %v363_v27  ;;  %2007 = vmatprep.subr.mxu0 %v1113_v26  ;;  %v1063_v27 = vld [vmem:[%s3495_s12] sm:$0xff] }
 0x3c0   :  { %581 = vmatpush1.msra.mxu1 %v362_v28  ;;  %v1097_v28 = vld [vmem:[%s3495_s12 + $0x110] sm:$0xff]  ;;  %v1187_v26 = vld [vmem:[%s3495_s12 + $0x3e0] sm:$0xff] }
 0x3c1   :  { %1930 = vmatmul.mubr.msk.f32.vlgmr.msra.gmra.mxu1 %vm171_vm2, %v2567_v25  ;;  %649 = vmatprep.subr.mxu1 %v381_v29  ;;  %v1112_v29 = vld [vmem:[%s3495_s12 + $0x188] sm:$0xff] }
 0x3c2   :  { %650 = vmatpush1.msra.mxu1 %v380_v30  ;;  %685 = vmatprep.mubr.f32.mxu1 %v2246_v0  ;;  %v1158_v30 = vld [vmem:[%s3495_s12 + $0x2f8] sm:$0xff] }
 0x3c3   :  { %651 = vmatprep.subr.mxu1 %v365_v31  ;;  %2008 = vmatpush3.msra.mxu0 %v1097_v28  ;;  %v1096_v31 = vld [vmem:[%s3495_s12 + $0x108] sm:$0xff] }
 0x3c4   :  { %652 = vmatpush1.msra.mxu1 %v364_v32  ;;  %2009 = vmatprep.subr.mxu0 %v1112_v29  ;;  %v1111_v32 = vld [vmem:[%s3495_s12 + $0x180] sm:$0xff] }
 0x3c5   :  { %1931 = vmatmul.mubr.msk.f32.vlgmr.msra.gmra.mxu1 %vm171_vm2, %v2567_v25  ;;  %720 = vmatprep.subr.mxu1 %v383_v33  ;;  %v1095_v33 = vld [vmem:[%s3495_s12 + $0x100] sm:$0xff] }
 0x3c6   :  { %721 = vmatpush1.msra.mxu1 %v382_v34  ;;  %756 = vmatprep.mubr.f32.mxu1 %v2246_v0  ;;  %v1190_v34 = vld [vmem:[%s3495_s12 + $0x3f8] sm:$0xff]  ;;  %v1171_v29 = vld [vmem:[%s3495_s12 + $0x360] sm:$0xff] }
 0x3c7   :  { %722 = vmatprep.subr.mxu1 %v367_v35  ;;  %2010 = vmatpush3.msra.mxu0 %v1096_v31  ;;  %v396_v35 = vlaneseq  ;;  %v1186_v31 = vld [vmem:[%s3495_s12 + $0x3d8] sm:$0xff] }
 0x3c8   :  { %723 = vmatpush1.msra.mxu1 %v366_v36  ;;  %2011 = vmatprep.subr.mxu0 %v1111_v32  ;;  %v1136_v32 = vld [vmem:[%s3495_s12 + $0x248] sm:$0xff] }
 0x3c9   :  { %1932 = vmatmul.mubr.msk.f32.vlgmr.msra.gmra.mxu1 %vm171_vm2, %v2567_v25  ;;  %791 = vmatprep.subr.mxu1 %v385_v37  ;;  %v2808_v36 = vshrl.u32 %v396_v35, 7  ;;  %v1185_v35 = vld [vmem:[%s3495_s12 + $0x3d0] sm:$0xff] }
 0x3ca   :  { %792 = vmatpush1.msra.mxu1 %v384_v38  ;;  %827 = vmatprep.mubr.f32.mxu1 %v2246_v0  ;;  %v2814_v38 = vld [vmem:[%s3498_s11 + $0x8] sm:$0xff] }
 0x3cb   :  { %793 = vmatprep.subr.mxu1 %v369_v39  ;;  %2012 = vmatpush3.msra.mxu0 %v1095_v33  ;;  %v414_v37 = vsub.s32 4, %v2808_v36  ;;  %v1170_v33 = vld [vmem:[%s3495_s12 + $0x358] sm:$0xff] }
 0x3cc   :  { %794 = vmatpush1.msra.mxu1 %v368_v40  ;;  %2051 = vmatprep.subr.mxu0 %v1190_v34  ;;  %v422_v40 = vsub.s32 6, %v2808_v36  ;;  %v1151_v34 = vld [vmem:[%s3495_s12 + $0x2c0] sm:$0xff] }
 0x3cd   :  { %1933 = vmatmul.mubr.msk.f32.vlgmr.msra.gmra.mxu1 %vm171_vm2, %v2567_v25  ;;  %862 = vmatprep.subr.mxu1 %v387_v41  ;;  %v2819_v39 = vrot.slane %v2814_v38, %v414_v37 }
 0x3ce   :  { %863 = vmatpush1.msra.mxu1 %v386_v42  ;;  %898 = vmatprep.mubr.f32.mxu1 %v2246_v0  ;;  %v2825_v41 = vrot.slane %v2814_v38, %v422_v40  ;;  %v398_v42 = vsub.s32 0, %v2808_v36 }
 0x3cf   :  { %864 = vmatprep.subr.mxu1 %v371_v43  ;;  %v2831_v43 = vld [vmem:[%s3498_s11] sm:$0xff] }
 0x3d0   :  { %865 = vmatpush1.msra.mxu1 %v370_v44  ;;  %v402_v44 = vsub.s32 1, %v2808_v36 }
 0x3d1   :  { %1934 = vmatmul.mubr.msk.f32.vlgmr.msra.gmra.mxu1 %vm171_vm2, %v2567_v25  ;;  %933 = vmatprep.subr.mxu1 %v389_v45  ;;  %v399_v45 = vrot.slane %v2831_v43, %v398_v42 }
 0x3d2   :  { %934 = vmatpush1.msra.mxu1 %v388_v46  ;;  %969 = vmatprep.mubr.f32.mxu1 %v2246_v0  ;;  %v406_v46 = vsub.s32 2, %v2808_v36 }
 0x3d3   :  { %935 = vmatprep.subr.mxu1 %v373_v47  ;;  %v403_v47 = vrot.slane %v2831_v43, %v402_v44 }
 0x3d4   :  { %936 = vmatpush1.msra.mxu1 %v372_v48  ;;  %v410_v48 = vsub.s32 3, %v2808_v36 }
 0x3d5   :  { %1935 = vmatmul.mubr.msk.f32.vlgmr.msra.gmra.mxu1 %vm171_vm2, %v2567_v25  ;;  %1004 = vmatprep.subr.mxu1 %v391_v49 }
 0x3d6   :  { %1005 = vmatpush1.msra.mxu1 %v390_v50  ;;  %1040 = vmatprep.mubr.f32.mxu1 %v2246_v0  ;;  %v1077_v0 = vld [vmem:[%s3495_s12 + $0x70] sm:$0xff] }
 0x3d7   :  { %1006 = vmatprep.subr.mxu1 %v375_v51 }
 0x3d8   :  { %1007 = vmatpush1.msra.mxu1 %v374_v52  ;;  %v407_v52 = vrot.slane %v2831_v43, %v406_v46 }
 0x3d9   :  { %1936 = vmatmul.mubr.msk.f32.vlgmr.msra.gmra.mxu1 %vm171_vm2, %v2567_v25  ;;  %1946 = vmatprep.subr.mxu1 %v1094_v53 }
 0x3da   :  { %1947 = vmatpush3.msra.mxu1 %v1078_v54  ;;  %v411_v54 = vrot.slane %v2831_v43, %v410_v48 }
 0x3db   :  { %1948 = vmatprep.subr.mxu1 %v1093_v55  ;;  %v418_v55 = vsub.s32 5, %v2808_v36 }
 0x3dc   :  { %1949 = vmatpush3.msra.mxu1 %v1077_v0 }
 0x3dd   :  { %1950 = vmatprep.subr.mxu1 %v1092_v56 }
 0x3de   :  { %1951 = vmatpush3.msra.mxu1 %v1076_v57 }
 0x3df   :  { %1952 = vmatprep.subr.mxu1 %v1091_v58 }
 0x3e0   :  { %1953 = vmatpush3.msra.mxu1 %v1075_v59 }
 0x3e1   :  { %1954 = vmatprep.subr.mxu1 %v1090_v60  ;;  %v1142_v60 = vld [vmem:[%s3495_s12 + $0x278] sm:$0xff] }
 0x3e2   :  { %1955 = vmatpush3.msra.mxu1 %v1074_v61 }
 0x3e3   :  { %1956 = vmatprep.subr.mxu1 %v1089_v62  ;;  %v1157_v62 = vld [vmem:[%s3495_s12 + $0x2f0] sm:$0xff] }
 0x3e4   :  { %1957 = vmatpush3.msra.mxu1 %v1073_v63  ;;  %v419_v63 = vrot.slane %v2831_v43, %v418_v55 }
 0x3e5   :  { %1958 = vmatprep.subr.mxu1 %v1088_v1  ;;  %v426_v1 = vsub.s32 7, %v2808_v36  ;;  %v1224_v36 = vld [vmem:[%s3495_s12 + $0x508] sm:$0xff] }
 0x3e6   :  { %1959 = vmatpush3.msra.mxu1 %v1072_v2 }
 0x3e7   :  { %1960 = vmatprep.subr.mxu1 %v1087_v3  ;;  %v1141_v3 = vld [vmem:[%s3495_s12 + $0x270] sm:$0xff] }
 0x3e8   :  { %1961 = vmatpush3.msra.mxu1 %v1071_v4 }
 0x3e9   :  { %1962 = vmatprep.subr.mxu1 %v1086_v5  ;;  %v1156_v5 = vld [vmem:[%s3495_s12 + $0x2e8] sm:$0xff] }
 0x3ea   :  { %1963 = vmatpush3.msra.mxu1 %v1070_v6 }
 0x3eb   :  { %1964 = vmatprep.subr.mxu1 %v1085_v7 }
 0x3ec   :  { %1965 = vmatpush3.msra.mxu1 %v1069_v8  ;;  %v1140_v8 = vld [vmem:[%s3495_s12 + $0x268] sm:$0xff] }
 0x3ed   :  { %1966 = vmatprep.subr.mxu1 %v1084_v9  ;;  %v1174_v9 = vld [vmem:[%s3495_s12 + $0x378] sm:$0xff] }
 0x3ee   :  { %1967 = vmatpush3.msra.mxu1 %v1068_v10 }
 0x3ef   :  { %1968 = vmatprep.subr.mxu1 %v1083_v11  ;;  %v1155_v11 = vld [vmem:[%s3495_s12 + $0x2e0] sm:$0xff] }
 0x3f0   :  { %1969 = vmatpush3.msra.mxu1 %v1067_v12  ;;  %v1189_v12 = vld [vmem:[%s3495_s12 + $0x3f0] sm:$0xff] }
 0x3f1   :  { %1970 = vmatprep.subr.mxu1 %v1082_v13  ;;  %v427_v13 = vrot.slane %v2831_v43, %v426_v1 }
 0x3f2   :  { %1971 = vmatpush3.msra.mxu1 %v1066_v14 }
 0x3f3   :  { %1972 = vmatprep.subr.mxu1 %v1081_v16  ;;  %v1173_v16 = vld [vmem:[%s3495_s12 + $0x370] sm:$0xff] }
 0x3f4   :  { %1973 = vmatpush3.msra.mxu1 %v1065_v18  ;;  %v1154_v18 = vld [vmem:[%s3495_s12 + $0x2d8] sm:$0xff] }
 0x3f5   :  { %1974 = vmatprep.subr.mxu1 %v1080_v20  ;;  %v1188_v20 = vld [vmem:[%s3495_s12 + $0x3e8] sm:$0xff] }
 0x3f6   :  { %1975 = vmatpush3.msra.mxu1 %v1064_v22 }
 0x3f7   :  { %1976 = vmatprep.subr.mxu1 %v1079_v24  ;;  %v1153_v24 = vld [vmem:[%s3495_s12 + $0x2d0] sm:$0xff] }
 0x3f8   :  { %1977 = vmatpush3.msra.mxu1 %v1063_v27  ;;  %v1137_v27 = vld [vmem:[%s3495_s12 + $0x250] sm:$0xff] }
 0x3f9   :  { %2016 = vmatprep.subr.mxu1 %v1158_v30  ;;  %v1152_v30 = vld [vmem:[%s3495_s12 + $0x2c8] sm:$0xff] }
 0x47d   :  { %v545_v49 = vpop.f32.mrf.mxu1 }
 0x47e   :  { %v546_v50 = vadd.f32 %v545_v49, %v399_v45  ;;  %v1135_v45 = vld [vmem:[%s3495_s12 + $0x240] sm:$0xff]  ;;  %v1150_v49 = vld [vmem:[%s3495_s12 + $0x2b8] sm:$0xff] }
 0x47f   :  { %v547_v51 = vpop.f32.mrf.mxu1 }
 0x480   :  { %v548_v53 = vadd.f32 %v547_v51, %v403_v47  ;;  %v1047_v57 = vmax.f32 %v546_v50, 0.0  ;;  %v1169_v47 = vld [vmem:[%s3495_s12 + $0x350] sm:$0xff]  ;;  %v1184_v50 = vld [vmem:[%s3495_s12 + $0x3c8] sm:$0xff]  ;;  %v1134_v51 = vld [vmem:[%s3495_s12 + $0x238] sm:$0xff] }
 0x481   :  { %v616_v0 = vpop.f32.mrf.mxu1 }
 0x482   :  { %v1048_v56 = vmax.f32 %v548_v53, 0.0  ;;  %v617_v58 = vadd.f32 %v616_v0, %v407_v52  ;;  %v1168_v52 = vld [vmem:[%s3495_s12 + $0x348] sm:$0xff]  ;;  %v1149_v53 = vld [vmem:[%s3495_s12 + $0x2b0] sm:$0xff] }
 0x483   :  { %v618_v59 = vpop.f32.mrf.mxu1  ;;  %v1133_v0 = vld [vmem:[%s3495_s12 + $0x230] sm:$0xff] }
 0x484   :  { %v619_v61 = vadd.f32 %v618_v59, %v411_v54  ;;  %1390 = vmatprep.mubr.f32.mxu1 %v1048_v56  ;;  %v1049_v6 = vmax.f32 %v617_v58, 0.0  ;;  %v1183_v54 = vld [vmem:[%s3495_s12 + $0x3c0] sm:$0xff]  ;;  %v1182_v58 = vld [vmem:[%s3495_s12 + $0x3b8] sm:$0xff] }
 0x485   :  { %v2859_v2 = vpop.f32.mrf.mxu1  ;;  %1391 = vmatmul.mubr.f32.vlgmr.msra.gmra.mxu1 %v1047_v57  ;;  %v1167_v56 = vld [vmem:[%s3495_s12 + $0x340] sm:$0xff]  ;;  %v1148_v57 = vld [vmem:[%s3495_s12 + $0x2a8] sm:$0xff] }
 0x486   :  { %v1050_v4 = vmax.f32 %v619_v61, 0.0  ;;  %2017 = vmatpush3.msra.mxu1 %v1142_v60  ;;  %v1132_v60 = vld [vmem:[%s3495_s12 + $0x228] sm:$0xff]  ;;  %v1166_v61 = vld [vmem:[%s3495_s12 + $0x338] sm:$0xff] }
 0x487   :  { %2018 = vmatprep.subr.mxu1 %v1157_v62  ;;  %v689_v7 = vpop.f32.mrf.mxu1  ;;  %v1147_v62 = vld [vmem:[%s3495_s12 + $0x2a0] sm:$0xff] }
 0x488   :  { %v690_v10 = vadd.f32 %v689_v7, %v419_v63  ;;  %2019 = vmatpush3.msra.mxu1 %v1141_v3  ;;  %1460 = vmatprep.mubr.f32.mxu0 %v1050_v4  ;;  %v1181_v63 = vld [vmem:[%s3495_s12 + $0x3b0] sm:$0xff]  ;;  %v1131_v3 = vld [vmem:[%s3495_s12 + $0x220] sm:$0xff]  ;;  %v415_v7 = vrot.slane %v2831_v43, %v414_v37 }
 0x489   :  { %2020 = vmatprep.subr.mxu1 %v1156_v5  ;;  %v2882_v14 = vpop.f32.mrf.mxu1  ;;  %1461 = vmatmul.mubr.f32.vlgmr.msra.gmra.mxu0 %v1049_v6  ;;  %v1165_v4 = vld [vmem:[%s3495_s12 + $0x330] sm:$0xff]  ;;  %v1146_v5 = vld [vmem:[%s3495_s12 + $0x298] sm:$0xff]  ;;  %v1180_v6 = vld [vmem:[%s3495_s12 + $0x3a8] sm:$0xff] }
 0x48a   :  { %v1052_v17 = vmax.f32 %v690_v10, 0.0  ;;  %2021 = vmatpush3.msra.mxu1 %v1140_v8  ;;  %2052 = vmatpush3.msra.mxu0 %v1174_v9  ;;  %v1130_v9 = vld [vmem:[%s3495_s12 + $0x218] sm:$0xff]  ;;  %v1164_v10 = vld [vmem:[%s3495_s12 + $0x328] sm:$0xff]  ;;  %v1179_v37 = vld [vmem:[%s3495_s12 + $0x3a0] sm:$0xff] }
 0x48b   :  { %2022 = vmatprep.subr.mxu1 %v1155_v11  ;;  %2053 = vmatprep.subr.mxu0 %v1189_v12  ;;  %v760_v19 = vpop.f32.mrf.mxu1  ;;  %v1145_v11 = vld [vmem:[%s3495_s12 + $0x290] sm:$0xff]  ;;  %v435_v12 = vrot.slane %v2814_v38, %v402_v44  ;;  %v1178_v44 = vld [vmem:[%s3495_s12 + $0x398] sm:$0xff] }
 0x48c   :  { %v761_v22 = vadd.f32 %v760_v19, %v427_v13  ;;  %2023 = vmatpush3.msra.mxu1 %v1139_v15  ;;  %2054 = vmatpush3.msra.mxu0 %v1173_v16  ;;  %v1129_v13 = vld [vmem:[%s3495_s12 + $0x210] sm:$0xff]  ;;  %v1163_v15 = vld [vmem:[%s3495_s12 + $0x320] sm:$0xff]  ;;  %v1144_v16 = vld [vmem:[%s3495_s12 + $0x288] sm:$0xff] }
 0x48d   :  { %2024 = vmatprep.subr.mxu1 %v1154_v18  ;;  %1530 = vmatprep.mubr.f32.mxu1 %v1052_v17  ;;  %v2968_v59 = vpop.f32.mrf.mxu1  ;;  %v688_v17 = vadd.f32 %v2859_v2, %v415_v7  ;;  %v1128_v19 = vld [vmem:[%s3495_s12 + $0x208] sm:$0xff]  ;;  %v1143_v2 = vld [vmem:[%s3495_s12 + $0x280] sm:$0xff]  ;;  %v1250_v7 = vld [vmem:[%s3495_s12 + $0x5d8] sm:$0xff] }
 0x48e   :  { %v1054_v28 = vmax.f32 %v761_v22, 0.0  ;;  %2055 = vmatprep.subr.mxu0 %v1188_v20  ;;  %2025 = vmatpush3.msra.mxu1 %v1138_v21  ;;  %v1162_v20 = vld [vmem:[%s3495_s12 + $0x318] sm:$0xff]  ;;  %v423_v21 = vrot.slane %v2831_v43, %v422_v40  ;;  %v1177_v22 = vld [vmem:[%s3495_s12 + $0x390] sm:$0xff]  ;;  %v443_v43 = vrot.slane %v2814_v38, %v410_v48 }
 0x48f   :  { %2056 = vmatpush3.msra.mxu0 %v1172_v23  ;;  %2026 = vmatprep.subr.mxu1 %v1153_v24  ;;  %v831_v8 = vpop.f32.mrf.mxu1  ;;  %v1127_v24 = vld [vmem:[%s3495_s12 + $0x200] sm:$0xff]  ;;  %v1161_v40 = vld [vmem:[%s3495_s12 + $0x310] sm:$0xff] }
 0x490   :  { %2057 = vmatprep.subr.mxu0 %v1187_v26  ;;  %2027 = vmatpush3.msra.mxu1 %v1137_v27  ;;  %v832_v23 = vadd.f32 %v831_v8, %v435_v12  ;;  %v1176_v26 = vld [vmem:[%s3495_s12 + $0x388] sm:$0xff]  ;;  %v1051_v27 = vmax.f32 %v688_v17, 0.0  ;;  %v759_v48 = vadd.f32 %v2882_v14, %v423_v21  ;;  %v1159_v14 = vld [vmem:[%s3495_s12 + $0x300] sm:$0xff]  ;;  %v1233_v12 = vld [vmem:[%s3495_s12 + $0x550] sm:$0xff] }
 0x491   :  { %2058 = vmatpush3.msra.mxu0 %v1171_v29  ;;  %2028 = vmatprep.subr.mxu1 %v1152_v30  ;;  %v3025_v18 = vpop.f32.mrf.mxu1  ;;  %v1222_v29 = vld [vmem:[%s3495_s12 + $0x4f8] sm:$0xff]  ;;  %v1160_v30 = vld [vmem:[%s3495_s12 + $0x308] sm:$0xff]  ;;  %v1213_v17 = vld [vmem:[%s3495_s12 + $0x4b0] sm:$0xff] }
 0x492   :  { %2059 = vmatprep.subr.mxu0 %v1186_v31  ;;  %1600 = vmatprep.mubr.f32.mxu0 %v1054_v28  ;;  %v1206_v31 = vld [vmem:[%s3495_s12 + $0x478] sm:$0xff]  ;;  %v1200_v8 = vld [vmem:[%s3495_s12 + $0x448] sm:$0xff]  ;;  %v1231_v21 = vld [vmem:[%s3495_s12 + $0x540] sm:$0xff] }
 0x493   :  { %2029 = vmatpush3.msra.mxu1 %v1136_v32  ;;  %2060 = vmatpush3.msra.mxu0 %v1170_v33  ;;  %v902_v28 = vpop.f32.mrf.mxu1  ;;  %v1056_v32 = vmax.f32 %v832_v23, 0.0  ;;  %v1175_v33 = vld [vmem:[%s3495_s12 + $0x380] sm:$0xff] }
 0x494   :  { %2030 = vmatprep.subr.mxu1 %v1151_v34  ;;  %2061 = vmatprep.subr.mxu0 %v1185_v35  ;;  %v1221_v34 = vld [vmem:[%s3495_s12 + $0x4f0] sm:$0xff]  ;;  %v903_v35 = vadd.f32 %v902_v28, %v443_v43  ;;  %v1211_v43 = vld [vmem:[%s3495_s12 + $0x4a0] sm:$0xff] }
 0x495   :  { %2031 = vmatpush3.msra.mxu1 %v1135_v45  ;;  %2062 = vmatpush3.msra.mxu0 %v1169_v47  ;;  %v1205_v45 = vld [vmem:[%s3495_s12 + $0x470] sm:$0xff]  ;;  %v1220_v47 = vld [vmem:[%s3495_s12 + $0x4e8] sm:$0xff]  ;;  %v3178_v23 = vpop.f32.mrf.mxu1 }
 0x496   :  { %2032 = vmatprep.subr.mxu1 %v1150_v49  ;;  %2063 = vmatprep.subr.mxu0 %v1184_v50  ;;  %v1053_v49 = vmax.f32 %v759_v48, 0.0  ;;  %v1254_v50 = vld [vmem:[%s3495_s12 + $0x5f8] sm:$0xff]  ;;  %v1229_v28 = vld [vmem:[%s3495_s12 + $0x530] sm:$0xff]  ;;  %v431_v48 = vrot.slane %v2814_v38, %v398_v42  ;;  %v1243_v42 = vld [vmem:[%s3495_s12 + $0x5a0] sm:$0xff] }
 0x497   :  { %2033 = vmatpush3.msra.mxu1 %v1134_v51  ;;  %2064 = vmatpush3.msra.mxu0 %v1168_v52  ;;  %v1204_v51 = vld [vmem:[%s3495_s12 + $0x468] sm:$0xff]  ;;  %v1238_v52 = vld [vmem:[%s3495_s12 + $0x578] sm:$0xff] }
 0x498   :  { %2034 = vmatprep.subr.mxu1 %v1149_v53  ;;  %2065 = vmatprep.subr.mxu0 %v1183_v54  ;;  %v1058_v53 = vmax.f32 %v903_v35, 0.0  ;;  %v1219_v54 = vld [vmem:[%s3495_s12 + $0x4e0] sm:$0xff]  ;;  %v451_v35 = vrot.slane %v2814_v38, %v418_v55  ;;  %v1242_v55 = vld [vmem:[%s3495_s12 + $0x598] sm:$0xff] }
 0x499   :  { %2035 = vmatpush3.msra.mxu1 %v1133_v0  ;;  %2066 = vmatpush3.msra.mxu0 %v1167_v56  ;;  %v1253_v0 = vld [vmem:[%s3495_s12 + $0x5f0] sm:$0xff]  ;;  %v1203_v56 = vld [vmem:[%s3495_s12 + $0x460] sm:$0xff] }
 0x49a   :  { %2036 = vmatprep.subr.mxu1 %v1148_v57  ;;  %2067 = vmatprep.subr.mxu0 %v1182_v58  ;;  %v1237_v57 = vld [vmem:[%s3495_s12 + $0x570] sm:$0xff]  ;;  %v1218_v58 = vld [vmem:[%s3495_s12 + $0x4d8] sm:$0xff] }
 0x49b   :  { %2037 = vmatpush3.msra.mxu1 %v1132_v60  ;;  %2068 = vmatpush3.msra.mxu0 %v1166_v61  ;;  %v1252_v60 = vld [vmem:[%s3495_s12 + $0x5e8] sm:$0xff]  ;;  %v1202_v61 = vld [vmem:[%s3495_s12 + $0x458] sm:$0xff] }
 0x49c   :  { %2038 = vmatprep.subr.mxu1 %v1147_v62  ;;  %2069 = vmatprep.subr.mxu0 %v1181_v63  ;;  %v1236_v62 = vld [vmem:[%s3495_s12 + $0x568] sm:$0xff]  ;;  %v1217_v63 = vld [vmem:[%s3495_s12 + $0x4d0] sm:$0xff] }
 0x49d   :  { %2039 = vmatpush3.msra.mxu1 %v1131_v3  ;;  %2070 = vmatpush3.msra.mxu0 %v1165_v4  ;;  %v1251_v3 = vld [vmem:[%s3495_s12 + $0x5e0] sm:$0xff]  ;;  %v1201_v4 = vld [vmem:[%s3495_s12 + $0x450] sm:$0xff] }
 0x49e   :  { %2040 = vmatprep.subr.mxu1 %v1146_v5  ;;  %2071 = vmatprep.subr.mxu0 %v1180_v6  ;;  %v1235_v5 = vld [vmem:[%s3495_s12 + $0x560] sm:$0xff]  ;;  %v1216_v6 = vld [vmem:[%s3495_s12 + $0x4c8] sm:$0xff] }
 0x49f   :  { %2041 = vmatpush3.msra.mxu1 %v1130_v9  ;;  %2072 = vmatpush3.msra.mxu0 %v1164_v10  ;;  %v1234_v9 = vld [vmem:[%s3495_s12 + $0x558] sm:$0xff]  ;;  %v1215_v10 = vld [vmem:[%s3495_s12 + $0x4c0] sm:$0xff] }
 0x4a0   :  { %2042 = vmatprep.subr.mxu1 %v1145_v11  ;;  %2073 = vmatprep.subr.mxu0 %v1179_v37  ;;  %v1249_v11 = vld [vmem:[%s3495_s12 + $0x5d0] sm:$0xff]  ;;  %v1199_v37 = vld [vmem:[%s3495_s12 + $0x440] sm:$0xff] }
 0x4a1   :  { %2043 = vmatpush3.msra.mxu1 %v1129_v13  ;;  %2074 = vmatpush3.msra.mxu0 %v1163_v15  ;;  %v1214_v13 = vld [vmem:[%s3495_s12 + $0x4b8] sm:$0xff]  ;;  %v1248_v15 = vld [vmem:[%s3495_s12 + $0x5c8] sm:$0xff] }
 0x4a2   :  { %2044 = vmatprep.subr.mxu1 %v1144_v16  ;;  %2075 = vmatprep.subr.mxu0 %v1178_v44  ;;  %v1198_v16 = vld [vmem:[%s3495_s12 + $0x438] sm:$0xff]  ;;  %v1232_v44 = vld [vmem:[%s3495_s12 + $0x548] sm:$0xff] }
 0x4a3   :  { %2045 = vmatpush3.msra.mxu1 %v1128_v19  ;;  %2076 = vmatpush3.msra.mxu0 %v1162_v20  ;;  %v1247_v19 = vld [vmem:[%s3495_s12 + $0x5c0] sm:$0xff]  ;;  %v1197_v20 = vld [vmem:[%s3495_s12 + $0x430] sm:$0xff] }
 0x4a4   :  { %2046 = vmatprep.subr.mxu1 %v1143_v2  ;;  %2077 = vmatprep.subr.mxu0 %v1177_v22  ;;  %v1212_v2 = vld [vmem:[%s3495_s12 + $0x4a8] sm:$0xff]  ;;  %v1246_v22 = vld [vmem:[%s3495_s12 + $0x5b8] sm:$0xff] }
 0x4a5   :  { %2047 = vmatpush3.msra.mxu1 %v1127_v24  ;;  %2078 = vmatpush3.msra.mxu0 %v1161_v40  ;;  %v1196_v24 = vld [vmem:[%s3495_s12 + $0x428] sm:$0xff]  ;;  %v1230_v40 = vld [vmem:[%s3495_s12 + $0x538] sm:$0xff] }
 0x4a6   :  { %1531 = vmatmul.mubr.f32.vlgmr.msra.gmra.mxu1 %v1051_v27  ;;  %2079 = vmatprep.subr.mxu0 %v1176_v26  ;;  %v1245_v26 = vld [vmem:[%s3495_s12 + $0x5b0] sm:$0xff]  ;;  %v1195_v27 = vld [vmem:[%s3495_s12 + $0x420] sm:$0xff] }
 0x4a7   :  { %2086 = vmatprep.subr.mxu1 %v1222_v29  ;;  %2080 = vmatpush3.msra.mxu0 %v1160_v30  ;;  %v1210_v29 = vld [vmem:[%s3495_s12 + $0x498] sm:$0xff]  ;;  %v1244_v30 = vld [vmem:[%s3495_s12 + $0x5a8] sm:$0xff] }
 0x4a8   :  { %2087 = vmatpush3.msra.mxu1 %v1206_v31  ;;  %1670 = vmatprep.mubr.f32.mxu1 %v1056_v32  ;;  %v973_v31 = vpop.f32.mrf.mxu1  ;;  %v1194_v32 = vld [vmem:[%s3495_s12 + $0x418] sm:$0xff] }
 0x4a9   :  { %2081 = vmatprep.subr.mxu0 %v1175_v33  ;;  %2088 = vmatprep.subr.mxu1 %v1221_v34  ;;  %v1228_v33 = vld [vmem:[%s3495_s12 + $0x528] sm:$0xff]  ;;  %v1209_v34 = vld [vmem:[%s3495_s12 + $0x490] sm:$0xff] }
 0x4aa   :  { %2082 = vmatpush3.msra.mxu0 %v1159_v14  ;;  %2089 = vmatpush3.msra.mxu1 %v1205_v45  ;;  %v1193_v14 = vld [vmem:[%s3495_s12 + $0x410] sm:$0xff]  ;;  %v1227_v45 = vld [vmem:[%s3495_s12 + $0x520] sm:$0xff] }
 0x4ab   :  { %1601 = vmatmul.mubr.f32.vlgmr.msra.gmra.mxu0 %v1053_v49  ;;  %2090 = vmatprep.subr.mxu1 %v1220_v47  ;;  %v1208_v47 = vld [vmem:[%s3495_s12 + $0x488] sm:$0xff]  ;;  %v830_v49 = vadd.f32 %v2968_v59, %v431_v48  ;;  %v1207_v59 = vld [vmem:[%s3495_s12 + $0x480] sm:$0xff]  ;;  %v1297_v48 = vld [vmem:[%s3495_s12 + $0x750] sm:$0xff] }
 0x4ac   :  { %2121 = vmatprep.subr.mxu0 %v1254_v50  ;;  %2091 = vmatpush3.msra.mxu1 %v1204_v51  ;;  %v3235_v50 = vpop.f32.mrf.mxu1  ;;  %v1192_v51 = vld [vmem:[%s3495_s12 + $0x408] sm:$0xff] }
 0x4ad   :  { %2122 = vmatpush3.msra.mxu0 %v1238_v52  ;;  %1740 = vmatprep.mubr.f32.mxu0 %v1058_v53  ;;  %v1226_v52 = vld [vmem:[%s3495_s12 + $0x518] sm:$0xff]  ;;  %v439_v53 = vrot.slane %v2814_v38, %v406_v46  ;;  %v1225_v46 = vld [vmem:[%s3495_s12 + $0x510] sm:$0xff] }
 0x4ae   :  { %2092 = vmatprep.subr.mxu1 %v1219_v54  ;;  %2123 = vmatprep.subr.mxu0 %v1253_v0  ;;  %v1241_v54 = vld [vmem:[%s3495_s12 + $0x590] sm:$0xff]  ;;  %v974_v0 = vadd.f32 %v973_v31, %v451_v35  ;;  %v1278_v31 = vld [vmem:[%s3495_s12 + $0x6b8] sm:$0xff]  ;;  %v1311_v35 = vld [vmem:[%s3495_s12 + $0x7c0] sm:$0xff] }
 0x4af   :  { %2093 = vmatpush3.msra.mxu1 %v1203_v56  ;;  %2124 = vmatpush3.msra.mxu0 %v1237_v57  ;;  %v1191_v56 = vld [vmem:[%s3495_s12 + $0x400] sm:$0xff]  ;;  %v459_v57 = vrot.slane %v2814_v38, %v426_v1  ;;  %v901_v38 = vadd.f32 %v3025_v18, %v439_v53  ;;  %v1270_v1 = vld [vmem:[%s3495_s12 + $0x678] sm:$0xff]  ;;  %v1309_v53 = vld [vmem:[%s3495_s12 + $0x7b0] sm:$0xff] }
 0x4b0   :  { %2094 = vmatprep.subr.mxu1 %v1218_v58  ;;  %2125 = vmatprep.subr.mxu0 %v1252_v60  ;;  %v1240_v58 = vld [vmem:[%s3495_s12 + $0x588] sm:$0xff]  ;;  %v1055_v60 = vmax.f32 %v830_v49, 0.0  ;;  %v1223_v18 = vld [vmem:[%s3495_s12 + $0x500] sm:$0xff] }
 0x4b1   :  { %2095 = vmatpush3.msra.mxu1 %v1202_v61  ;;  %2126 = vmatpush3.msra.mxu0 %v1236_v62  ;;  %v1044_v61 = vpop.f32.mrf.mxu1  ;;  %v1286_v62 = vld [vmem:[%s3495_s12 + $0x6f8] sm:$0xff]  ;;  %v1260_v49 = vld [vmem:[%s3495_s12 + $0x628] sm:$0xff] }
 0x4b2   :  { %2096 = vmatprep.subr.mxu1 %v1217_v63  ;;  %2127 = vmatprep.subr.mxu0 %v1251_v3  ;;  %v1060_v63 = vmax.f32 %v974_v0, 0.0  ;;  %v1239_v3 = vld [vmem:[%s3495_s12 + $0x580] sm:$0xff]  ;;  %v1274_v0 = vld [vmem:[%s3495_s12 + $0x698] sm:$0xff] }
 0x4b3   :  { %2097 = vmatpush3.msra.mxu1 %v1201_v4  ;;  %2128 = vmatpush3.msra.mxu0 %v1235_v5  ;;  %v1285_v4 = vld [vmem:[%s3495_s12 + $0x6f0] sm:$0xff]  ;;  %v1045_v5 = vadd.f32 %v1044_v61, %v459_v57  ;;  %v1292_v57 = vld [vmem:[%s3495_s12 + $0x728] sm:$0xff] }
 0x4b4   :  { %2098 = vmatprep.subr.mxu1 %v1216_v6  ;;  %2129 = vmatprep.subr.mxu0 %v1250_v7  ;;  %v1269_v6 = vld [vmem:[%s3495_s12 + $0x670] sm:$0xff]  ;;  %v1284_v7 = vld [vmem:[%s3495_s12 + $0x6e8] sm:$0xff] }
 0x4b5   :  { %2099 = vmatpush3.msra.mxu1 %v1200_v8  ;;  %2130 = vmatpush3.msra.mxu0 %v1234_v9  ;;  %v1057_v8 = vmax.f32 %v901_v38, 0.0  ;;  %v1318_v9 = vld [vmem:[%s3495_s12 + $0x7f8] sm:$0xff]  ;;  %v1257_v61 = vld [vmem:[%s3495_s12 + $0x610] sm:$0xff] }
 0x4b6   :  { %2100 = vmatprep.subr.mxu1 %v1215_v10  ;;  %2131 = vmatprep.subr.mxu0 %v1249_v11  ;;  %v1268_v10 = vld [vmem:[%s3495_s12 + $0x668] sm:$0xff]  ;;  %v1302_v11 = vld [vmem:[%s3495_s12 + $0x778] sm:$0xff] }
 0x4b7   :  { %2101 = vmatpush3.msra.mxu1 %v1199_v37  ;;  %2132 = vmatpush3.msra.mxu0 %v1233_v12  ;;  %v1062_v37 = vmax.f32 %v1045_v5, 0.0  ;;  %v1283_v12 = vld [vmem:[%s3495_s12 + $0x6e0] sm:$0xff]  ;;  %v1306_v38 = vld [vmem:[%s3495_s12 + $0x798] sm:$0xff]  ;;  %v1289_v5 = vld [vmem:[%s3495_s12 + $0x710] sm:$0xff] }
 0x4b8   :  { %2102 = vmatprep.subr.mxu1 %v1214_v13  ;;  %2133 = vmatprep.subr.mxu0 %v1248_v15  ;;  %v1317_v13 = vld [vmem:[%s3495_s12 + $0x7f0] sm:$0xff]  ;;  %v1267_v15 = vld [vmem:[%s3495_s12 + $0x660] sm:$0xff] }
 0x4b9   :  { %2103 = vmatpush3.msra.mxu1 %v1198_v16  ;;  %2134 = vmatpush3.msra.mxu0 %v1232_v44  ;;  %v1301_v16 = vld [vmem:[%s3495_s12 + $0x770] sm:$0xff]  ;;  %v1282_v44 = vld [vmem:[%s3495_s12 + $0x6d8] sm:$0xff] }
 0x4ba   :  { %2104 = vmatprep.subr.mxu1 %v1213_v17  ;;  %2135 = vmatprep.subr.mxu0 %v1247_v19  ;;  %v1316_v17 = vld [vmem:[%s3495_s12 + $0x7e8] sm:$0xff]  ;;  %v1266_v19 = vld [vmem:[%s3495_s12 + $0x658] sm:$0xff] }
 0x4bb   :  { %2105 = vmatpush3.msra.mxu1 %v1197_v20  ;;  %2136 = vmatpush3.msra.mxu0 %v1231_v21  ;;  %v1300_v20 = vld [vmem:[%s3495_s12 + $0x768] sm:$0xff]  ;;  %v1281_v21 = vld [vmem:[%s3495_s12 + $0x6d0] sm:$0xff] }
 0x4bc   :  { %2106 = vmatprep.subr.mxu1 %v1212_v2  ;;  %2137 = vmatprep.subr.mxu0 %v1246_v22  ;;  %v1315_v2 = vld [vmem:[%s3495_s12 + $0x7e0] sm:$0xff]  ;;  %v1265_v22 = vld [vmem:[%s3495_s12 + $0x650] sm:$0xff] }
 0x4bd   :  { %2107 = vmatpush3.msra.mxu1 %v1196_v24  ;;  %2138 = vmatpush3.msra.mxu0 %v1230_v40  ;;  %v1299_v24 = vld [vmem:[%s3495_s12 + $0x760] sm:$0xff]  ;;  %v1280_v40 = vld [vmem:[%s3495_s12 + $0x6c8] sm:$0xff] }
 0x4be   :  { %2108 = vmatprep.subr.mxu1 %v1211_v43  ;;  %2139 = vmatprep.subr.mxu0 %v1245_v26  ;;  %v1314_v43 = vld [vmem:[%s3495_s12 + $0x7d8] sm:$0xff]  ;;  %v1264_v26 = vld [vmem:[%s3495_s12 + $0x648] sm:$0xff] }
 0x4bf   :  { %2109 = vmatpush3.msra.mxu1 %v1195_v27  ;;  %2140 = vmatpush3.msra.mxu0 %v1229_v28  ;;  %v1298_v27 = vld [vmem:[%s3495_s12 + $0x758] sm:$0xff]  ;;  %v1279_v28 = vld [vmem:[%s3495_s12 + $0x6c0] sm:$0xff] }
 0x4c0   :  { %2110 = vmatprep.subr.mxu1 %v1210_v29  ;;  %2141 = vmatprep.subr.mxu0 %v1244_v30  ;;  %v1313_v29 = vld [vmem:[%s3495_s12 + $0x7d0] sm:$0xff]  ;;  %v1263_v30 = vld [vmem:[%s3495_s12 + $0x640] sm:$0xff] }
 0x4c1   :  { %2111 = vmatpush3.msra.mxu1 %v1194_v32  ;;  %2142 = vmatpush3.msra.mxu0 %v1228_v33  ;;  %v1312_v32 = vld [vmem:[%s3495_s12 + $0x7c8] sm:$0xff]  ;;  %v1262_v33 = vld [vmem:[%s3495_s12 + $0x638] sm:$0xff] }
 0x4c2   :  { %2112 = vmatprep.subr.mxu1 %v1209_v34  ;;  %2143 = vmatprep.subr.mxu0 %v1243_v42  ;;  %v1296_v34 = vld [vmem:[%s3495_s12 + $0x748] sm:$0xff]  ;;  %v1277_v42 = vld [vmem:[%s3495_s12 + $0x6b0] sm:$0xff] }
 0x4c3   :  { %2113 = vmatpush3.msra.mxu1 %v1193_v14  ;;  %2144 = vmatpush3.msra.mxu0 %v1227_v45  ;;  %v1261_v14 = vld [vmem:[%s3495_s12 + $0x630] sm:$0xff]  ;;  %v1295_v45 = vld [vmem:[%s3495_s12 + $0x740] sm:$0xff] }
 0x4c4   :  { %2114 = vmatprep.subr.mxu1 %v1208_v47  ;;  %2145 = vmatprep.subr.mxu0 %v1242_v55  ;;  %v1276_v47 = vld [vmem:[%s3495_s12 + $0x6a8] sm:$0xff]  ;;  %v1310_v55 = vld [vmem:[%s3495_s12 + $0x7b8] sm:$0xff] }
 0x4c5   :  { %2115 = vmatpush3.msra.mxu1 %v1192_v51  ;;  %2146 = vmatpush3.msra.mxu0 %v1226_v52  ;;  %v1294_v51 = vld [vmem:[%s3495_s12 + $0x738] sm:$0xff]  ;;  %v1275_v52 = vld [vmem:[%s3495_s12 + $0x6a0] sm:$0xff] }
 0x4c6   :  { %2116 = vmatprep.subr.mxu1 %v1207_v59  ;;  %2147 = vmatprep.subr.mxu0 %v1241_v54  ;;  %v1259_v59 = vld [vmem:[%s3495_s12 + $0x620] sm:$0xff]  ;;  %v1293_v54 = vld [vmem:[%s3495_s12 + $0x730] sm:$0xff] }
 0x4c7   :  { %2117 = vmatpush3.msra.mxu1 %v1191_v56  ;;  %2148 = vmatpush3.msra.mxu0 %v1225_v46  ;;  %v1308_v56 = vld [vmem:[%s3495_s12 + $0x7a8] sm:$0xff]  ;;  %v1258_v46 = vld [vmem:[%s3495_s12 + $0x618] sm:$0xff] }
 0x4c8   :  { %1671 = vmatmul.mubr.f32.vlgmr.msra.gmra.mxu1 %v1055_v60  ;;  %2149 = vmatprep.subr.mxu0 %v1240_v58  ;;  %v1273_v58 = vld [vmem:[%s3495_s12 + $0x690] sm:$0xff]  ;;  %v1307_v60 = vld [vmem:[%s3495_s12 + $0x7a0] sm:$0xff] }
 0x4c9   :  { %2156 = vmatprep.subr.mxu1 %v1286_v62  ;;  %2150 = vmatpush3.msra.mxu0 %v1224_v36  ;;  %v1291_v62 = vld [vmem:[%s3495_s12 + $0x720] sm:$0xff]  ;;  %v1272_v36 = vld [vmem:[%s3495_s12 + $0x688] sm:$0xff] }
 0x4ca   :  { %2157 = vmatpush3.msra.mxu1 %v1270_v1  ;;  %1810 = vmatprep.mubr.f32.mxu1 %v1060_v63  ;;  %v972_v1 = vadd.f32 %v3178_v23, %v2819_v39  ;;  %v1256_v63 = vld [vmem:[%s3495_s12 + $0x608] sm:$0xff]  ;;  %v1305_v39 = vld [vmem:[%s3495_s12 + $0x790] sm:$0xff]  ;;  %v1255_v23 = vld [vmem:[%s3495_s12 + $0x600] sm:$0xff] }
 0x4cb   :  { %2151 = vmatprep.subr.mxu0 %v1239_v3  ;;  %2158 = vmatprep.subr.mxu1 %v1285_v4  ;;  %v1290_v3 = vld [vmem:[%s3495_s12 + $0x718] sm:$0xff]  ;;  %v1271_v4 = vld [vmem:[%s3495_s12 + $0x680] sm:$0xff] }
 0x4cc   :  { %2152 = vmatpush3.msra.mxu0 %v1223_v18  ;;  %2159 = vmatpush3.msra.mxu1 %v1269_v6  ;;  %v1304_v18 = vld [vmem:[%s3495_s12 + $0x788] sm:$0xff]  ;;  %v1059_v6 = vmax.f32 %v972_v1, 0.0 }
 0x4cd   :  { %1741 = vmatmul.mubr.f32.vlgmr.msra.gmra.mxu0 %v1057_v8  ;;  %2160 = vmatprep.subr.mxu1 %v1284_v7  ;;  %v1043_v7 = vadd.f32 %v3235_v50, %v2825_v41  ;;  %v1288_v8 = vld [vmem:[%s3495_s12 + $0x708] sm:$0xff] }
 0x4ce   :  { %2191 = vmatprep.subr.mxu0 %v1318_v9  ;;  %2161 = vmatpush3.msra.mxu1 %v1268_v10  ;;  %v1303_v9 = vld [vmem:[%s3495_s12 + $0x780] sm:$0xff] }
 0x4cf   :  { %2192 = vmatpush3.msra.mxu0 %v1302_v11  ;;  %1880 = vmatprep.mubr.f32.mxu0 %v1062_v37  ;;  %v1287_v10 = vld [vmem:[%s3495_s12 + $0x700] sm:$0xff]  ;;  %v1061_v41 = vmax.f32 %v1043_v7, 0.0 }
 0x4d0   :  { %2162 = vmatprep.subr.mxu1 %v1283_v12  ;;  %2193 = vmatprep.subr.mxu0 %v1317_v13 }
 0x4d1   :  { %2163 = vmatpush3.msra.mxu1 %v1267_v15  ;;  %2194 = vmatpush3.msra.mxu0 %v1301_v16 }
 0x4d2   :  { %2164 = vmatprep.subr.mxu1 %v1282_v44  ;;  %2195 = vmatprep.subr.mxu0 %v1316_v17  ;;  %v1937_v17 = vld [vmem:[%s3499_s13] ss:$0 sm:$0xff] }
 0x4d3   :  { %2165 = vmatpush3.msra.mxu1 %v1266_v19  ;;  %2196 = vmatpush3.msra.mxu0 %v1300_v20 }
 0x4d4   :  { %2166 = vmatprep.subr.mxu1 %v1281_v21  ;;  %2197 = vmatprep.subr.mxu0 %v1315_v2 }
 0x4d5   :  { %2167 = vmatpush3.msra.mxu1 %v1265_v22  ;;  %2198 = vmatpush3.msra.mxu0 %v1299_v24 }
 0x4d6   :  { %2168 = vmatprep.subr.mxu1 %v1280_v40  ;;  %2199 = vmatprep.subr.mxu0 %v1314_v43 }
 0x4d7   :  { %2169 = vmatpush3.msra.mxu1 %v1264_v26  ;;  %2200 = vmatpush3.msra.mxu0 %v1298_v27 }
 0x4d8   :  { %2170 = vmatprep.subr.mxu1 %v1279_v28  ;;  %2201 = vmatprep.subr.mxu0 %v1313_v29 }
 0x4d9   :  { %2171 = vmatpush3.msra.mxu1 %v1263_v30  ;;  %2202 = vmatpush3.msra.mxu0 %v1297_v48 }
 0x4da   :  { %2172 = vmatprep.subr.mxu1 %v1278_v31  ;;  %2203 = vmatprep.subr.mxu0 %v1312_v32 }
 0x4db   :  { %2173 = vmatpush3.msra.mxu1 %v1262_v33  ;;  %2204 = vmatpush3.msra.mxu0 %v1296_v34 }
 0x4dc   :  { %2174 = vmatprep.subr.mxu1 %v1277_v42  ;;  %2205 = vmatprep.subr.mxu0 %v1311_v35 }
 0x4dd   :  { %2175 = vmatpush3.msra.mxu1 %v1261_v14  ;;  %2206 = vmatpush3.msra.mxu0 %v1295_v45 }
 0x4de   :  { %2176 = vmatprep.subr.mxu1 %v1276_v47  ;;  %2207 = vmatprep.subr.mxu0 %v1310_v55 }
 0x4df   :  { %2177 = vmatpush3.msra.mxu1 %v1260_v49  ;;  %2208 = vmatpush3.msra.mxu0 %v1294_v51 }
 0x4e0   :  { %2178 = vmatprep.subr.mxu1 %v1275_v52  ;;  %2209 = vmatprep.subr.mxu0 %v1309_v53 }
 0x4e1   :  { %2179 = vmatpush3.msra.mxu1 %v1259_v59  ;;  %2210 = vmatpush3.msra.mxu0 %v1293_v54 }
 0x4e2   :  { %2180 = vmatprep.subr.mxu1 %v1274_v0  ;;  %2211 = vmatprep.subr.mxu0 %v1308_v56 }
 0x4e3   :  { %2181 = vmatpush3.msra.mxu1 %v1258_v46  ;;  %2212 = vmatpush3.msra.mxu0 %v1292_v57 }
 0x4e4   :  { %2182 = vmatprep.subr.mxu1 %v1273_v58  ;;  %2213 = vmatprep.subr.mxu0 %v1307_v60  ;;  %v1938_v60 = vld [vmem:[%s3500_s14] ss:$0 sm:$0xff] }
 0x4e5   :  { %2183 = vmatpush3.msra.mxu1 %v1257_v61  ;;  %2214 = vmatpush3.msra.mxu0 %v1291_v62  ;;  %v1939_v61 = vld [vmem:[%s3501_s15] ss:$0 sm:$0xff] }
 0x4e6   :  { %2184 = vmatprep.subr.mxu1 %v1272_v36  ;;  %2215 = vmatprep.subr.mxu0 %v1306_v38 }
 0x4e7   :  { %2185 = vmatpush3.msra.mxu1 %v1256_v63  ;;  %2216 = vmatpush3.msra.mxu0 %v1290_v3 }
 0x4e8   :  { %2186 = vmatprep.subr.mxu1 %v1271_v4  ;;  %2217 = vmatprep.subr.mxu0 %v1305_v39 }
 0x4e9   :  { %2187 = vmatpush3.msra.mxu1 %v1255_v23  ;;  %2218 = vmatpush3.msra.mxu0 %v1289_v5 }
 0x4ea   :  { %1811 = vmatmul.mubr.f32.vlgmr.msra.gmra.mxu1 %v1059_v6  ;;  %2219 = vmatprep.subr.mxu0 %v1304_v18 }
 0x4eb   :  { %2220 = vmatpush3.msra.mxu0 %v1288_v8 }
 0x4ec   :  { %2221 = vmatprep.subr.mxu0 %v1303_v9 }
 0x4ed   :  { %2222 = vmatpush3.msra.mxu0 %v1287_v10 }
 0x4ee   :  { %1881 = vmatmul.mubr.f32.vlgmr.msra.gmra.mxu0 %v1061_v41 }
 0x545   :  { %v1978_v50 = vpop.f32.mrf.mxu1 }
 0x547   :  { %v1979_v37 = vpop.f32.mrf.mxu1 }
 0x548   :  { %v1980_v44 = vadd.f32 %v1979_v37, %v1978_v50 }
 0x549   :  { %v2013_v11 = vpop.f32.mrf.mxu0 }
 0x54a   :  { %v1393_v22 = vadd.f32 %v1980_v44, %v1937_v17 }
 0x54b   :  { %v2014_v12 = vpop.f32.mrf.mxu0 }
 0x54c   :  { %v2015_v21 = vadd.f32 %v2014_v12, %v2013_v11 }
 0x54e   :  { %v1463_v43 = vadd.f32 %v2015_v21, %v1393_v22 }
 0x566   :  { %v2048_v13 = vpop.f32.mrf.mxu1 }
 0x568   :  { %v2049_v16 = vpop.f32.mrf.mxu1 }
 0x569   :  { %v2050_v24 = vadd.f32 %v2049_v16, %v2048_v13 }
 0x56b   :  { %v2083_v15 = vpop.f32.mrf.mxu0  ;;  %v1533_v28 = vadd.f32 %v2050_v24, %v1463_v43 }
 0x56d   :  { %v2084_v19 = vpop.f32.mrf.mxu0 }
 0x56e   :  { %v2085_v26 = vadd.f32 %v2084_v19, %v2083_v15 }
 0x570   :  { %v1603_v48 = vadd.f32 %v2085_v26, %v1533_v28 }
 0x588   :  { %v2118_v20 = vpop.f32.mrf.mxu1 }
 0x58a   :  { %v2119_v40 = vpop.f32.mrf.mxu1 }
 0x58b   :  { %v2120_v29 = vadd.f32 %v2119_v40, %v2118_v20 }
 0x58d   :  { %v2153_v2 = vpop.f32.mrf.mxu0  ;;  %v1673_v33 = vadd.f32 %v2120_v29, %v1603_v48 }
 0x58f   :  { %v2154_v27 = vpop.f32.mrf.mxu0 }
 0x590   :  { %v2155_v31 = vadd.f32 %v2154_v27, %v2153_v2 }
 0x592   :  { %v1743_v35 = vadd.f32 %v2155_v31, %v1673_v33 }
 0x5aa   :  { %v2188_v30 = vpop.f32.mrf.mxu1 }
 0x5ac   :  { %v2189_v32 = vpop.f32.mrf.mxu1 }
 0x5ad   :  { %v2190_v34 = vadd.f32 %v2189_v32, %v2188_v30 }
 0x5ae   :  { %v2223_v42 = vpop.f32.mrf.mxu0 }
 0x5af   :  { %v1813_v45 = vadd.f32 %v2190_v34, %v1743_v35 }
 0x5b0   :  { %v2224_v14 = vpop.f32.mrf.mxu0 }
 0x5b1   :  { %v2225_v47 = vadd.f32 %v2224_v14, %v2223_v42 }
 0x5b3   :  { %v1883_v55 = vadd.f32 %v2225_v47, %v1813_v45 }
 0x5b5   :  { %v1886_v49 = vadd.f32 %v1883_v55, %v2567_v25 }
 0x5b7   :  { %v1889_v51 = vsel %vm171_vm2, %v1886_v49, 0.0 }
 0x5b8   :  { %1890 = vadd.xlane.f32.xlu1 %v1889_v51 }
 0x641   :  { %v1891_v52 = vpop.xlane.xlu1 %1890 }
 0x642   :  { %v1892_v53 = vmul.f32 0.0625, %v1891_v52 }
 0x644   :  { %v1893_v59 = vsub.f32 %v1886_v49, %v1892_v53 }
 0x646   :  { %v1894_v54 = vmul.f32 %v1893_v59, %v1893_v59 }
 0x648   :  { %v1895_v0 = vsel %vm171_vm2, %v1894_v54, 0.0 }
 0x649   :  { %1896 = vadd.xlane.f32.xlu1 %v1895_v0 }
 0x6d2   :  { %v1897_v56 = vpop.xlane.xlu1 %1896 }
 0x6d3   :  { %v1898_v46 = vmul.f32 0.0625, %v1897_v56 }
 0x6d5   :  { %v1899_v57 = vadd.f32 1e-05, %v1898_v46 }
 0x6d7   :  { %2244 = vrsqrt.f32 %v1899_v57 }
 0x6e4   :  { %v2245_v58 = vpop.eup %2244 }
 0x6e5   :  { %v1901_v25 = vmul.f32 %v2245_v58, %v1893_v59 }
 0x6e7   :  { %v1908_v62 = vmul.f32 %v1938_v60, %v1901_v25 }
 0x6e9   :  { %v1915_v36 = vadd.f32 %v1939_v61, %v1908_v62 }
 0x6eb   :  { %1916 = vst.msk [vmem:[%s3502_s16] sm:$0xff] %vm171_vm2, %v1915_v36 }

// kernel: _lambda_.27
= control target key start
LH: loop header
LB: loop body
LE: loop exit
PB: predicated region body
PF: predicated region fallthrough
CT: control target
= control target key end

     0   :  { %v219_v0 = vmov 0.0   ;;  %vm220_vm0 = vmmov 0   ;;  %vm30_vm1 = vcmask 130048   ;;  %vm187_vm2 = vcmask 23552   ;;  %s277_s1 = inlined_call_operand.vmem [shape: f32[16,16], index: 1, kind: input, shape index: {}]   ;;  %s278_s0 = inlined_call_operand.vmem [shape: f32[8,16], index: 0, kind: input, shape index: {}]   ;;  %s279_s3 = inlined_call_operand.vmem [shape: f32[16,3], index: 3, kind: input, shape index: {}]   ;;  %s280_s2 = inlined_call_operand.vmem [shape: f32[1,16], index: 2, kind: input, shape index: {}]   ;;  %s281_s4 = inlined_call_operand.vmem [shape: f32[1,3], index: 4, kind: input, shape index: {}]   ;;  %s282_s5 = inlined_call_operand.vmem [shape: f32[8,3], index: 5, kind: output, shape index: {}]  }
   0x1   :  { %203 = vmatprep.subr.mxu0 %v219_v0  ;;  %v22_v1 = vld [vmem:[%s277_s1 + $0x8] sm:$0xff]  ;;  %v21_v2 = vld [vmem:[%s277_s1] sm:$0xff]  ;;  %207 = vmatprep.mubr.msk.f32.mxu0 %vm220_vm0, %v219_v0 }
   0x2   :  { %204 = vmatpush3.msra.mxu0 %v22_v1  ;;  %v20_v3 = vld [vmem:[%s278_s0] sm:$0xff]  ;;  %210 = vmatprep.subr.mxu1 %v219_v0  ;;  %v106_v4 = vld [vmem:[%s279_s3 + $0x8] sm:$0xff] }
   0x3   :  { %205 = vmatprep.subr.mxu0 %v219_v0  ;;  %214 = vmatprep.mubr.msk.f32.mxu1 %vm220_vm0, %v219_v0  ;;  %v105_v5 = vld [vmem:[%s279_s3] sm:$0xff] }
   0x4   :  { %206 = vmatpush3.msra.mxu0 %v21_v2  ;;  %211 = vmatpush3.msra.mxu1 %v106_v4  ;;  %v193_v6 = vld [vmem:[%s280_s2] ss:$0 sm:$0xff] }
   0x5   :  { %208 = vmatmul.mubr.msk.f32.vlgmr.msra.gmra.mxu0 %vm30_vm1, %v20_v3  ;;  %212 = vmatprep.subr.mxu1 %v219_v0  ;;  %v195_v11 = vld [vmem:[%s281_s4] ss:$0 sm:$0xff] }
   0x6   :  { %213 = vmatpush3.msra.mxu1 %v105_v5 }
  0xc5   :  { %v100_v7 = vpop.f32.mrf.mxu0 }
  0xc6   :  { %v101_v8 = vadd.f32 %v193_v6, %v100_v7 }
  0xc7   :  { %v209_v9 = vpop.f32.mrf.mxu0 }
  0xc8   :  { %v104_v10 = vmax.f32 %v101_v8, 0.0 }
  0xca   :  { %215 = vmatmul.mubr.msk.f32.vlgmr.msra.gmra.mxu1 %vm30_vm1, %v104_v10 }
 0x18a   :  { %v183_v12 = vpop.f32.mrf.mxu1 }
 0x18b   :  { %v184_v13 = vadd.f32 %v195_v11, %v183_v12 }
 0x18c   :  { %v216_v14 = vpop.f32.mrf.mxu1 }
 0x18d   :  { %188 = vst.msk [vmem:[%s282_s5] sm:$0xff] %vm187_vm2, %v184_v13 }

</bundles_post_ra>
